<compile_context>
chip_gen: v6e
topology: v6e:2x2x1
jax: 0.10.0
libtpu: 0.0.40
codegen_flags: <defaults>
</compile_context>

<pallas_src>
import functools

import jax
import jax.numpy as jnp
from jax.experimental import pallas as pl
from jax.experimental.pallas import tpu as pltpu

# MXU operand / conv_out storage dtype.  bf16 halves HBM/VMEM traffic and runs
# at full MXU rate; accumulation and all BatchNorm math stay in float32.  Set
# to jnp.float32 for tight (<2e-4) parity with the all-f32 reference.
_MXU_DTYPE = jnp.bfloat16

# Left column pad inside the conv scratch.  8 keeps the interior store
# sublane-aligned; the 3x3 taps read at column offsets _PW-1, _PW, _PW+1.
_PW = 8


def _conv_stats_kernel(x_ref, xt_ref, xb_ref, p_ref, pt_ref, pb_ref, w_ref,
                       y_ref, stats_ref, xpad):
    """One (batch image, row tile) per grid step.

      x_ref  : (1, TH, W, Cx)   upsampled-x rows of this tile        (bf16)
      xt_ref : (1, 1,  W, Cx)   row above the tile (clamped @ top)   (bf16)
      xb_ref : (1, 1,  W, Cx)   row below the tile (clamped @ bottom)(bf16)
      p_ref/pt_ref/pb_ref : same three for the skip connection       (bf16)
      w_ref  : (9*Cin, Cout)    tap-major im2col weight              (bf16)
      y_ref  : (1, Cout, TH*W)  conv output, channel-major/lane-dense
      stats_ref : (1, 1, 2, Cout)  row0 = sum, row1 = sum of squares (f32)
      xpad   : (TH+2, W+2*_PW, Cin) zero-padded concat scratch (VMEM)
    """
    r = pl.program_id(1)
    nrt = pl.num_programs(1)

    th, w = x_ref.shape[1], x_ref.shape[2]
    cx, cp = x_ref.shape[3], p_ref.shape[3]
    cin = cx + cp
    cout = w_ref.shape[1]

    # ---- fill the padded, channel-concatenated scratch for this row tile ----
    # Only one column on each side of the image is ever read by the taps; zero
    # those two 1-wide strips every step (cheap, and it keeps every grid step
    # self-contained so both grid axes are safe to shard across cores).
    xpad[:, _PW - 1:_PW, :] = jnp.zeros((th + 2, 1, cin), xpad.dtype)
    xpad[:, _PW + w:_PW + w + 1, :] = jnp.zeros((th + 2, 1, cin), xpad.dtype)

    # interior rows: fused channel concat (two lane-range stores, no HBM temp)
    xpad[1:1 + th, _PW:_PW + w, 0:cx] = x_ref[0]
    xpad[1:1 + th, _PW:_PW + w, cx:cin] = p_ref[0]

    # top halo row: real data for interior tiles, zero pad at the image top
    @pl.when(r > 0)
    def _():
        xpad[0:1, _PW:_PW + w, 0:cx] = xt_ref[0]
        xpad[0:1, _PW:_PW + w, cx:cin] = pt_ref[0]

    @pl.when(r == 0)
    def _():
        xpad[0:1, _PW:_PW + w, :] = jnp.zeros((1, w, cin), xpad.dtype)

    # bottom halo row
    @pl.when(r < nrt - 1)
    def _():
        xpad[th + 1:th + 2, _PW:_PW + w, 0:cx] = xb_ref[0]
        xpad[th + 1:th + 2, _PW:_PW + w, cx:cin] = pb_ref[0]

    @pl.when(r == nrt - 1)
    def _():
        xpad[th + 1:th + 2, _PW:_PW + w, :] = jnp.zeros((1, w, cin), xpad.dtype)

    # ---- 3x3 conv as 9 tap matmuls, f32 accumulation (no materialized im2col)
    acc = jnp.zeros((th * w, cout), jnp.float32)
    t = 0
    for dy in range(3):
        for dx in range(3):
            tap = xpad[dy:dy + th, _PW - 1 + dx:_PW - 1 + dx + w, :]  # (TH,W,Cin)
            tap = tap.reshape(th * w, cin)          # free when W % 8 == 0
            acc = acc + jnp.dot(tap, w_ref[t * cin:(t + 1) * cin, :],
                                preferred_element_type=jnp.float32)
            t += 1

    # ---- per-tile BatchNorm partial sums (finalized exactly in the wrapper) -
    stats_ref[0, 0, 0:1, :] = jnp.sum(acc, axis=0, keepdims=True)
    stats_ref[0, 0, 1:2, :] = jnp.sum(acc * acc, axis=0, keepdims=True)

    # ---- channel-major, lane-dense conv output (final NCHW layout then needs
    #      only free reshapes; pass 2 stores are unmasked full-lane stores) ----
    y_ref[0] = jnp.transpose(acc).astype(y_ref.dtype)


def _bn_relu_kernel(y_ref, scale_ref, shift_ref, o_ref):
    """Elementwise y*scale + shift, then ReLU.  Lane dim = spatial (dense)."""
    o_ref[...] = jnp.maximum(
        y_ref[...].astype(jnp.float32) * scale_ref[...] + shift_ref[...], 0.0)


def _pass1_vmem_bytes(th, w, cin, cout):
    """Rough per-grid-step VMEM footprint of pass 1 (for TH selection)."""
    it = jnp.dtype(_MXU_DTYPE).itemsize
    main_in = th * w * cin * it                 # x + prev main blocks
    halo_in = 4 * w * max(1, cin) * it          # four 1-row halo blocks
    wgt = 9 * cin * cout * it
    yout = th * w * cout * it
    dbl = 2 * (main_in + halo_in + wgt + yout)  # pipeline double-buffering
    scratch = (th + 2) * (w + 2 * _PW) * cin * it
    acc = th * w * cout * 4
    tap_tmp = 2 * th * w * cin * it
    return dbl + scratch + acc + tap_tmp + 4 * cout * 4


def _pick_row_tile(h, w, cin, cout, budget):
    """Largest TH dividing H whose pass-1 footprint fits `budget` (and keeps the
    lane-dense y block a multiple of 128)."""
    smallest_valid = h
    for th in range(h, 0, -1):
        if h % th:
            continue
        if th != h and (th * w) % 128:
            continue
        smallest_valid = th
        if _pass1_vmem_bytes(th, w, cin, cout) <= budget:
            return th
    return smallest_valid


def _largest_divisor(n, align, cap):
    """Largest divisor of n that is <= cap and a multiple of `align` (or n)."""
    for d in range(min(n, cap), 0, -1):
        if n % d == 0 and (d % align == 0 or d == n):
            return d
    return n


@functools.partial(jax.jit, static_argnames=("tile_rows",))
def basic_decoder_block(x, previous, conv_w, conv_b, bn_gamma, bn_beta,
                        tile_rows=None):
    """x: (N, Cx, H/2, W/2), previous: (N, Cp, H, W); NCHW f32 -> NCHW f32."""
    del conv_b  # exactly cancelled by training-mode BatchNorm mean subtraction

    n, cx, h2, w2 = x.shape
    _, cp, h, w = previous.shape
    assert h == 2 * h2 and w == 2 * w2, "previous must be 2x the size of x"
    cin = cx + cp
    cout = conv_w.shape[0]

    # ---- VMEM budget: v7x has 64 MiB per core, v5e/v6e 128 MiB --------------
    try:
        vmem_cap = int(pltpu.get_tpu_info().vmem_capacity_bytes)
    except Exception:
        vmem_cap = 64 * 1024 * 1024            # conservative: assume v7x
    vmem_limit = min(vmem_cap * 3 // 4, 100 * 1024 * 1024)
    tile_budget = int(vmem_limit * 0.55)

    if tile_rows is None:
        tile_rows = _pick_row_tile(h, w, cin, cout, tile_budget)
    assert h % tile_rows == 0, "tile_rows must divide H"
    th = tile_rows
    rt = h // th

    # ---- layout glue (XLA): NHWC inputs for the Cin-minor conv scratch ------
    # x is cast to bf16 *before* the nearest-x2 repeat so the materialized
    # upsampled intermediate is half as big as before; `previous` pays a single
    # fused transpose+cast.
    # TODO(synk): fold the nearest x2 upsample into the kernel (needs a strided
    # / interleaving scratch store which is not worth the lowering risk here).
    x_up = jnp.transpose(x, (0, 2, 3, 1)).astype(_MXU_DTYPE)
    x_up = jnp.repeat(jnp.repeat(x_up, 2, axis=1), 2, axis=2)      # (N,H,W,Cx)
    prev_nhwc = jnp.transpose(previous, (0, 2, 3, 1)).astype(_MXU_DTYPE)

    # conv weight (Cout, Cin, 3, 3) -> (9*Cin, Cout): tap-major, channel-minor
    w_mat = jnp.transpose(conv_w, (2, 3, 1, 0)).reshape(9 * cin, cout)
    w_mat = w_mat.astype(_MXU_DTYPE)

    row_map = lambda b, r: (b, r, 0, 0)
    top_map = lambda b, r: (b, jnp.maximum(r * th - 1, 0), 0, 0)     # 1-row halo
    bot_map = lambda b, r: (b, jnp.minimum((r + 1) * th, h - 1), 0, 0)

    itemsize = jnp.dtype(_MXU_DTYPE).itemsize
    cost = pl.CostEstimate(
        flops=2 * n * h * w * 9 * cin * cout,
        transcendentals=0,
        bytes_accessed=(x_up.size + prev_nhwc.size + w_mat.size
                        + n * h * w * cout) * itemsize + n * rt * 2 * cout * 4)

    # ---- pass 1: pad + concat + conv + BN partial sums, grid=(N, row tiles) -
    conv_y, stats = pl.pallas_call(
        _conv_stats_kernel,
        out_shape=(jax.ShapeDtypeStruct((n, cout, h * w), _MXU_DTYPE),
                   jax.ShapeDtypeStruct((n, rt, 2, cout), jnp.float32)),
        grid=(n, rt),
        in_specs=[pl.BlockSpec((1, th, w, cx), row_map),
                  pl.BlockSpec((1, 1, w, cx), top_map),
                  pl.BlockSpec((1, 1, w, cx), bot_map),
                  pl.BlockSpec((1, th, w, cp), row_map),
                  pl.BlockSpec((1, 1, w, cp), top_map),
                  pl.BlockSpec((1, 1, w, cp), bot_map),
                  pl.BlockSpec((9 * cin, cout), lambda b, r: (0, 0))],
        out_specs=(pl.BlockSpec((1, cout, th * w), lambda b, r: (b, 0, r)),
                   pl.BlockSpec((1, 1, 2, cout), lambda b, r: (b, r, 0, 0))),
        scratch_shapes=[pltpu.VMEM((th + 2, w + 2 * _PW, cin), _MXU_DTYPE)],
        compiler_params=pltpu.CompilerParams(
            dimension_semantics=("parallel", "parallel"),
            vmem_limit_bytes=int(vmem_limit)),
        cost_estimate=cost,
    )(x_up, x_up, x_up, prev_nhwc, prev_nhwc, prev_nhwc, w_mat)

    # ---- finalize training-mode BatchNorm statistics (tiny per-channel math)
    count = n * h * w
    ch_sum = jnp.sum(stats[:, :, 0, :], axis=(0, 1))
    ch_sq = jnp.sum(stats[:, :, 1, :], axis=(0, 1))
    mean = ch_sum / count
    # NOTE: E[x^2]-E[x]^2 in f32; switch to centered per-tile sums if tighter
    # parity with PyTorch's two-pass variance is ever required.
    var = jnp.maximum(ch_sq / count - mean * mean, 0.0)   # biased, as PyTorch
    scale = bn_gamma * jax.lax.rsqrt(var + 1e-5)
    shift = bn_beta - mean * scale

    # ---- pass 2: channel-major BN affine + ReLU (lane dim = spatial) --------
    rows = n * cout
    y2d = conv_y.reshape(rows, h * w)                      # free reshape
    scale_rows = jnp.tile(scale, n).reshape(rows, 1).astype(jnp.float32)
    shift_rows = jnp.tile(shift, n).reshape(rows, 1).astype(jnp.float32)

    tr = _largest_divisor(rows, 8, 512)
    tc_cap = max(128, (4 * 1024 * 1024) // (6 * tr))       # ~few-MiB blocks
    tc = _largest_divisor(h * w, 128, tc_cap)

    out2d = pl.pallas_call(
        _bn_relu_kernel,
        out_shape=jax.ShapeDtypeStruct((rows, h * w), jnp.float32),
        grid=(rows // tr, (h * w) // tc),
        in_specs=[pl.BlockSpec((tr, tc), lambda i, j: (i, j)),
                  pl.BlockSpec((tr, 1), lambda i, j: (i, 0)),
                  pl.BlockSpec((tr, 1), lambda i, j: (i, 0))],
        out_specs=pl.BlockSpec((tr, tc), lambda i, j: (i, j)),
        compiler_params=pltpu.CompilerParams(
            dimension_semantics=("parallel", "parallel"),
            vmem_limit_bytes=int(vmem_limit)),
    )(y2d, scale_rows, shift_rows)

    return out2d.reshape(n, cout, h, w)                    # free reshape: NCHW


def _reference(x, previous, conv_w, conv_b, bn_gamma, bn_beta):
    """Pure-JAX f32 replica of the PyTorch forward (sanity check)."""
    x_prime = jnp.repeat(jnp.repeat(x, 2, axis=2), 2, axis=3)
    combined = jnp.concatenate([x_prime, previous], axis=1)
    conv = jax.lax.conv_general_dilated(
        combined, conv_w, window_strides=(1, 1), padding=((1, 1), (1, 1)),
        dimension_numbers=("NCHW", "OIHW", "NCHW"))
    conv = conv + conv_b[None, :, None, None]
    mean = jnp.mean(conv, axis=(0, 2, 3), keepdims=True)
    var = jnp.mean((conv - mean) ** 2, axis=(0, 2, 3), keepdims=True)
    y = (conv - mean) * jax.lax.rsqrt(var + 1e-5)
    y = y * bn_gamma[None, :, None, None] + bn_beta[None, :, None, None]
    return jnp.maximum(y, 0.0)


if __name__ == "__main__":
    key = jax.random.PRNGKey(0)
    k_x, k_p, k_w, k_b, k_g, k_be = jax.random.split(key, 6)

    # x: low-res feature map, previous: skip connection at 2x resolution
    N, C_x, H2, W2 = 2, 4, 16, 16
    C_prev = 4
    in_ = C_x + C_prev
    out_ = 8

    x = jax.random.normal(k_x, (N, C_x, H2, W2), dtype=jnp.float32)
    previous = jax.random.normal(k_p, (N, C_prev, 2 * H2, 2 * W2),
                                 dtype=jnp.float32)
    conv_w = 0.1 * jax.random.normal(k_w, (out_, in_, 3, 3), dtype=jnp.float32)
    conv_b = 0.1 * jax.random.normal(k_b, (out_,), dtype=jnp.float32)
    bn_gamma = 1.0 + 0.1 * jax.random.normal(k_g, (out_,), dtype=jnp.float32)
    bn_beta = 0.1 * jax.random.normal(k_be, (out_,), dtype=jnp.float32)

    # tile_rows=8 -> 4 row tiles per image: exercises the halo / row-tiling path.
    out = basic_decoder_block(x, previous, conv_w, conv_b, bn_gamma, bn_beta,
                              tile_rows=8)
    out = jax.block_until_ready(out)

    ref = _reference(x, previous, conv_w, conv_b, bn_gamma, bn_beta)
    # bf16 MXU operands and bf16 conv_out storage (f32 accumulation / BN stats)
    # leave ~1e-2-level deviations vs the all-f32 reference; with
    # _MXU_DTYPE = jnp.float32 this passes at 2e-4.
    tol = 2e-4 if _MXU_DTYPE == jnp.float32 else 5e-2
    max_err = float(jnp.max(jnp.abs(out - ref)))
    assert out.shape == (N, out_, 2 * H2, 2 * W2), out.shape
    assert jnp.allclose(out, ref, atol=tol, rtol=tol), max_err

    print("KERNEL_OK")
</pallas_src>

<mosaic_0001>
module attributes {stable_mosaic.version = 11 : i64} {
  func.func @_conv_stats_kernel(%arg0: i32, %arg1: i32, %arg2: memref<1x8x32x4xbf16, #tpu.memory_space<vmem>>, %arg3: memref<1x1x32x4xbf16, #tpu.memory_space<vmem>>, %arg4: memref<1x1x32x4xbf16, #tpu.memory_space<vmem>>, %arg5: memref<1x8x32x4xbf16, #tpu.memory_space<vmem>>, %arg6: memref<1x1x32x4xbf16, #tpu.memory_space<vmem>>, %arg7: memref<1x1x32x4xbf16, #tpu.memory_space<vmem>>, %arg8: memref<72x8xbf16, #tpu.memory_space<vmem>>, %arg9: memref<1x8x256xbf16, #tpu.memory_space<vmem>>, %arg10: memref<1x1x2x8xf32, #tpu.memory_space<vmem>>, %arg11: memref<10x48x8xbf16, #tpu.memory_space<vmem>>) attributes {dimension_semantics = [#tpu.dimension_semantics<parallel>, #tpu.dimension_semantics<parallel>], iteration_bounds = array<i64: 2, 4>, scalar_prefetch = 0 : i64, scratch_operands = 1 : i64, tpu.core_type = #tpu.core_type<tc>, window_params = [{transform_indices = @transform_0, window_bounds = array<i64: 1, 8, 32, 4>}, {transform_indices = @transform_1, window_bounds = array<i64: 1, 1, 32, 4>}, {transform_indices = @transform_2, window_bounds = array<i64: 1, 1, 32, 4>}, {transform_indices = @transform_3, window_bounds = array<i64: 1, 8, 32, 4>}, {transform_indices = @transform_4, window_bounds = array<i64: 1, 1, 32, 4>}, {transform_indices = @transform_5, window_bounds = array<i64: 1, 1, 32, 4>}, {pipeline_mode = #tpu.pipeline_mode<synchronous>, transform_indices = @transform_6, window_bounds = array<i64: 72, 8>}, {transform_indices = @transform_7, window_bounds = array<i64: 1, 8, 256>}, {transform_indices = @transform_8, window_bounds = array<i64: 1, 1, 2, 8>}]} {
    %cst = arith.constant 0.000000e+00 : bf16
    %0 = vector.broadcast %cst : bf16 to vector<10x1x8xbf16>
    %c0 = arith.constant 0 : index
    %c7 = arith.constant 7 : index
    %c0_0 = arith.constant 0 : index
    %1 = vector.load %arg11[%c0, %c7, %c0_0] : memref<10x48x8xbf16, #tpu.memory_space<vmem>>, vector<10x1x8xbf16>
    tpu.vector_store %arg11[%c0, %c7, %c0_0], %0 {strides = array<i32>} : memref<10x48x8xbf16, #tpu.memory_space<vmem>>, vector<10x1x8xbf16>,
    %cst_1 = arith.constant 0.000000e+00 : bf16
    %2 = vector.broadcast %cst_1 : bf16 to vector<10x1x8xbf16>
    %c0_2 = arith.constant 0 : index
    %c40 = arith.constant 40 : index
    %c0_3 = arith.constant 0 : index
    %3 = vector.load %arg11[%c0_2, %c40, %c0_3] : memref<10x48x8xbf16, #tpu.memory_space<vmem>>, vector<10x1x8xbf16>
    tpu.vector_store %arg11[%c0_2, %c40, %c0_3], %2 {strides = array<i32>} : memref<10x48x8xbf16, #tpu.memory_space<vmem>>, vector<10x1x8xbf16>,
    %c0_4 = arith.constant 0 : index
    %c0_5 = arith.constant 0 : index
    %c0_6 = arith.constant 0 : index
    %c0_7 = arith.constant 0 : index
    %4 = vector.load %arg2[%c0_4, %c0_5, %c0_6, %c0_7] : memref<1x8x32x4xbf16, #tpu.memory_space<vmem>>, vector<1x8x32x4xbf16>
    %5 = vector.shape_cast %4 : vector<1x8x32x4xbf16> to vector<8x32x4xbf16>
    %c1 = arith.constant 1 : index
    %c8 = arith.constant 8 : index
    %c0_8 = arith.constant 0 : index
    %6 = vector.load %arg11[%c1, %c8, %c0_8] : memref<10x48x8xbf16, #tpu.memory_space<vmem>>, vector<8x32x4xbf16>
    tpu.vector_store %arg11[%c1, %c8, %c0_8], %5 {strides = array<i32>} : memref<10x48x8xbf16, #tpu.memory_space<vmem>>, vector<8x32x4xbf16>,
    %c0_9 = arith.constant 0 : index
    %c0_10 = arith.constant 0 : index
    %c0_11 = arith.constant 0 : index
    %c0_12 = arith.constant 0 : index
    %7 = vector.load %arg5[%c0_9, %c0_10, %c0_11, %c0_12] : memref<1x8x32x4xbf16, #tpu.memory_space<vmem>>, vector<1x8x32x4xbf16>
    %8 = vector.shape_cast %7 : vector<1x8x32x4xbf16> to vector<8x32x4xbf16>
    %c1_13 = arith.constant 1 : index
    %c8_14 = arith.constant 8 : index
    %c4 = arith.constant 4 : index
    %9 = vector.load %arg11[%c1_13, %c8_14, %c4] : memref<10x48x8xbf16, #tpu.memory_space<vmem>>, vector<8x32x4xbf16>
    tpu.vector_store %arg11[%c1_13, %c8_14, %c4], %8 {strides = array<i32>} : memref<10x48x8xbf16, #tpu.memory_space<vmem>>, vector<8x32x4xbf16>,
    %c0_i32 = arith.constant 0 : i32
    %10 = arith.cmpi sgt, %arg1, %c0_i32 : i32
    %11 = arith.extui %10 : i1 to i32
    %c0_i32_15 = arith.constant 0 : i32
    %12 = arith.cmpi ne, %11, %c0_i32_15 : i32
    scf.if %12 {
      %c0_81 = arith.constant 0 : index
      %c0_82 = arith.constant 0 : index
      %c0_83 = arith.constant 0 : index
      %c0_84 = arith.constant 0 : index
      %84 = vector.load %arg3[%c0_81, %c0_82, %c0_83, %c0_84] : memref<1x1x32x4xbf16, #tpu.memory_space<vmem>>, vector<1x1x32x4xbf16>
      %85 = vector.shape_cast %84 : vector<1x1x32x4xbf16> to vector<1x32x4xbf16>
      %c0_85 = arith.constant 0 : index
      %c8_86 = arith.constant 8 : index
      %c0_87 = arith.constant 0 : index
      %86 = vector.load %arg11[%c0_85, %c8_86, %c0_87] : memref<10x48x8xbf16, #tpu.memory_space<vmem>>, vector<1x32x4xbf16>
      tpu.vector_store %arg11[%c0_85, %c8_86, %c0_87], %85 {strides = array<i32>} : memref<10x48x8xbf16, #tpu.memory_space<vmem>>, vector<1x32x4xbf16>,
      %c0_88 = arith.constant 0 : index
      %c0_89 = arith.constant 0 : index
      %c0_90 = arith.constant 0 : index
      %c0_91 = arith.constant 0 : index
      %87 = vector.load %arg6[%c0_88, %c0_89, %c0_90, %c0_91] : memref<1x1x32x4xbf16, #tpu.memory_space<vmem>>, vector<1x1x32x4xbf16>
      %88 = vector.shape_cast %87 : vector<1x1x32x4xbf16> to vector<1x32x4xbf16>
      %c0_92 = arith.constant 0 : index
      %c8_93 = arith.constant 8 : index
      %c4_94 = arith.constant 4 : index
      %89 = vector.load %arg11[%c0_92, %c8_93, %c4_94] : memref<10x48x8xbf16, #tpu.memory_space<vmem>>, vector<1x32x4xbf16>
      tpu.vector_store %arg11[%c0_92, %c8_93, %c4_94], %88 {strides = array<i32>} : memref<10x48x8xbf16, #tpu.memory_space<vmem>>, vector<1x32x4xbf16>,
    } else {
    }
    %c0_i32_16 = arith.constant 0 : i32
    %13 = arith.cmpi eq, %arg1, %c0_i32_16 : i32
    %14 = arith.extui %13 : i1 to i32
    %c0_i32_17 = arith.constant 0 : i32
    %15 = arith.cmpi ne, %14, %c0_i32_17 : i32
    scf.if %15 {
      %cst_81 = arith.constant 0.000000e+00 : bf16
      %84 = vector.broadcast %cst_81 : bf16 to vector<1x32x8xbf16>
      %c0_82 = arith.constant 0 : index
      %c8_83 = arith.constant 8 : index
      %c0_84 = arith.constant 0 : index
      %85 = vector.load %arg11[%c0_82, %c8_83, %c0_84] : memref<10x48x8xbf16, #tpu.memory_space<vmem>>, vector<1x32x8xbf16>
      tpu.vector_store %arg11[%c0_82, %c8_83, %c0_84], %84 {strides = array<i32>} : memref<10x48x8xbf16, #tpu.memory_space<vmem>>, vector<1x32x8xbf16>,
    } else {
    }
    %c3_i32 = arith.constant 3 : i32
    %16 = arith.cmpi slt, %arg1, %c3_i32 : i32
    %17 = arith.extui %16 : i1 to i32
    %c0_i32_18 = arith.constant 0 : i32
    %18 = arith.cmpi ne, %17, %c0_i32_18 : i32
    scf.if %18 {
      %c0_81 = arith.constant 0 : index
      %c0_82 = arith.constant 0 : index
      %c0_83 = arith.constant 0 : index
      %c0_84 = arith.constant 0 : index
      %84 = vector.load %arg4[%c0_81, %c0_82, %c0_83, %c0_84] : memref<1x1x32x4xbf16, #tpu.memory_space<vmem>>, vector<1x1x32x4xbf16>
      %85 = vector.shape_cast %84 : vector<1x1x32x4xbf16> to vector<1x32x4xbf16>
      %c9_85 = arith.constant 9 : index
      %c8_86 = arith.constant 8 : index
      %c0_87 = arith.constant 0 : index
      %86 = vector.load %arg11[%c9_85, %c8_86, %c0_87] : memref<10x48x8xbf16, #tpu.memory_space<vmem>>, vector<1x32x4xbf16>
      tpu.vector_store %arg11[%c9_85, %c8_86, %c0_87], %85 {strides = array<i32>} : memref<10x48x8xbf16, #tpu.memory_space<vmem>>, vector<1x32x4xbf16>,
      %c0_88 = arith.constant 0 : index
      %c0_89 = arith.constant 0 : index
      %c0_90 = arith.constant 0 : index
      %c0_91 = arith.constant 0 : index
      %87 = vector.load %arg7[%c0_88, %c0_89, %c0_90, %c0_91] : memref<1x1x32x4xbf16, #tpu.memory_space<vmem>>, vector<1x1x32x4xbf16>
      %88 = vector.shape_cast %87 : vector<1x1x32x4xbf16> to vector<1x32x4xbf16>
      %c9_92 = arith.constant 9 : index
      %c8_93 = arith.constant 8 : index
      %c4_94 = arith.constant 4 : index
      %89 = vector.load %arg11[%c9_92, %c8_93, %c4_94] : memref<10x48x8xbf16, #tpu.memory_space<vmem>>, vector<1x32x4xbf16>
      tpu.vector_store %arg11[%c9_92, %c8_93, %c4_94], %88 {strides = array<i32>} : memref<10x48x8xbf16, #tpu.memory_space<vmem>>, vector<1x32x4xbf16>,
    } else {
    }
    %c3_i32_19 = arith.constant 3 : i32
    %19 = arith.cmpi eq, %arg1, %c3_i32_19 : i32
    %20 = arith.extui %19 : i1 to i32
    %c0_i32_20 = arith.constant 0 : i32
    %21 = arith.cmpi ne, %20, %c0_i32_20 : i32
    scf.if %21 {
      %cst_81 = arith.constant 0.000000e+00 : bf16
      %84 = vector.broadcast %cst_81 : bf16 to vector<1x32x8xbf16>
      %c9_82 = arith.constant 9 : index
      %c8_83 = arith.constant 8 : index
      %c0_84 = arith.constant 0 : index
      %85 = vector.load %arg11[%c9_82, %c8_83, %c0_84] : memref<10x48x8xbf16, #tpu.memory_space<vmem>>, vector<1x32x8xbf16>
      tpu.vector_store %arg11[%c9_82, %c8_83, %c0_84], %84 {strides = array<i32>} : memref<10x48x8xbf16, #tpu.memory_space<vmem>>, vector<1x32x8xbf16>,
    } else {
    }
    %cst_21 = arith.constant 0.000000e+00 : f32
    %22 = vector.broadcast %cst_21 : f32 to vector<256x8xf32>
    %c0_22 = arith.constant 0 : index
    %c7_23 = arith.constant 7 : index
    %c0_24 = arith.constant 0 : index
    %23 = vector.load %arg11[%c0_22, %c7_23, %c0_24] : memref<10x48x8xbf16, #tpu.memory_space<vmem>>, vector<8x32x8xbf16>
    %24 = vector.shape_cast %23 : vector<8x32x8xbf16> to vector<256x8xbf16>
    %c0_25 = arith.constant 0 : index
    %c0_26 = arith.constant 0 : index
    %25 = vector.load %arg8[%c0_25, %c0_26] : memref<72x8xbf16, #tpu.memory_space<vmem>>, vector<8x8xbf16>
    %cst_27 = arith.constant dense<0.000000e+00> : vector<256x8xf32>
    %26 = tpu.matmul %24, %25, %cst_27 {dimension_numbers = #tpu.dot_dimension_numbers<[1], [0], [0], [1], [0, 0, 1, 1], [], []>} : vector<256x8xbf16>, vector<8x8xbf16>, vector<256x8xf32> -> vector<256x8xf32>
    %27 = arith.addf %22, %26 : vector<256x8xf32>
    %c0_28 = arith.constant 0 : index
    %c8_29 = arith.constant 8 : index
    %c0_30 = arith.constant 0 : index
    %28 = vector.load %arg11[%c0_28, %c8_29, %c0_30] : memref<10x48x8xbf16, #tpu.memory_space<vmem>>, vector<8x32x8xbf16>
    %29 = vector.shape_cast %28 : vector<8x32x8xbf16> to vector<256x8xbf16>
    %c8_31 = arith.constant 8 : index
    %c0_32 = arith.constant 0 : index
    %30 = vector.load %arg8[%c8_31, %c0_32] : memref<72x8xbf16, #tpu.memory_space<vmem>>, vector<8x8xbf16>
    %cst_33 = arith.constant dense<0.000000e+00> : vector<256x8xf32>
    %31 = tpu.matmul %29, %30, %cst_33 {dimension_numbers = #tpu.dot_dimension_numbers<[1], [0], [0], [1], [0, 0, 1, 1], [], []>} : vector<256x8xbf16>, vector<8x8xbf16>, vector<256x8xf32> -> vector<256x8xf32>
    %32 = arith.addf %27, %31 : vector<256x8xf32>
    %c0_34 = arith.constant 0 : index
    %c9 = arith.constant 9 : index
    %c0_35 = arith.constant 0 : index
    %33 = vector.load %arg11[%c0_34, %c9, %c0_35] : memref<10x48x8xbf16, #tpu.memory_space<vmem>>, vector<8x32x8xbf16>
    %34 = vector.shape_cast %33 : vector<8x32x8xbf16> to vector<256x8xbf16>
    %c16 = arith.constant 16 : index
    %c0_36 = arith.constant 0 : index
    %35 = vector.load %arg8[%c16, %c0_36] : memref<72x8xbf16, #tpu.memory_space<vmem>>, vector<8x8xbf16>
    %cst_37 = arith.constant dense<0.000000e+00> : vector<256x8xf32>
    %36 = tpu.matmul %34, %35, %cst_37 {dimension_numbers = #tpu.dot_dimension_numbers<[1], [0], [0], [1], [0, 0, 1, 1], [], []>} : vector<256x8xbf16>, vector<8x8xbf16>, vector<256x8xf32> -> vector<256x8xf32>
    %37 = arith.addf %32, %36 : vector<256x8xf32>
    %c1_38 = arith.constant 1 : index
    %c7_39 = arith.constant 7 : index
    %c0_40 = arith.constant 0 : index
    %38 = vector.load %arg11[%c1_38, %c7_39, %c0_40] : memref<10x48x8xbf16, #tpu.memory_space<vmem>>, vector<8x32x8xbf16>
    %39 = vector.shape_cast %38 : vector<8x32x8xbf16> to vector<256x8xbf16>
    %c24 = arith.constant 24 : index
    %c0_41 = arith.constant 0 : index
    %40 = vector.load %arg8[%c24, %c0_41] : memref<72x8xbf16, #tpu.memory_space<vmem>>, vector<8x8xbf16>
    %cst_42 = arith.constant dense<0.000000e+00> : vector<256x8xf32>
    %41 = tpu.matmul %39, %40, %cst_42 {dimension_numbers = #tpu.dot_dimension_numbers<[1], [0], [0], [1], [0, 0, 1, 1], [], []>} : vector<256x8xbf16>, vector<8x8xbf16>, vector<256x8xf32> -> vector<256x8xf32>
    %42 = arith.addf %37, %41 : vector<256x8xf32>
    %c1_43 = arith.constant 1 : index
    %c8_44 = arith.constant 8 : index
    %c0_45 = arith.constant 0 : index
    %43 = vector.load %arg11[%c1_43, %c8_44, %c0_45] : memref<10x48x8xbf16, #tpu.memory_space<vmem>>, vector<8x32x8xbf16>
    %44 = vector.shape_cast %43 : vector<8x32x8xbf16> to vector<256x8xbf16>
    %c32 = arith.constant 32 : index
    %c0_46 = arith.constant 0 : index
    %45 = vector.load %arg8[%c32, %c0_46] : memref<72x8xbf16, #tpu.memory_space<vmem>>, vector<8x8xbf16>
    %cst_47 = arith.constant dense<0.000000e+00> : vector<256x8xf32>
    %46 = tpu.matmul %44, %45, %cst_47 {dimension_numbers = #tpu.dot_dimension_numbers<[1], [0], [0], [1], [0, 0, 1, 1], [], []>} : vector<256x8xbf16>, vector<8x8xbf16>, vector<256x8xf32> -> vector<256x8xf32>
    %47 = arith.addf %42, %46 : vector<256x8xf32>
    %c1_48 = arith.constant 1 : index
    %c9_49 = arith.constant 9 : index
    %c0_50 = arith.constant 0 : index
    %48 = vector.load %arg11[%c1_48, %c9_49, %c0_50] : memref<10x48x8xbf16, #tpu.memory_space<vmem>>, vector<8x32x8xbf16>
    %49 = vector.shape_cast %48 : vector<8x32x8xbf16> to vector<256x8xbf16>
    %c40_51 = arith.constant 40 : index
    %c0_52 = arith.constant 0 : index
    %50 = vector.load %arg8[%c40_51, %c0_52] : memref<72x8xbf16, #tpu.memory_space<vmem>>, vector<8x8xbf16>
    %cst_53 = arith.constant dense<0.000000e+00> : vector<256x8xf32>
    %51 = tpu.matmul %49, %50, %cst_53 {dimension_numbers = #tpu.dot_dimension_numbers<[1], [0], [0], [1], [0, 0, 1, 1], [], []>} : vector<256x8xbf16>, vector<8x8xbf16>, vector<256x8xf32> -> vector<256x8xf32>
    %52 = arith.addf %47, %51 : vector<256x8xf32>
    %c2 = arith.constant 2 : index
    %c7_54 = arith.constant 7 : index
    %c0_55 = arith.constant 0 : index
    %53 = vector.load %arg11[%c2, %c7_54, %c0_55] : memref<10x48x8xbf16, #tpu.memory_space<vmem>>, vector<8x32x8xbf16>
    %54 = vector.shape_cast %53 : vector<8x32x8xbf16> to vector<256x8xbf16>
    %c48 = arith.constant 48 : index
    %c0_56 = arith.constant 0 : index
    %55 = vector.load %arg8[%c48, %c0_56] : memref<72x8xbf16, #tpu.memory_space<vmem>>, vector<8x8xbf16>
    %cst_57 = arith.constant dense<0.000000e+00> : vector<256x8xf32>
    %56 = tpu.matmul %54, %55, %cst_57 {dimension_numbers = #tpu.dot_dimension_numbers<[1], [0], [0], [1], [0, 0, 1, 1], [], []>} : vector<256x8xbf16>, vector<8x8xbf16>, vector<256x8xf32> -> vector<256x8xf32>
    %57 = arith.addf %52, %56 : vector<256x8xf32>
    %c2_58 = arith.constant 2 : index
    %c8_59 = arith.constant 8 : index
    %c0_60 = arith.constant 0 : index
    %58 = vector.load %arg11[%c2_58, %c8_59, %c0_60] : memref<10x48x8xbf16, #tpu.memory_space<vmem>>, vector<8x32x8xbf16>
    %59 = vector.shape_cast %58 : vector<8x32x8xbf16> to vector<256x8xbf16>
    %c56 = arith.constant 56 : index
    %c0_61 = arith.constant 0 : index
    %60 = vector.load %arg8[%c56, %c0_61] : memref<72x8xbf16, #tpu.memory_space<vmem>>, vector<8x8xbf16>
    %cst_62 = arith.constant dense<0.000000e+00> : vector<256x8xf32>
    %61 = tpu.matmul %59, %60, %cst_62 {dimension_numbers = #tpu.dot_dimension_numbers<[1], [0], [0], [1], [0, 0, 1, 1], [], []>} : vector<256x8xbf16>, vector<8x8xbf16>, vector<256x8xf32> -> vector<256x8xf32>
    %62 = arith.addf %57, %61 : vector<256x8xf32>
    %c2_63 = arith.constant 2 : index
    %c9_64 = arith.constant 9 : index
    %c0_65 = arith.constant 0 : index
    %63 = vector.load %arg11[%c2_63, %c9_64, %c0_65] : memref<10x48x8xbf16, #tpu.memory_space<vmem>>, vector<8x32x8xbf16>
    %64 = vector.shape_cast %63 : vector<8x32x8xbf16> to vector<256x8xbf16>
    %c64 = arith.constant 64 : index
    %c0_66 = arith.constant 0 : index
    %65 = vector.load %arg8[%c64, %c0_66] : memref<72x8xbf16, #tpu.memory_space<vmem>>, vector<8x8xbf16>
    %cst_67 = arith.constant dense<0.000000e+00> : vector<256x8xf32>
    %66 = tpu.matmul %64, %65, %cst_67 {dimension_numbers = #tpu.dot_dimension_numbers<[1], [0], [0], [1], [0, 0, 1, 1], [], []>} : vector<256x8xbf16>, vector<8x8xbf16>, vector<256x8xf32> -> vector<256x8xf32>
    %67 = arith.addf %62, %66 : vector<256x8xf32>
    %cst_68 = arith.constant dense<0.000000e+00> : vector<8xf32>
    %68 = vector.multi_reduction <add>, %67, %cst_68 [0] : vector<256x8xf32> to vector<8xf32>
    %69 = vector.shape_cast %68 : vector<8xf32> to vector<1x8xf32>
    %c0_69 = arith.constant 0 : index
    %c0_70 = arith.constant 0 : index
    %c0_71 = arith.constant 0 : index
    %c0_72 = arith.constant 0 : index
    %70 = vector.load %arg10[%c0_69, %c0_70, %c0_71, %c0_72] : memref<1x1x2x8xf32, #tpu.memory_space<vmem>>, vector<1x1x1x8xf32>
    %71 = vector.shape_cast %70 : vector<1x1x1x8xf32> to vector<1x8xf32>
    %72 = vector.shape_cast %69 : vector<1x8xf32> to vector<1x1x1x8xf32>
    tpu.vector_store %arg10[%c0_69, %c0_70, %c0_71, %c0_72], %72 {strides = array<i32>} : memref<1x1x2x8xf32, #tpu.memory_space<vmem>>, vector<1x1x1x8xf32>,
    %73 = arith.mulf %67, %67 : vector<256x8xf32>
    %cst_73 = arith.constant dense<0.000000e+00> : vector<8xf32>
    %74 = vector.multi_reduction <add>, %73, %cst_73 [0] : vector<256x8xf32> to vector<8xf32>
    %75 = vector.shape_cast %74 : vector<8xf32> to vector<1x8xf32>
    %c0_74 = arith.constant 0 : index
    %c0_75 = arith.constant 0 : index
    %c1_76 = arith.constant 1 : index
    %c0_77 = arith.constant 0 : index
    %76 = vector.load %arg10[%c0_74, %c0_75, %c1_76, %c0_77] : memref<1x1x2x8xf32, #tpu.memory_space<vmem>>, vector<1x1x1x8xf32>
    %77 = vector.shape_cast %76 : vector<1x1x1x8xf32> to vector<1x8xf32>
    %78 = vector.shape_cast %75 : vector<1x8xf32> to vector<1x1x1x8xf32>
    tpu.vector_store %arg10[%c0_74, %c0_75, %c1_76, %c0_77], %78 {strides = array<i32>} : memref<1x1x2x8xf32, #tpu.memory_space<vmem>>, vector<1x1x1x8xf32>,
    %79 = tpu.transpose %67, [1, 0] : vector<256x8xf32> -> vector<8x256xf32>
    %80 = arith.truncf %79 : vector<8x256xf32> to vector<8x256xbf16>
    %c0_78 = arith.constant 0 : index
    %c0_79 = arith.constant 0 : index
    %c0_80 = arith.constant 0 : index
    %81 = vector.load %arg9[%c0_78, %c0_79, %c0_80] : memref<1x8x256xbf16, #tpu.memory_space<vmem>>, vector<1x8x256xbf16>
    %82 = vector.shape_cast %81 : vector<1x8x256xbf16> to vector<8x256xbf16>
    %83 = vector.shape_cast %80 : vector<8x256xbf16> to vector<1x8x256xbf16>
    tpu.vector_store %arg9[%c0_78, %c0_79, %c0_80], %83 {strides = array<i32>} : memref<1x8x256xbf16, #tpu.memory_space<vmem>>, vector<1x8x256xbf16>,
    return
  }
  func.func @transform_0(%arg0: i32, %arg1: i32) -> (i32, i32, i32, i32) {
    %c0_i32 = arith.constant 0 : i32
    %c0_i32_0 = arith.constant 0 : i32
    %c0_i32_1 = arith.constant 0 : i32
    return %arg0, %arg1, %c0_i32, %c0_i32_0 : i32, i32, i32, i32
  }
  func.func @transform_1(%arg0: i32, %arg1: i32) -> (i32, i32, i32, i32) {
    %c8_i32 = arith.constant 8 : i32
    %0 = arith.muli %arg1, %c8_i32 : i32
    %c1_i32 = arith.constant 1 : i32
    %1 = arith.subi %0, %c1_i32 : i32
    %c0_i32 = arith.constant 0 : i32
    %2 = arith.maxsi %1, %c0_i32 : i32
    %c0_i32_0 = arith.constant 0 : i32
    %c0_i32_1 = arith.constant 0 : i32
    %c0_i32_2 = arith.constant 0 : i32
    return %arg0, %2, %c0_i32_0, %c0_i32_1 : i32, i32, i32, i32
  }
  func.func @transform_2(%arg0: i32, %arg1: i32) -> (i32, i32, i32, i32) {
    %c1_i32 = arith.constant 1 : i32
    %0 = arith.addi %arg1, %c1_i32 : i32
    %c8_i32 = arith.constant 8 : i32
    %1 = arith.muli %0, %c8_i32 : i32
    %c31_i32 = arith.constant 31 : i32
    %2 = arith.minsi %1, %c31_i32 : i32
    %c0_i32 = arith.constant 0 : i32
    %c0_i32_0 = arith.constant 0 : i32
    %c0_i32_1 = arith.constant 0 : i32
    return %arg0, %2, %c0_i32, %c0_i32_0 : i32, i32, i32, i32
  }
  func.func @transform_3(%arg0: i32, %arg1: i32) -> (i32, i32, i32, i32) {
    %c0_i32 = arith.constant 0 : i32
    %c0_i32_0 = arith.constant 0 : i32
    %c0_i32_1 = arith.constant 0 : i32
    return %arg0, %arg1, %c0_i32, %c0_i32_0 : i32, i32, i32, i32
  }
  func.func @transform_4(%arg0: i32, %arg1: i32) -> (i32, i32, i32, i32) {
    %c8_i32 = arith.constant 8 : i32
    %0 = arith.muli %arg1, %c8_i32 : i32
    %c1_i32 = arith.constant 1 : i32
    %1 = arith.subi %0, %c1_i32 : i32
    %c0_i32 = arith.constant 0 : i32
    %2 = arith.maxsi %1, %c0_i32 : i32
    %c0_i32_0 = arith.constant 0 : i32
    %c0_i32_1 = arith.constant 0 : i32
    %c0_i32_2 = arith.constant 0 : i32
    return %arg0, %2, %c0_i32_0, %c0_i32_1 : i32, i32, i32, i32
  }
  func.func @transform_5(%arg0: i32, %arg1: i32) -> (i32, i32, i32, i32) {
    %c1_i32 = arith.constant 1 : i32
    %0 = arith.addi %arg1, %c1_i32 : i32
    %c8_i32 = arith.constant 8 : i32
    %1 = arith.muli %0, %c8_i32 : i32
    %c31_i32 = arith.constant 31 : i32
    %2 = arith.minsi %1, %c31_i32 : i32
    %c0_i32 = arith.constant 0 : i32
    %c0_i32_0 = arith.constant 0 : i32
    %c0_i32_1 = arith.constant 0 : i32
    return %arg0, %2, %c0_i32, %c0_i32_0 : i32, i32, i32, i32
  }
  func.func @transform_6(%arg0: i32, %arg1: i32) -> (i32, i32) {
    %c0_i32 = arith.constant 0 : i32
    %c0_i32_0 = arith.constant 0 : i32
    %c0_i32_1 = arith.constant 0 : i32
    return %c0_i32, %c0_i32_0 : i32, i32
  }
  func.func @transform_7(%arg0: i32, %arg1: i32) -> (i32, i32, i32) {
    %c0_i32 = arith.constant 0 : i32
    %c0_i32_0 = arith.constant 0 : i32
    return %arg0, %c0_i32, %arg1 : i32, i32, i32
  }
  func.func @transform_8(%arg0: i32, %arg1: i32) -> (i32, i32, i32, i32) {
    %c0_i32 = arith.constant 0 : i32
    %c0_i32_0 = arith.constant 0 : i32
    %c0_i32_1 = arith.constant 0 : i32
    return %arg0, %arg1, %c0_i32, %c0_i32_0 : i32, i32, i32, i32
  }
}

module attributes {stable_mosaic.version = 11 : i64} {
  func.func @_bn_relu_kernel(%arg0: i32, %arg1: i32, %arg2: memref<16x1024xbf16, #tpu.memory_space<vmem>>, %arg3: memref<16x1xf32, #tpu.memory_space<vmem>>, %arg4: memref<16x1xf32, #tpu.memory_space<vmem>>, %arg5: memref<16x1024xf32, #tpu.memory_space<vmem>>) attributes {dimension_semantics = [#tpu.dimension_semantics<parallel>, #tpu.dimension_semantics<parallel>], iteration_bounds = array<i64: 1, 1>, scalar_prefetch = 0 : i64, scratch_operands = 0 : i64, tpu.core_type = #tpu.core_type<tc>, window_params = [{transform_indices = @transform_0, window_bounds = array<i64: 16, 1024>}, {transform_indices = @transform_1, window_bounds = array<i64: 16, 1>}, {transform_indices = @transform_2, window_bounds = array<i64: 16, 1>}, {transform_indices = @transform_3, window_bounds = array<i64: 16, 1024>}]} {
    %c0 = arith.constant 0 : index
    %c0_0 = arith.constant 0 : index
    %0 = vector.load %arg2[%c0, %c0_0] : memref<16x1024xbf16, #tpu.memory_space<vmem>>, vector<16x1024xbf16>
    %1 = arith.extf %0 : vector<16x1024xbf16> to vector<16x1024xf32>
    %c0_1 = arith.constant 0 : index
    %c0_2 = arith.constant 0 : index
    %2 = vector.load %arg3[%c0_1, %c0_2] : memref<16x1xf32, #tpu.memory_space<vmem>>, vector<16x1xf32>
    %3 = vector.broadcast %2 : vector<16x1xf32> to vector<16x1024xf32>
    %4 = arith.mulf %1, %3 : vector<16x1024xf32>
    %c0_3 = arith.constant 0 : index
    %c0_4 = arith.constant 0 : index
    %5 = vector.load %arg4[%c0_3, %c0_4] : memref<16x1xf32, #tpu.memory_space<vmem>>, vector<16x1xf32>
    %6 = vector.broadcast %5 : vector<16x1xf32> to vector<16x1024xf32>
    %7 = arith.addf %4, %6 : vector<16x1024xf32>
    %cst = arith.constant 0.000000e+00 : f32
    %8 = vector.broadcast %cst : f32 to vector<16x1024xf32>
    %9 = arith.maximumf %7, %8 : vector<16x1024xf32>
    %c0_5 = arith.constant 0 : index
    %c0_6 = arith.constant 0 : index
    %10 = vector.load %arg5[%c0_5, %c0_6] : memref<16x1024xf32, #tpu.memory_space<vmem>>, vector<16x1024xf32>
    tpu.vector_store %arg5[%c0_5, %c0_6], %9 {strides = array<i32>} : memref<16x1024xf32, #tpu.memory_space<vmem>>, vector<16x1024xf32>,
    return
  }
  func.func @transform_0(%arg0: i32, %arg1: i32) -> (i32, i32) {
    %c0_i32 = arith.constant 0 : i32
    return %arg0, %arg1 : i32, i32
  }
  func.func @transform_1(%arg0: i32, %arg1: i32) -> (i32, i32) {
    %c0_i32 = arith.constant 0 : i32
    %c0_i32_0 = arith.constant 0 : i32
    return %arg0, %c0_i32 : i32, i32
  }
  func.func @transform_2(%arg0: i32, %arg1: i32) -> (i32, i32) {
    %c0_i32 = arith.constant 0 : i32
    %c0_i32_0 = arith.constant 0 : i32
    return %arg0, %c0_i32 : i32, i32
  }
  func.func @transform_3(%arg0: i32, %arg1: i32) -> (i32, i32) {
    %c0_i32 = arith.constant 0 : i32
    return %arg0, %arg1 : i32, i32
  }
}

</mosaic_0001>

<bundles_post_ra>
// kernel: tile.13
= control target key start
LH: loop header
LB: loop body
LE: loop exit
PB: predicated region body
PF: predicated region fallthrough
CT: control target
= control target key end

     0   :  { %s22_s0 = inlined_call_operand.vmem [shape: f32[8], index: 0, kind: input, shape index: {}]   ;;  %s23_s1 = inlined_call_operand.vmem [shape: f32[2,8], index: 1, kind: output, shape index: {}]  }
   0x1   :  { %v4_v0 = vld [vmem:[%s22_s0] ss:$0 sm:$0xff] }
   0x2   :  { %5 = vst [vmem:[%s23_s1] sm:$0x3] %v4_v0 }

// kernel: tile.0
= control target key start
LH: loop header
LB: loop body
LE: loop exit
PB: predicated region body
PF: predicated region fallthrough
CT: control target
= control target key end

     0   :  { %s67_s8 = smov 125   ;;  %vm8_vm0 = vcmask 7168   ;;  %s68_s11 = smov 126   ;;  %s118_s0 = inlined_call_operand.vmem [shape: f32[2,8], index: 0, kind: input, shape index: {}]   ;;  %s119_s1 = inlined_call_operand.vmem [shape: f32[16,1], index: 1, kind: output, shape index: {}]  }
   0x1   :  { %v5_v0 = vld [vmem:[%s118_s0] sm:$0x3]  ;;  %s66_s0 = smov 127   ;;  %s69_s12 = smov 124  }
   0x2   :  { %6 = vst [vmem:[#allocation0] sm:$0x3] %v5_v0  ;;  %s70_s13 = smov 123   ;;  %s71_s14 = smov 122  }
   0x3   :  { %s72_s15 = smov 121  }
   0x9   :  { %v10_v1 = vld [vmem:[#allocation0] sm:$0x3]  }
   0xa   :  { %v22_v2 = vld [vmem:[#allocation0] sm:$0x3]   ;;  %11 = vrot.lane.b32.xlu0 %v10_v1, %s66_s0 }
   0xb   :  { %23 = vrot.lane.b32.xlu1 %v22_v2, %s67_s8  ;;  %v16_v3 = vld [vmem:[#allocation0] sm:$0x3]  }
   0xc   :  { %v28_v4 = vld [vmem:[#allocation0] sm:$0x3]  }
   0xd   :  { %v7_v5 = vld [vmem:[#allocation0] sm:$0x3]  }
   0xe   :  { %9 = vst.msk [vmem:[%s119_s1] ss:$8 sm:$0x3] %vm8_vm0, %v7_v5   ;;  %17 = vrot.lane.b32.xlu0 %v16_v3, %s68_s11  ;;  %v34_v6 = vld [vmem:[#allocation0] sm:$0x3]  }
   0xf   :  { %29 = vrot.lane.b32.xlu1 %v28_v4, %s69_s12  ;;  %v40_v7 = vld [vmem:[#allocation0] sm:$0x3]  }
  0x10   :  { %v46_v8 = vld [vmem:[#allocation0] sm:$0x3]  }
  0x12   :  { %35 = vrot.lane.b32.xlu0 %v34_v6, %s70_s13 }
  0x13   :  { %41 = vrot.lane.b32.xlu1 %v40_v7, %s71_s14 }
  0x16   :  { %47 = vrot.lane.b32.xlu0 %v46_v8, %s72_s15 }
  0x7c   :  { %v12_v9 = vpop.permute.xlu0 %11  }
  0x7d   :  { %v24_v10 = vpop.permute.xlu1 %23   ;;  %52 = vst.msk [vmem:[%s119_s1 + $0x1] ss:$8 sm:$0x3] %vm8_vm0, %v12_v9  }
  0x7e   :  { %54 = vst.msk [vmem:[%s119_s1 + $0x3] ss:$8 sm:$0x3] %vm8_vm0, %v24_v10  }
  0x80   :  { %v18_v11 = vpop.permute.xlu0 %17  }
  0x81   :  { %v30_v12 = vpop.permute.xlu1 %29   ;;  %53 = vst.msk [vmem:[%s119_s1 + $0x2] ss:$8 sm:$0x3] %vm8_vm0, %v18_v11  }
  0x82   :  { %55 = vst.msk [vmem:[%s119_s1 + $0x4] ss:$8 sm:$0x3] %vm8_vm0, %v30_v12  }
  0x84   :  { %v36_v13 = vpop.permute.xlu0 %35  }
  0x85   :  { %v42_v14 = vpop.permute.xlu1 %41   ;;  %56 = vst.msk [vmem:[%s119_s1 + $0x5] ss:$8 sm:$0x3] %vm8_vm0, %v36_v13  }
  0x86   :  { %57 = vst.msk [vmem:[%s119_s1 + $0x6] ss:$8 sm:$0x3] %vm8_vm0, %v42_v14  }
  0x88   :  { %v48_v15 = vpop.permute.xlu0 %47  }
  0x89   :  { %58 = vst.msk [vmem:[%s119_s1 + $0x7] ss:$8 sm:$0x3] %vm8_vm0, %v48_v15  }

// kernel: basic_decoder_block.3
= control target key start
LH: loop header
LB: loop body
LE: loop exit
PB: predicated region body
PF: predicated region fallthrough
CT: control target
= control target key end

     0   :  { %v133_v0 = vmov 0   ;;  %s238_s2 = inlined_call_operand.vmem [shape: f32[16,1], index: 2, kind: input, shape index: {}]   ;;  %s239_s1 = inlined_call_operand.vmem [shape: f32[16,1], index: 1, kind: input, shape index: {}]   ;;  %s240_s0 = inlined_call_operand.vmem [shape: bf16[16,1024], index: 0, kind: input, shape index: {}]   ;;  %s241_s3 = inlined_call_operand.vmem [shape: f32[16,1024], index: 3, kind: output, shape index: {}]  }
   0x1   :  { %132 = vset.pattern.permute.xlu1 %v133_v0  ;;  %131 = vset.pattern.permute.xlu0 %v133_v0  ;;  %v66_v1 = vld [vmem:[%s238_s2] sm:$0xff]  ;;  %v67_v3 = vld [vmem:[%s238_s2 + $0x8] sm:$0xff]  ;;  %v16_v7 = vld [vmem:[%s240_s0 + $0x10] sm:$0xff] }
   0x2   :  { %v38_v2 = vld [vmem:[%s239_s1] sm:$0xff]  ;;  %70 = vperm.xlu1 %132, %v66_v1   ;;  %v39_v4 = vld [vmem:[%s239_s1 + $0x8] sm:$0xff]  ;;  %v17_v8 = vld [vmem:[%s240_s0 + $0x18] sm:$0xff]  ;;  %v26_v17 = vunpack.c.l.bf16 %v16_v7  ;;  %v27_v18 = vunpack.c.h.bf16 %v16_v7 }
   0x3   :  { %42 = vperm.xlu0 %131, %v38_v2   ;;  %v14_v5 = vld [vmem:[%s240_s0] sm:$0xff]  ;;  %v15_v6 = vld [vmem:[%s240_s0 + $0x8] sm:$0xff]  ;;  %v20_v15 = vld [vmem:[%s240_s0 + $0x30] sm:$0xff]  ;;  %v28_v19 = vunpack.c.l.bf16 %v17_v8  ;;  %v29_v20 = vunpack.c.h.bf16 %v17_v8 }
   0x4   :  { %v18_v9 = vld [vmem:[%s240_s0 + $0x20] sm:$0xff]  ;;  %v19_v10 = vld [vmem:[%s240_s0 + $0x28] sm:$0xff]  ;;  %v22_v11 = vunpack.c.l.bf16 %v14_v5  ;;  %v23_v12 = vunpack.c.h.bf16 %v14_v5  ;;  %v24_v13 = vunpack.c.l.bf16 %v15_v6  ;;  %v25_v14 = vunpack.c.h.bf16 %v15_v6  ;;  %v21_v16 = vld [vmem:[%s240_s0 + $0x38] sm:$0xff] }
   0x5   :  { %v30_v21 = vunpack.c.l.bf16 %v18_v9  ;;  %v31_v22 = vunpack.c.h.bf16 %v18_v9  ;;  %v32_v23 = vunpack.c.l.bf16 %v19_v10  ;;  %v33_v24 = vunpack.c.h.bf16 %v19_v10 }
   0x6   :  { %75 = vperm.xlu1 %132, %v67_v3   ;;  %v34_v26 = vunpack.c.l.bf16 %v20_v15  ;;  %v35_v27 = vunpack.c.h.bf16 %v20_v15  ;;  %v36_v28 = vunpack.c.l.bf16 %v21_v16  ;;  %v37_v29 = vunpack.c.h.bf16 %v21_v16 }
   0x7   :  { %47 = vperm.xlu0 %131, %v39_v4  }
  0x7d   :  { %v71_v34 = vpop.permute.xlu1 %70 }
  0x7e   :  { %v43_v25 = vpop.permute.xlu0 %42 }
  0x7f   :  { %v50_v30 = vmul.f32 %v43_v25, %v22_v11  ;;  %v51_v31 = vmul.f32 %v43_v25, %v23_v12  ;;  %v52_v32 = vmul.f32 %v43_v25, %v24_v13  ;;  %v53_v33 = vmul.f32 %v43_v25, %v25_v14 }
  0x80   :  { %v54_v35 = vmul.f32 %v43_v25, %v26_v17  ;;  %v55_v36 = vmul.f32 %v43_v25, %v27_v18  ;;  %v56_v37 = vmul.f32 %v43_v25, %v28_v19  ;;  %v57_v38 = vmul.f32 %v43_v25, %v29_v20 }
  0x81   :  { %v78_v39 = vadd.f32 %v71_v34, %v50_v30  ;;  %v79_v40 = vadd.f32 %v71_v34, %v51_v31  ;;  %v80_v41 = vadd.f32 %v71_v34, %v52_v32  ;;  %v81_v42 = vadd.f32 %v71_v34, %v53_v33  ;;  %v76_v60 = vpop.permute.xlu1 %75 }
  0x82   :  { %v82_v43 = vadd.f32 %v71_v34, %v54_v35  ;;  %v83_v44 = vadd.f32 %v71_v34, %v55_v36  ;;  %v84_v45 = vadd.f32 %v71_v34, %v56_v37  ;;  %v85_v46 = vadd.f32 %v71_v34, %v57_v38  ;;  %v48_v47 = vpop.permute.xlu0 %47 }
  0x83   :  { %v94_v48 = vmax.f32 %v78_v39, 0.0  ;;  %v95_v49 = vmax.f32 %v79_v40, 0.0  ;;  %v96_v50 = vmax.f32 %v80_v41, 0.0  ;;  %v97_v51 = vmax.f32 %v81_v42, 0.0 }
  0x84   :  { %v98_v52 = vmax.f32 %v82_v43, 0.0  ;;  %v99_v53 = vmax.f32 %v83_v44, 0.0  ;;  %v100_v54 = vmax.f32 %v84_v45, 0.0  ;;  %v101_v55 = vmax.f32 %v85_v46, 0.0 }
  0x85   :  { %110 = vst [vmem:[%s241_s3] sm:$0xff] %v94_v48  ;;  %111 = vst [vmem:[%s241_s3 + $0x8] sm:$0xff] %v95_v49  ;;  %v58_v56 = vmul.f32 %v48_v47, %v30_v21  ;;  %v59_v57 = vmul.f32 %v48_v47, %v31_v22  ;;  %v60_v58 = vmul.f32 %v48_v47, %v32_v23 }
  0x86   :  { %112 = vst [vmem:[%s241_s3 + $0x10] sm:$0xff] %v96_v50  ;;  %113 = vst [vmem:[%s241_s3 + $0x18] sm:$0xff] %v97_v51  ;;  %v61_v59 = vmul.f32 %v48_v47, %v33_v24  ;;  %v62_v61 = vmul.f32 %v48_v47, %v34_v26  ;;  %v63_v62 = vmul.f32 %v48_v47, %v35_v27 }
  0x87   :  { %114 = vst [vmem:[%s241_s3 + $0x20] sm:$0xff] %v98_v52  ;;  %115 = vst [vmem:[%s241_s3 + $0x28] sm:$0xff] %v99_v53  ;;  %v64_v63 = vmul.f32 %v48_v47, %v36_v28  ;;  %v65_v0 = vmul.f32 %v48_v47, %v37_v29  ;;  %v86_v1 = vadd.f32 %v76_v60, %v58_v56 }
  0x88   :  { %116 = vst [vmem:[%s241_s3 + $0x30] sm:$0xff] %v100_v54  ;;  %117 = vst [vmem:[%s241_s3 + $0x38] sm:$0xff] %v101_v55  ;;  %v87_v2 = vadd.f32 %v76_v60, %v59_v57  ;;  %v88_v3 = vadd.f32 %v76_v60, %v60_v58  ;;  %v89_v4 = vadd.f32 %v76_v60, %v61_v59 }
  0x89   :  { %v90_v5 = vadd.f32 %v76_v60, %v62_v61  ;;  %v91_v6 = vadd.f32 %v76_v60, %v63_v62  ;;  %v92_v7 = vadd.f32 %v76_v60, %v64_v63  ;;  %v93_v8 = vadd.f32 %v76_v60, %v65_v0 }
  0x8a   :  { %v102_v9 = vmax.f32 %v86_v1, 0.0  ;;  %v103_v10 = vmax.f32 %v87_v2, 0.0  ;;  %v104_v11 = vmax.f32 %v88_v3, 0.0  ;;  %v105_v12 = vmax.f32 %v89_v4, 0.0 }
  0x8b   :  { %v106_v13 = vmax.f32 %v90_v5, 0.0  ;;  %v107_v14 = vmax.f32 %v91_v6, 0.0  ;;  %v108_v15 = vmax.f32 %v92_v7, 0.0  ;;  %v109_v16 = vmax.f32 %v93_v8, 0.0 }
  0x8c   :  { %118 = vst [vmem:[%s241_s3 + $0x40] sm:$0xff] %v102_v9  ;;  %119 = vst [vmem:[%s241_s3 + $0x48] sm:$0xff] %v103_v10 }
  0x8d   :  { %120 = vst [vmem:[%s241_s3 + $0x50] sm:$0xff] %v104_v11  ;;  %121 = vst [vmem:[%s241_s3 + $0x58] sm:$0xff] %v105_v12 }
  0x8e   :  { %122 = vst [vmem:[%s241_s3 + $0x60] sm:$0xff] %v106_v13  ;;  %123 = vst [vmem:[%s241_s3 + $0x68] sm:$0xff] %v107_v14 }
  0x8f   :  { %124 = vst [vmem:[%s241_s3 + $0x70] sm:$0xff] %v108_v15  ;;  %125 = vst [vmem:[%s241_s3 + $0x78] sm:$0xff] %v109_v16 }

// kernel: basic_decoder_block.2
= control target key start
LH: loop header
LB: loop body
LE: loop exit
PB: predicated region body
PF: predicated region fallthrough
CT: control target
= control target key end

     0   :  { %s7612_s27 = smov 0   ;;  %s7614_s28 = smov 0   ;;  %s10063_s0 = inlined_call_operand.vmem [shape: bf16[2,32,32,4], index: 0, kind: input, shape index: {}, may-alias: {0,1,2}]   ;;  %s10064_s1 = inlined_call_operand.vmem [shape: bf16[2,32,32,4], index: 1, kind: input, shape index: {}, may-alias: {0,1,2}]   ;;  %s10065_s2 = inlined_call_operand.vmem [shape: bf16[2,32,32,4], index: 2, kind: input, shape index: {}, may-alias: {0,1,2}]   ;;  %s10066_s3 = inlined_call_operand.vmem [shape: bf16[2,32,32,4], index: 3, kind: input, shape index: {}, may-alias: {3,4,5}]   ;;  %s10067_s4 = inlined_call_operand.vmem [shape: bf16[2,32,32,4], index: 4, kind: input, shape index: {}, may-alias: {3,4,5}]   ;;  %s10068_s5 = inlined_call_operand.vmem [shape: bf16[2,32,32,4], index: 5, kind: input, shape index: {}, may-alias: {3,4,5}]   ;;  %s10069_s6 = inlined_call_operand.vmem [shape: bf16[72,8], index: 6, kind: input, shape index: {}]   ;;  %s10070_s7 = inlined_call_operand.vmem [shape: bf16[2,8,1024], index: 7, kind: output, shape index: {0}]   ;;  %s10071_s8 = inlined_call_operand.vmem [shape: f32[2,4,2,8], index: 8, kind: output, shape index: {1}]  }
   0x1   :  { %s7616_s29 = smov 0   ;;  %s7618_s30 = smov 0  }
   0x2   :  { %s7620_s9 = smov 0  }
   0x3 LB: > { %10101 = sst [smem:[#allocation3_spill]] %s7552_s29  ;;  %s28_s10 = sadd.s32 1, %s7552_s29  ;;  %s7560_s9 = sphi %s7620_s9, %s19_s9   ;;  %s7556_s30 = sphi %s7618_s30, %s10389_s30   ;;  %s7552_s29 = sphi %s7616_s29, %s10388_s29   ;;  %s7548_s28 = sphi %s7614_s28, %s10387_s28   ;;  %s7544_s27 = sphi %s7612_s27, %s10386_s27  }
   0x4   : > { %10102 = sst [smem:[#allocation4_spill]] %s7556_s30  ;;  %s31_s11 = sadd.s32 1, %s7556_s30 }
   0x5   : > { %p29_p0 = scmp.ge.s32.totalorder %s28_s10, 4  ;;  %p6514_p1 = scmp.ge.s32.totalorder %s7560_s9, 1 }
   0x6   : > { %p435_p2 = scmp.lt.s32.totalorder %s7560_s9, 9 }
   0x7   : > { %s10391_s10 = smov (%p29_p0, %s28_s10), 0  ;;  %s10393_s11 = smov (!%p29_p0, %s31_s11), %s7556_s30 }
   0x8   : > { %10103 = sst [smem:[#allocation5_spill]] %s10391_s10  ;;  %p436_p3 = pnand %p6514_p1, %p435_p2 }
   0x9   : > { %p33_p4 = scmp.ge.s32.totalorder %s10393_s11, 2 }
   0xa   : > { %439 = sbr.rel (%p436_p3) target bundleno = 1172 (0x494), region = 48 }
   0xb   : > { %s10395_s11 = smov (%p33_p4, %s10393_s11), 0 }
   0xc   : > { %10104 = sst [smem:[#allocation6_spill]] %s10395_s11 }
   0xf   : > { %s6515_s12 = sshll.u32 %s7544_s27, 3  ;;  %p549_p5 = scmp.lt.s32.totalorder %s7548_s28, 1  ;;  %vm756_vm0 = vcmask 27648   ;;  %vm657_vm1 = vcmask 60419   ;;  %vm658_vm2 = vsmask.f32 7950 }
  0x10   : > { %p551_p6 = scmp.lt.s32.totalorder %s6515_s12, 31  ;;  %s6520_s13 = sadd.s32 4294967295, %s6515_s12  ;;  %vm690_vm3 = vcmask 57344   ;;  %vm7812_vm4 = vmand %vm657_vm1, %vm658_vm2  ;;  %vm691_vm5 = vsmask.f32 256  ;;  %vm949_vm7 = vcmask 60448  }
  0x11   : > { %s10397_s28 = smov (!%p549_p5, %s7548_s28), 1  ;;  %p561_p7 = scmp.gt.s32.totalorder %s6520_s13, 0  ;;  %v660_v59 = vld [vmem:[#allocation2] sm:$0x8]  ;;  %v663_v60 = vld [vmem:[#allocation2 + $0x18] sm:$0x8]  ;;  %vm7836_vm6 = vmand %vm690_vm3, %vm691_vm5 }
  0x12   : > { %s552_s14 = scalar_select %p551_p6, %s6515_s12, 31  ;;  %v666_v61 = vld [vmem:[#allocation2 + $0x30] sm:$0x8] }
  0x13   : > { %s6517_s15 = sshll.u32 %s10397_s28, 7  ;;  %p6521_p8 = scmp.lt.s32.totalorder %s6520_s13, 31 }
  0x14   : > { %s6516_s16 = sshll.u32 %s552_s14, 2  ;;  %s6892_s18 = sadd.s32 8, %s6515_s12 }
  0x15   : > { %s7648_s17 = sadd.s32 %s6517_s15, %s6516_s16  ;;  %p578_p9 = scmp.lt.s32.totalorder %s6892_s18, 31 }
  0x16   : > { %s10074_s19 = sshll.u32 %s7648_s17, 2  ;;  %s10399_s13 = smov (!%p561_p7, %s6520_s13), 0 }
  0x17   : > { %s10401_s18 = smov (!%p578_p9, %s6892_s18), 31  ;;  %s10403_s13 = smov (!%p6521_p8, %s10399_s13), 31 }
  0x18   : > { %s10405_s18 = smov (!%p578_p9, %s10401_s18), 31  ;;  %s6526_s20 = sshll.u32 %s10403_s13, 2 }
  0x19   : > { %s7656_s23 = scalar_lea.vmem %s10066_s3, %s10074_s19  ;;  %s569_s24 = sadd.s32 %s6526_s20, %s6517_s15 }
  0x1a   : > { %s6533_s25 = sshll.u32 %s10405_s18, 2  ;;  %s6528_s26 = sshll.u32 %s569_s24, 2  ;;  %v791_v0 = vld [vmem:[%s7656_s23 + $0x8] sm:$0xf]  ;;  %v789_v1 = vld [vmem:[%s7656_s23] sm:$0xf] }
  0x1b   : > { %s586_s12 = sadd.s32 %s6533_s25, %s6517_s15  ;;  %s7661_s11 = scalar_lea.vmem %s10064_s1, %s6528_s26  ;;  %v792_v2 = vld [vmem:[%s7656_s23 + $0xc] sm:$0xf]  ;;  %v790_v3 = vld [vmem:[%s7656_s23 + $0x4] sm:$0xf]  ;;  %v794_v4 = vld [vmem:[%s7656_s23 + $0x14] sm:$0xf] }
  0x1c   : > { %s6535_s10 = sshll.u32 %s586_s12, 2  ;;  %s7671_s20 = scalar_lea.vmem %s10067_s4, %s6528_s26  ;;  %v793_v5 = vld [vmem:[%s7656_s23 + $0x10] sm:$0xf]  ;;  %v796_v13 = vld [vmem:[%s7656_s23 + $0x1c] sm:$0xf] }
  0x1d   : > { %s7666_s29 = scalar_lea.vmem %s10065_s2, %s6535_s10  ;;  %s7676_s15 = scalar_lea.vmem %s10068_s5, %s6535_s10  ;;  %v795_v19 = vld [vmem:[%s7656_s23 + $0x18] sm:$0xf]  ;;  %v798_v22 = vld [vmem:[%s7656_s23 + $0x24] sm:$0xf]  ;;  %v797_v23 = vld [vmem:[%s7656_s23 + $0x20] sm:$0xf] }
  0x1e   : > { %s6557_s24 = sshll.u32 %s7544_s27, 1  ;;  %s6558_s25 = sshll.u32 %s10397_s28, 3  ;;  %v800_v26 = vld [vmem:[%s7656_s23 + $0x2c] sm:$0xf]  ;;  %v799_v27 = vld [vmem:[%s7656_s23 + $0x28] sm:$0xf] }
  0x1f   : > { %p641_p10 = scmp.lt.s32.totalorder %s6557_s24, 7  ;;  %p650_p11 = scmp.lt.s32.totalorder %s7544_s27, 3  ;;  %v802_v30 = vld [vmem:[%s7656_s23 + $0x34] sm:$0xf]  ;;  %v801_v31 = vld [vmem:[%s7656_s23 + $0x30] sm:$0xf] }
  0x20   : > { %s6560_s12 = sshll.u32 %s10397_s28, 2  ;;  %s7562_s19 = smov 4   ;;  %v804_v34 = vld [vmem:[%s7656_s23 + $0x3c] sm:$0xf]  ;;  %v803_v35 = vld [vmem:[%s7656_s23 + $0x38] sm:$0xf] }
  0x21   : > { %s10407_s24 = smov (!%p641_p10, %s6557_s24), 7  ;;  %857 = vrot.lane.b32.xlu1 %v791_v0, %s7562_s19  ;;  %853 = vrot.lane.b32.xlu0 %v789_v1, %s7562_s19  ;;  %v806_v38 = vld [vmem:[%s7656_s23 + $0x44] sm:$0xf]  ;;  %v805_v39 = vld [vmem:[%s7656_s23 + $0x40] sm:$0xf]  ;;  %v661_v0 = vsel %vm7812_vm4, 0, %v660_v59 }
  0x22   : > { %s651_s30 = scalar_select %p650_p11, %s7544_s27, 3  ;;  %v808_v42 = vld [vmem:[%s7656_s23 + $0x4c] sm:$0xf]  ;;  %v807_v43 = vld [vmem:[%s7656_s23 + $0x48] sm:$0xf]  ;;  %v664_v1 = vsel %vm7812_vm4, 0, %v663_v60 }
  0x23   : > { %s644_s26 = sadd.s32 %s6558_s25, %s10407_s24  ;;  %s10105_s25 = sshll.u32 %s7648_s17, 2  ;;  %v810_v46 = vld [vmem:[%s7656_s23 + $0x54] sm:$0xf]  ;;  %v809_v47 = vld [vmem:[%s7656_s23 + $0x50] sm:$0xf] }
  0x24   : > { %s6559_s14 = sshll.u32 %s644_s26, 2  ;;  %s653_s16 = sadd.s32 %s6560_s12, %s651_s30  ;;  %v812_v50 = vld [vmem:[%s7656_s23 + $0x5c] sm:$0xf]  ;;  %v811_v51 = vld [vmem:[%s7656_s23 + $0x58] sm:$0xf] }
  0x25   : > { %s7690_s21 = scalar_lea.vmem %s10070_s7, %s6559_s14  ;;  %s6561_s28 = sshll.u32 %s653_s16, 1  ;;  %859 = vrot.lane.b32.xlu1 %v792_v2, %s7562_s19  ;;  %855 = vrot.lane.b32.xlu0 %v790_v3, %s7562_s19  ;;  %v814_v54 = vld [vmem:[%s7656_s23 + $0x64] sm:$0xf]  ;;  %v813_v55 = vld [vmem:[%s7656_s23 + $0x60] sm:$0xf]  ;;  %v667_v2 = vsel %vm7812_vm4, 0, %v666_v61 }
  0x26   : > { %s7697_s24 = scalar_lea.vmem %s10071_s8, %s6561_s28  ;;  %s7704_s26 = scalar_lea.vmem %s10063_s0, %s10105_s25  ;;  %v816_v62 = vld [vmem:[%s7656_s23 + $0x6c] sm:$0xf]  ;;  %v815_v63 = vld [vmem:[%s7656_s23 + $0x68] sm:$0xf]  ;;  %662 = vst [vmem:[#allocation2] sm:$0x8] %v661_v0 }
  0x27   : > { %v725_v6 = vld [vmem:[%s7704_s26 + $0x8] sm:$0xf]  ;;  %v723_v7 = vld [vmem:[%s7704_s26] sm:$0xf]  ;;  %v726_v8 = vld [vmem:[%s7704_s26 + $0xc] sm:$0xf] }
  0x28   : > { %759 = vst.msk [vmem:[#allocation2 + $0x24] sm:$0xf] %vm756_vm0, %v725_v6  ;;  %v724_v9 = vld [vmem:[%s7704_s26 + $0x4] sm:$0xf]  ;;  %757 = vst.msk [vmem:[#allocation2 + $0x1c] sm:$0xf] %vm756_vm0, %v723_v7 }
  0x29   : > { %760 = vst.msk [vmem:[#allocation2 + $0x28] sm:$0xf] %vm756_vm0, %v726_v8  ;;  %758 = vst.msk [vmem:[#allocation2 + $0x20] sm:$0xf] %vm756_vm0, %v724_v9  ;;  %v728_v10 = vld [vmem:[%s7704_s26 + $0x14] sm:$0xf]  ;;  %863 = vrot.lane.b32.xlu1 %v794_v4, %s7562_s19  ;;  %861 = vrot.lane.b32.xlu0 %v793_v5, %s7562_s19 }
  0x2a   : > { %v727_v11 = vld [vmem:[%s7704_s26 + $0x10] sm:$0xf]  ;;  %v730_v12 = vld [vmem:[%s7704_s26 + $0x1c] sm:$0xf]  ;;  %762 = vst.msk [vmem:[#allocation2 + $0x38] sm:$0xf] %vm756_vm0, %v728_v10 }
  0x2b   : > { %761 = vst.msk [vmem:[#allocation2 + $0x34] sm:$0xf] %vm756_vm0, %v727_v11  ;;  %764 = vst.msk [vmem:[#allocation2 + $0x40] sm:$0xf] %vm756_vm0, %v730_v12  ;;  %v729_v14 = vld [vmem:[%s7704_s26 + $0x18] sm:$0xf] }
  0x2c   : > { %v732_v15 = vld [vmem:[%s7704_s26 + $0x24] sm:$0xf]  ;;  %v731_v16 = vld [vmem:[%s7704_s26 + $0x20] sm:$0xf]  ;;  %763 = vst.msk [vmem:[#allocation2 + $0x3c] sm:$0xf] %vm756_vm0, %v729_v14 }
  0x2d   : > { %766 = vst.msk [vmem:[#allocation2 + $0x50] sm:$0xf] %vm756_vm0, %v732_v15  ;;  %765 = vst.msk [vmem:[#allocation2 + $0x4c] sm:$0xf] %vm756_vm0, %v731_v16  ;;  %v734_v17 = vld [vmem:[%s7704_s26 + $0x2c] sm:$0xf]  ;;  %867 = vrot.lane.b32.xlu1 %v796_v13, %s7562_s19  ;;  %865 = vrot.lane.b32.xlu0 %v795_v19, %s7562_s19 }
  0x2e   : > { %v733_v18 = vld [vmem:[%s7704_s26 + $0x28] sm:$0xf]  ;;  %768 = vst.msk [vmem:[#allocation2 + $0x58] sm:$0xf] %vm756_vm0, %v734_v17  ;;  %v736_v20 = vld [vmem:[%s7704_s26 + $0x34] sm:$0xf] }
  0x2f   : > { %767 = vst.msk [vmem:[#allocation2 + $0x54] sm:$0xf] %vm756_vm0, %v733_v18  ;;  %v735_v21 = vld [vmem:[%s7704_s26 + $0x30] sm:$0xf]  ;;  %770 = vst.msk [vmem:[#allocation2 + $0x68] sm:$0xf] %vm756_vm0, %v736_v20 }
  0x30   : > { %769 = vst.msk [vmem:[#allocation2 + $0x64] sm:$0xf] %vm756_vm0, %v735_v21  ;;  %v738_v24 = vld [vmem:[%s7704_s26 + $0x3c] sm:$0xf]  ;;  %v737_v25 = vld [vmem:[%s7704_s26 + $0x38] sm:$0xf] }
  0x31   : > { %772 = vst.msk [vmem:[#allocation2 + $0x70] sm:$0xf] %vm756_vm0, %v738_v24  ;;  %771 = vst.msk [vmem:[#allocation2 + $0x6c] sm:$0xf] %vm756_vm0, %v737_v25  ;;  %871 = vrot.lane.b32.xlu1 %v798_v22, %s7562_s19  ;;  %869 = vrot.lane.b32.xlu0 %v797_v23, %s7562_s19  ;;  %v740_v28 = vld [vmem:[%s7704_s26 + $0x44] sm:$0xf] }
  0x32   : > { %v739_v29 = vld [vmem:[%s7704_s26 + $0x40] sm:$0xf]  ;;  %774 = vst.msk [vmem:[#allocation2 + $0x80] sm:$0xf] %vm756_vm0, %v740_v28  ;;  %v742_v32 = vld [vmem:[%s7704_s26 + $0x4c] sm:$0xf] }
  0x33   : > { %773 = vst.msk [vmem:[#allocation2 + $0x7c] sm:$0xf] %vm756_vm0, %v739_v29  ;;  %v741_v33 = vld [vmem:[%s7704_s26 + $0x48] sm:$0xf]  ;;  %776 = vst.msk [vmem:[#allocation2 + $0x88] sm:$0xf] %vm756_vm0, %v742_v32 }
  0x34   : > { %775 = vst.msk [vmem:[#allocation2 + $0x84] sm:$0xf] %vm756_vm0, %v741_v33  ;;  %v744_v36 = vld [vmem:[%s7704_s26 + $0x54] sm:$0xf]  ;;  %v743_v37 = vld [vmem:[%s7704_s26 + $0x50] sm:$0xf] }
  0x35   : > { %875 = vrot.lane.b32.xlu1 %v800_v26, %s7562_s19  ;;  %873 = vrot.lane.b32.xlu0 %v799_v27, %s7562_s19  ;;  %778 = vst.msk [vmem:[#allocation2 + $0x98] sm:$0xf] %vm756_vm0, %v744_v36  ;;  %777 = vst.msk [vmem:[#allocation2 + $0x94] sm:$0xf] %vm756_vm0, %v743_v37  ;;  %v746_v40 = vld [vmem:[%s7704_s26 + $0x5c] sm:$0xf] }
  0x36   : > { %v745_v41 = vld [vmem:[%s7704_s26 + $0x58] sm:$0xf]  ;;  %780 = vst.msk [vmem:[#allocation2 + $0xa0] sm:$0xf] %vm756_vm0, %v746_v40  ;;  %v748_v44 = vld [vmem:[%s7704_s26 + $0x64] sm:$0xf] }
  0x37   : > { %779 = vst.msk [vmem:[#allocation2 + $0x9c] sm:$0xf] %vm756_vm0, %v745_v41  ;;  %v747_v45 = vld [vmem:[%s7704_s26 + $0x60] sm:$0xf]  ;;  %782 = vst.msk [vmem:[#allocation2 + $0xb0] sm:$0xf] %vm756_vm0, %v748_v44 }
  0x38   : > { %781 = vst.msk [vmem:[#allocation2 + $0xac] sm:$0xf] %vm756_vm0, %v747_v45  ;;  %v750_v48 = vld [vmem:[%s7704_s26 + $0x6c] sm:$0xf]  ;;  %v749_v49 = vld [vmem:[%s7704_s26 + $0x68] sm:$0xf] }
  0x39   : > { %879 = vrot.lane.b32.xlu1 %v802_v30, %s7562_s19  ;;  %877 = vrot.lane.b32.xlu0 %v801_v31, %s7562_s19  ;;  %784 = vst.msk [vmem:[#allocation2 + $0xb8] sm:$0xf] %vm756_vm0, %v750_v48  ;;  %783 = vst.msk [vmem:[#allocation2 + $0xb4] sm:$0xf] %vm756_vm0, %v749_v49  ;;  %v752_v52 = vld [vmem:[%s7704_s26 + $0x74] sm:$0xf] }
  0x3a   : > { %v751_v53 = vld [vmem:[%s7704_s26 + $0x70] sm:$0xf]  ;;  %786 = vst.msk [vmem:[#allocation2 + $0xc8] sm:$0xf] %vm756_vm0, %v752_v52  ;;  %v754_v56 = vld [vmem:[%s7704_s26 + $0x7c] sm:$0xf] }
  0x3b   : > { %785 = vst.msk [vmem:[#allocation2 + $0xc4] sm:$0xf] %vm756_vm0, %v751_v53  ;;  %v753_v57 = vld [vmem:[%s7704_s26 + $0x78] sm:$0xf]  ;;  %788 = vst.msk [vmem:[#allocation2 + $0xd0] sm:$0xf] %vm756_vm0, %v754_v56 }
  0x3c   : > { %787 = vst.msk [vmem:[#allocation2 + $0xcc] sm:$0xf] %vm756_vm0, %v753_v57  ;;  %v669_v3 = vld [vmem:[#allocation2 + $0x48] sm:$0x8]  ;;  %665 = vst [vmem:[#allocation2 + $0x18] sm:$0x8] %v664_v1 }
  0x3d   : > { %883 = vrot.lane.b32.xlu1 %v804_v34, %s7562_s19  ;;  %881 = vrot.lane.b32.xlu0 %v803_v35, %s7562_s19  ;;  %668 = vst [vmem:[#allocation2 + $0x30] sm:$0x8] %v667_v2  ;;  %v670_v4 = vsel %vm7812_vm4, 0, %v669_v3  ;;  %v672_v5 = vld [vmem:[#allocation2 + $0x60] sm:$0x8]  ;;  %p6562_p12 = scmp.le.s32.totalorder %s7544_s27, 0 }
  0x3e   : > { %v675_v6 = vld [vmem:[#allocation2 + $0x78] sm:$0x8]  ;;  %671 = vst [vmem:[#allocation2 + $0x48] sm:$0x8] %v670_v4  ;;  %v673_v7 = vsel %vm7812_vm4, 0, %v672_v5  ;;  %s7563_s17 = smov (!%p6562_p12), 4  }
  0x3f   : > { %v676_v8 = vsel %vm7812_vm4, 0, %v675_v6  ;;  %v678_v9 = vld [vmem:[#allocation2 + $0x90] sm:$0x8]  ;;  %v681_v10 = vld [vmem:[#allocation2 + $0xa8] sm:$0x8] }
  0x40   : > { %674 = vst [vmem:[#allocation2 + $0x60] sm:$0x8] %v673_v7  ;;  %677 = vst [vmem:[#allocation2 + $0x78] sm:$0x8] %v676_v8  ;;  %v679_v12 = vsel %vm7812_vm4, 0, %v678_v9  ;;  %v682_v13 = vsel %vm7812_vm4, 0, %v681_v10 }
  0x41   : > { %887 = vrot.lane.b32.xlu1 %v806_v38, %s7562_s19  ;;  %885 = vrot.lane.b32.xlu0 %v805_v39, %s7562_s19  ;;  %v684_v14 = vld [vmem:[#allocation2 + $0xc0] sm:$0x8]  ;;  %v687_v15 = vld [vmem:[#allocation2 + $0xd8] sm:$0x8]  ;;  %v818_v16 = vld [vmem:[%s7656_s23 + $0x74] sm:$0xf] }
  0x42   : > { %v817_v17 = vld [vmem:[%s7656_s23 + $0x70] sm:$0xf]  ;;  %680 = vst [vmem:[#allocation2 + $0x90] sm:$0x8] %v679_v12  ;;  %683 = vst [vmem:[#allocation2 + $0xa8] sm:$0x8] %v682_v13 }
  0x43   : > { %v685_v18 = vsel %vm7812_vm4, 0, %v684_v14  ;;  %v688_v19 = vsel %vm7812_vm4, 0, %v687_v15  ;;  %v693_v20 = vld [vmem:[#allocation2 + $0x14] sm:$0x1]  ;;  %v696_v21 = vld [vmem:[#allocation2 + $0x2c] sm:$0x1] }
  0x44   : > { %686 = vst [vmem:[#allocation2 + $0xc0] sm:$0x8] %v685_v18  ;;  %689 = vst [vmem:[#allocation2 + $0xd8] sm:$0x8] %v688_v19  ;;  %v694_v22 = vsel %vm7836_vm6, 0, %v693_v20  ;;  %v697_v23 = vsel %vm7836_vm6, 0, %v696_v21 }
  0x45   : > { %891 = vrot.lane.b32.xlu1 %v808_v42, %s7562_s19  ;;  %889 = vrot.lane.b32.xlu0 %v807_v43, %s7562_s19  ;;  %v699_v24 = vld [vmem:[#allocation2 + $0x44] sm:$0x1]  ;;  %v702_v25 = vld [vmem:[#allocation2 + $0x5c] sm:$0x1]  ;;  %695 = vst [vmem:[#allocation2 + $0x14] sm:$0x1] %v694_v22 }
  0x46   : > { %698 = vst [vmem:[#allocation2 + $0x2c] sm:$0x1] %v697_v23  ;;  %v700_v26 = vsel %vm7836_vm6, 0, %v699_v24  ;;  %v703_v27 = vsel %vm7836_vm6, 0, %v702_v25  ;;  %v705_v28 = vld [vmem:[#allocation2 + $0x74] sm:$0x1] }
  0x47   : > { %v708_v29 = vld [vmem:[#allocation2 + $0x8c] sm:$0x1]  ;;  %701 = vst [vmem:[#allocation2 + $0x44] sm:$0x1] %v700_v26  ;;  %704 = vst [vmem:[#allocation2 + $0x5c] sm:$0x1] %v703_v27 }
  0x48   : > { %v706_v30 = vsel %vm7836_vm6, 0, %v705_v28  ;;  %v709_v31 = vsel %vm7836_vm6, 0, %v708_v29  ;;  %v711_v32 = vld [vmem:[#allocation2 + $0xa4] sm:$0x1]  ;;  %v714_v33 = vld [vmem:[#allocation2 + $0xbc] sm:$0x1] }
  0x49   : > { %895 = vrot.lane.b32.xlu1 %v810_v46, %s7562_s19  ;;  %893 = vrot.lane.b32.xlu0 %v809_v47, %s7562_s19  ;;  %707 = vst [vmem:[#allocation2 + $0x74] sm:$0x1] %v706_v30  ;;  %710 = vst [vmem:[#allocation2 + $0x8c] sm:$0x1] %v709_v31  ;;  %v712_v34 = vsel %vm7836_vm6, 0, %v711_v32  ;;  %v715_v35 = vsel %vm7836_vm6, 0, %v714_v33 }
  0x4a   : > { %v717_v36 = vld [vmem:[#allocation2 + $0xd4] sm:$0x1]  ;;  %v720_v37 = vld [vmem:[#allocation2 + $0xec] sm:$0x1]  ;;  %713 = vst [vmem:[#allocation2 + $0xa4] sm:$0x1] %v712_v34 }
  0x4b   : > { %716 = vst [vmem:[#allocation2 + $0xbc] sm:$0x1] %v715_v35  ;;  %v718_v38 = vsel %vm7836_vm6, 0, %v717_v36  ;;  %v721_v39 = vsel %vm7836_vm6, 0, %v720_v37  ;;  %v820_v40 = vld [vmem:[%s7656_s23 + $0x7c] sm:$0xf] }
  0x4c   : > { %v819_v41 = vld [vmem:[%s7656_s23 + $0x78] sm:$0xf]  ;;  %719 = vst [vmem:[#allocation2 + $0xd4] sm:$0x1] %v718_v38  ;;  %722 = vst [vmem:[#allocation2 + $0xec] sm:$0x1] %v721_v39 }
  0x4d   : > { %899 = vrot.lane.b32.xlu1 %v812_v50, %s7562_s19  ;;  %897 = vrot.lane.b32.xlu0 %v811_v51, %s7562_s19 }
  0x51   : > { %903 = vrot.lane.b32.xlu1 %v814_v54, %s7562_s19  ;;  %901 = vrot.lane.b32.xlu0 %v813_v55, %s7562_s19 }
  0x55   : > { %907 = vrot.lane.b32.xlu1 %v816_v62, %s7562_s19  ;;  %905 = vrot.lane.b32.xlu0 %v815_v63, %s7562_s19 }
  0x59   : > { %911 = vrot.lane.b32.xlu1 %v818_v16, %s7562_s19  ;;  %909 = vrot.lane.b32.xlu0 %v817_v17, %s7562_s19 }
  0x5d   : > { %915 = vrot.lane.b32.xlu1 %v820_v40, %s7562_s19  ;;  %913 = vrot.lane.b32.xlu0 %v819_v41, %s7562_s19 }
  0x93   : > { %v858_v42 = vpop.permute.xlu1 %857  ;;  %v854_v43 = vpop.permute.xlu0 %853 }
  0x94   : > { %952 = vst.msk [vmem:[#allocation2 + $0x24] sm:$0xf] %vm949_vm7, %v858_v42  ;;  %950 = vst.msk [vmem:[#allocation2 + $0x1c] sm:$0xf] %vm949_vm7, %v854_v43 }
  0x97   : > { %v860_v44 = vpop.permute.xlu1 %859  ;;  %v856_v45 = vpop.permute.xlu0 %855 }
  0x98   : > { %953 = vst.msk [vmem:[#allocation2 + $0x28] sm:$0xf] %vm949_vm7, %v860_v44  ;;  %951 = vst.msk [vmem:[#allocation2 + $0x20] sm:$0xf] %vm949_vm7, %v856_v45 }
  0x9b   : > { %v864_v46 = vpop.permute.xlu1 %863  ;;  %v862_v47 = vpop.permute.xlu0 %861 }
  0x9c   : > { %955 = vst.msk [vmem:[#allocation2 + $0x38] sm:$0xf] %vm949_vm7, %v864_v46  ;;  %954 = vst.msk [vmem:[#allocation2 + $0x34] sm:$0xf] %vm949_vm7, %v862_v47 }
  0x9f   : > { %v868_v48 = vpop.permute.xlu1 %867  ;;  %v866_v49 = vpop.permute.xlu0 %865 }
  0xa0   : > { %957 = vst.msk [vmem:[#allocation2 + $0x40] sm:$0xf] %vm949_vm7, %v868_v48  ;;  %956 = vst.msk [vmem:[#allocation2 + $0x3c] sm:$0xf] %vm949_vm7, %v866_v49 }
  0xa3   : > { %v872_v50 = vpop.permute.xlu1 %871  ;;  %v870_v51 = vpop.permute.xlu0 %869 }
  0xa4   : > { %959 = vst.msk [vmem:[#allocation2 + $0x50] sm:$0xf] %vm949_vm7, %v872_v50  ;;  %958 = vst.msk [vmem:[#allocation2 + $0x4c] sm:$0xf] %vm949_vm7, %v870_v51 }
  0xa7   : > { %v876_v52 = vpop.permute.xlu1 %875  ;;  %v874_v53 = vpop.permute.xlu0 %873 }
  0xa8   : > { %961 = vst.msk [vmem:[#allocation2 + $0x58] sm:$0xf] %vm949_vm7, %v876_v52  ;;  %960 = vst.msk [vmem:[#allocation2 + $0x54] sm:$0xf] %vm949_vm7, %v874_v53 }
  0xab   : > { %v880_v54 = vpop.permute.xlu1 %879  ;;  %v878_v55 = vpop.permute.xlu0 %877 }
  0xac   : > { %963 = vst.msk [vmem:[#allocation2 + $0x68] sm:$0xf] %vm949_vm7, %v880_v54  ;;  %962 = vst.msk [vmem:[#allocation2 + $0x64] sm:$0xf] %vm949_vm7, %v878_v55 }
  0xaf   : > { %v884_v56 = vpop.permute.xlu1 %883  ;;  %v882_v57 = vpop.permute.xlu0 %881 }
  0xb0   : > { %965 = vst.msk [vmem:[#allocation2 + $0x70] sm:$0xf] %vm949_vm7, %v884_v56  ;;  %964 = vst.msk [vmem:[#allocation2 + $0x6c] sm:$0xf] %vm949_vm7, %v882_v57 }
  0xb3   : > { %v888_v58 = vpop.permute.xlu1 %887  ;;  %v886_v59 = vpop.permute.xlu0 %885 }
  0xb4   : > { %967 = vst.msk [vmem:[#allocation2 + $0x80] sm:$0xf] %vm949_vm7, %v888_v58  ;;  %966 = vst.msk [vmem:[#allocation2 + $0x7c] sm:$0xf] %vm949_vm7, %v886_v59 }
  0xb7   : > { %v892_v60 = vpop.permute.xlu1 %891  ;;  %v890_v61 = vpop.permute.xlu0 %889 }
  0xb8   : > { %969 = vst.msk [vmem:[#allocation2 + $0x88] sm:$0xf] %vm949_vm7, %v892_v60  ;;  %968 = vst.msk [vmem:[#allocation2 + $0x84] sm:$0xf] %vm949_vm7, %v890_v61 }
  0xbb   : > { %v896_v62 = vpop.permute.xlu1 %895  ;;  %v894_v63 = vpop.permute.xlu0 %893 }
  0xbc   : > { %971 = vst.msk [vmem:[#allocation2 + $0x98] sm:$0xf] %vm949_vm7, %v896_v62  ;;  %970 = vst.msk [vmem:[#allocation2 + $0x94] sm:$0xf] %vm949_vm7, %v894_v63 }
  0xbf   : > { %v900_v0 = vpop.permute.xlu1 %899  ;;  %v898_v1 = vpop.permute.xlu0 %897 }
  0xc0   : > { %973 = vst.msk [vmem:[#allocation2 + $0xa0] sm:$0xf] %vm949_vm7, %v900_v0  ;;  %972 = vst.msk [vmem:[#allocation2 + $0x9c] sm:$0xf] %vm949_vm7, %v898_v1 }
  0xc3   : > { %v904_v2 = vpop.permute.xlu1 %903  ;;  %v902_v3 = vpop.permute.xlu0 %901 }
  0xc4   : > { %975 = vst.msk [vmem:[#allocation2 + $0xb0] sm:$0xf] %vm949_vm7, %v904_v2  ;;  %974 = vst.msk [vmem:[#allocation2 + $0xac] sm:$0xf] %vm949_vm7, %v902_v3 }
  0xc7   : > { %v908_v4 = vpop.permute.xlu1 %907  ;;  %v906_v5 = vpop.permute.xlu0 %905 }
  0xc8   : > { %977 = vst.msk [vmem:[#allocation2 + $0xb8] sm:$0xf] %vm949_vm7, %v908_v4  ;;  %976 = vst.msk [vmem:[#allocation2 + $0xb4] sm:$0xf] %vm949_vm7, %v906_v5 }
  0xcb   : > { %v912_v6 = vpop.permute.xlu1 %911  ;;  %v910_v7 = vpop.permute.xlu0 %909 }
  0xcc   : > { %979 = vst.msk [vmem:[#allocation2 + $0xc8] sm:$0xf] %vm949_vm7, %v912_v6  ;;  %978 = vst.msk [vmem:[#allocation2 + $0xc4] sm:$0xf] %vm949_vm7, %v910_v7  ;;  %985 = sbr.rel (%p6562_p12) target bundleno = 330 (0x14a), region = 52 }
  0xcf   : > { %v916_v8 = vpop.permute.xlu1 %915  ;;  %v914_v9 = vpop.permute.xlu0 %913 }
  0xd0   : > { %981 = vst.msk [vmem:[#allocation2 + $0xd0] sm:$0xf] %vm949_vm7, %v916_v8  ;;  %980 = vst.msk [vmem:[#allocation2 + $0xcc] sm:$0xf] %vm949_vm7, %v914_v9 }
  0xd1   : > { %v996_v10 = vld [vmem:[%s7671_s20 + $0x8] sm:$0xf]  ;;  %v994_v11 = vld [vmem:[%s7671_s20] sm:$0xf]  ;;  %v997_v12 = vld [vmem:[%s7671_s20 + $0xc] sm:$0xf] }
  0xd2   : > { %1006 = vrot.lane.b32.xlu1 %v996_v10, %s7563_s17  ;;  %1002 = vrot.lane.b32.xlu0 %v994_v11, %s7563_s17  ;;  %v995_v13 = vld [vmem:[%s7671_s20 + $0x4] sm:$0xf]  ;;  %v988_v14 = vld [vmem:[%s7661_s11 + $0x8] sm:$0xf] }
  0xd3   : > { %v986_v15 = vld [vmem:[%s7661_s11] sm:$0xf]  ;;  %v989_v16 = vld [vmem:[%s7661_s11 + $0xc] sm:$0xf]  ;;  %992 = vst.msk [vmem:[#allocation2 + $0xc] sm:$0xf] %vm756_vm0, %v988_v14 }
  0xd4   : > { %990 = vst.msk [vmem:[#allocation2 + $0x4] sm:$0xf] %vm756_vm0, %v986_v15  ;;  %993 = vst.msk [vmem:[#allocation2 + $0x10] sm:$0xf] %vm756_vm0, %v989_v16  ;;  %v987_v17 = vld [vmem:[%s7661_s11 + $0x4] sm:$0xf] }
  0xd5   : > { %991 = vst.msk [vmem:[#allocation2 + $0x8] sm:$0xf] %vm756_vm0, %v987_v17 }
  0xd6   : > { %1008 = vrot.lane.b32.xlu1 %v997_v12, %s7563_s17  ;;  %1004 = vrot.lane.b32.xlu0 %v995_v13, %s7563_s17 }
 0x144   : > { %v1007_v18 = vpop.permute.xlu1 %1006  ;;  %v1003_v19 = vpop.permute.xlu0 %1002 }
 0x145   : > { %1016 = vst.msk [vmem:[#allocation2 + $0xc] sm:$0xf] %vm949_vm7, %v1007_v18  ;;  %1014 = vst.msk [vmem:[#allocation2 + $0x4] sm:$0xf] %vm949_vm7, %v1003_v19 }
 0x148   : > { %v1009_v20 = vpop.permute.xlu1 %1008  ;;  %v1005_v21 = vpop.permute.xlu0 %1004 }
 0x149   : > { %1017 = vst.msk [vmem:[#allocation2 + $0x10] sm:$0xf] %vm949_vm7, %v1009_v20  ;;  %1015 = vst.msk [vmem:[#allocation2 + $0x8] sm:$0xf] %vm949_vm7, %v1005_v21 }
 0x14a PF: > { %p6563_p13 = scmp.ne.s32.totalorder %s7544_s27, 0 }
 0x14c   : > { %1021 = sbr.rel (%p6563_p13) target bundleno = 340 (0x154), region = 56 }
 0x151   : > { %vm1022_vm8 = vcmask 60416   ;;  %v7564_v22 = vmov 0  }
 0x152   : > { %1023 = vst.msk [vmem:[#allocation2 + $0x4] sm:$0xf] %vm1022_vm8, %v7564_v22  ;;  %1024 = vst.msk [vmem:[#allocation2 + $0x8] sm:$0xf] %vm1022_vm8, %v7564_v22 }
 0x153   : > { %1025 = vst.msk [vmem:[#allocation2 + $0xc] sm:$0xf] %vm1022_vm8, %v7564_v22  ;;  %1026 = vst.msk [vmem:[#allocation2 + $0x10] sm:$0xf] %vm1022_vm8, %v7564_v22 }
 0x154 PF: > { %p6564_p0 = scmp.ge.s32.totalorder %s7544_s27, 3 }
 0x155   : > { %s7565_s11 = smov (!%p6564_p0), 4  }
 0x156   : > { %1030 = sbr.rel (%p6564_p0) target bundleno = 468 (0x1d4), region = 60 }
 0x15b   : > { %v1042_v23 = vld [vmem:[%s7676_s15 + $0x8] sm:$0xf]  ;;  %v1040_v24 = vld [vmem:[%s7676_s15] sm:$0xf]  ;;  %v1043_v25 = vld [vmem:[%s7676_s15 + $0xc] sm:$0xf] }
 0x15c   : > { %1052 = vrot.lane.b32.xlu1 %v1042_v23, %s7565_s11  ;;  %1048 = vrot.lane.b32.xlu0 %v1040_v24, %s7565_s11  ;;  %v1041_v26 = vld [vmem:[%s7676_s15 + $0x4] sm:$0xf]  ;;  %v1033_v27 = vld [vmem:[%s7666_s29 + $0x8] sm:$0xf] }
 0x15d   : > { %v1031_v28 = vld [vmem:[%s7666_s29] sm:$0xf]  ;;  %v1034_v29 = vld [vmem:[%s7666_s29 + $0xc] sm:$0xf]  ;;  %1038 = vst.msk [vmem:[#allocation2 + $0xe4] sm:$0xf] %vm756_vm0, %v1033_v27 }
 0x15e   : > { %1036 = vst.msk [vmem:[#allocation2 + $0xdc] sm:$0xf] %vm756_vm0, %v1031_v28  ;;  %1039 = vst.msk [vmem:[#allocation2 + $0xe8] sm:$0xf] %vm756_vm0, %v1034_v29  ;;  %v1032_v30 = vld [vmem:[%s7666_s29 + $0x4] sm:$0xf] }
 0x15f   : > { %1037 = vst.msk [vmem:[#allocation2 + $0xe0] sm:$0xf] %vm756_vm0, %v1032_v30 }
 0x160   : > { %1054 = vrot.lane.b32.xlu1 %v1043_v25, %s7565_s11  ;;  %1050 = vrot.lane.b32.xlu0 %v1041_v26, %s7565_s11 }
 0x1ce   : > { %v1053_v31 = vpop.permute.xlu1 %1052  ;;  %v1049_v32 = vpop.permute.xlu0 %1048 }
 0x1cf   : > { %1062 = vst.msk [vmem:[#allocation2 + $0xe4] sm:$0xf] %vm949_vm7, %v1053_v31  ;;  %1060 = vst.msk [vmem:[#allocation2 + $0xdc] sm:$0xf] %vm949_vm7, %v1049_v32 }
 0x1d2   : > { %v1055_v33 = vpop.permute.xlu1 %1054  ;;  %v1051_v34 = vpop.permute.xlu0 %1050 }
 0x1d3   : > { %1063 = vst.msk [vmem:[#allocation2 + $0xe8] sm:$0xf] %vm949_vm7, %v1055_v33  ;;  %1061 = vst.msk [vmem:[#allocation2 + $0xe0] sm:$0xf] %vm949_vm7, %v1051_v34 }
 0x1d4 PF: > { %p6565_p1 = scmp.ne.s32.totalorder %s7544_s27, 3 }
 0x1d6   : > { %1067 = sbr.rel (%p6565_p1) target bundleno = 478 (0x1de), region = 64 }
 0x1db   : > { %vm1069_vm9 = vcmask 60416   ;;  %v7566_v35 = vmov 0  }
 0x1dc   : > { %1070 = vst.msk [vmem:[#allocation2 + $0xdc] sm:$0xf] %vm1069_vm9, %v7566_v35  ;;  %1071 = vst.msk [vmem:[#allocation2 + $0xe0] sm:$0xf] %vm1069_vm9, %v7566_v35 }
 0x1dd   : > { %1072 = vst.msk [vmem:[#allocation2 + $0xe4] sm:$0xf] %vm1069_vm9, %v7566_v35  ;;  %1073 = vst.msk [vmem:[#allocation2 + $0xe8] sm:$0xf] %vm1069_vm9, %v7566_v35 }
 0x1de PF: > { %v1437_v36 = vld [vmem:[%s10069_s6 + $0x4] sm:$0xf]  ;;  %vm1567_vm10 = vcmask 1043456   ;;  %v1076_v39 = vld [vmem:[#allocation2 + $0x8] sm:$0xf]  ;;  %vm1518_vm11 = vcmask 64512  }
 0x1df   : > { %v1075_v37 = vld [vmem:[#allocation2 + $0x4] sm:$0xf]  ;;  %7359 = vmatprep.subr.msk.bf16.mxu0 %vm1567_vm10, %v1437_v36  ;;  %7360 = vmatprep.subr.msk.bf16.mxu1 %vm1567_vm10, %v1437_v36  ;;  %v1569_v38 = vsel %vm1567_vm10, %v1437_v36, 0  ;;  %v1131_v42 = vshrl.u32 %v1076_v39, 16  ;;  %v1134_v43 = vshll.u32 %v1076_v39, 16 }
 0x1e0   : > { %v1122_v40 = vshrl.u32 %v1075_v37, 16  ;;  %v1125_v41 = vshll.u32 %v1075_v37, 16  ;;  %7052 = vmatpush3.bf16.msra.mxu0 %v1569_v38  ;;  %7358 = vmatpush3.bf16.msra.mxu1 %v1569_v38  ;;  %v6574_v44 = vcombine.low %v1075_v37, %v1076_v39  ;;  %v1095_v45 = vld [vmem:[#allocation2 + $0x64] sm:$0xf]  ;;  %v1096_v46 = vld [vmem:[#allocation2 + $0x68] sm:$0xf] }
 0x1e1   : > { %v1282_v48 = vshrl.u32 %v1095_v45, 16  ;;  %v1285_v49 = vshll.u32 %v1095_v45, 16  ;;  %v1291_v50 = vshrl.u32 %v1096_v46, 16  ;;  %v1077_v51 = vld [vmem:[#allocation2 + $0xc] sm:$0xf]  ;;  %v7954_v52 = vrot.slane %v1131_v42, 7 }
 0x1e2   : > { %v7952_v47 = vrot.slane %v1122_v40, 7  ;;  %7053 = vmatprep.mubr.msk.bf16.mxu0 %vm1518_vm11, %v6574_v44  ;;  %v1294_v53 = vshll.u32 %v1096_v46, 16  ;;  %v6582_v54 = vcombine.low %v1095_v45, %v1096_v46  ;;  %v1078_v55 = vld [vmem:[#allocation2 + $0x10] sm:$0xf]  ;;  %v1140_v56 = vshrl.u32 %v1077_v51, 16 }
 0x1e3   : > { %v7961_v59 = vrot.slane %v1282_v48, 7  ;;  %v7963_v60 = vrot.slane %v1291_v50, 7  ;;  %v7965_v61 = vld [vmem:[#allocation2 + $0x6c] sm:$0xf]  ;;  %v7968_v62 = vor.u32 %v1134_v43, %v7954_v52  ;;  %v1143_v1 = vshll.u32 %v1077_v51, 16 }
 0x1e4   : > { %v7958_v57 = vor.u32 %v1125_v41, %v7952_v47  ;;  %7069 = vmatprep.mubr.msk.bf16.mxu1 %vm1518_vm11, %v6582_v54  ;;  %v7972_v0 = vrot.slane %v1140_v56, 7  ;;  %v7974_v2 = vld [vmem:[#allocation2 + $0x70] sm:$0xf]  ;;  %v1436_v7 = vld [vmem:[%s10069_s6] sm:$0xf]  ;;  %v1149_v11 = vshrl.u32 %v1078_v55, 16  ;;  %v6575_v14 = vcombine.low %v1077_v51, %v1078_v55 }
 0x1e5   : > { %v7977_v3 = vor.u32 %v1285_v49, %v7961_v59  ;;  %v7981_v5 = vor.u32 %v1294_v53, %v7963_v60  ;;  %v2387_v8 = vld [vmem:[%s10069_s6 + $0x8] sm:$0xf]  ;;  %v1152_v12 = vshll.u32 %v1078_v55, 16  ;;  %7361 = vmatprep.subr.msk.bf16.mxu1 %vm1567_vm10, %v1436_v7  ;;  %v7996_v13 = vld [vmem:[#allocation2 + $0x1c] sm:$0xf]  ;;  %v1300_v15 = vshrl.u32 %v7965_v61, 16 }
 0x1e6   : > { %v7991_v9 = vor.u32 %v1143_v1, %v7972_v0  ;;  %7362 = vmatprep.subr.msk.bf16.mxu0 %vm1567_vm10, %v2387_v8  ;;  %v1309_v17 = vshrl.u32 %v7974_v2, 16  ;;  %v8001_v18 = vld [vmem:[#allocation2 + $0x20] sm:$0xf]  ;;  %v1151_v19 = vrot.slane %v1149_v11, 7  ;;  %v6583_v21 = vcombine.low %v7965_v61, %v7974_v2  ;;  %v8007_v23 = vld [vmem:[#allocation2 + $0x7c] sm:$0xf]  ;;  %7054 = vmatmul.mubr.msk.bf16.vlgmr.msra.gmra.mxu0 %vm1518_vm11, %v6575_v14 }
 0x1e7   : > { %v1829_v22 = vsel %vm1567_vm10, %v1436_v7, 0  ;;  %v8010_v24 = vrot.slane %v1300_v15, 7  ;;  %v2485_v26 = vsel %vm1567_vm10, %v2387_v8, 0  ;;  %v1162_v27 = vshrl.u32 %v7996_v13, 16  ;;  %v8016_v28 = vld [vmem:[#allocation2 + $0x80] sm:$0xf] }
 0x1e8   : > { %v8012_v25 = vrot.slane %v1309_v17, 7  ;;  %v8018_v29 = vor.u32 %v1152_v12, %v1151_v19  ;;  %7070 = vmatmul.mubr.msk.bf16.vlgmr.msra.gmra.mxu1 %vm1518_vm11, %v6583_v21  ;;  %7120 = vmatpush3.bf16.msra.mxu0 %v2485_v26  ;;  %v1171_v31 = vshrl.u32 %v8001_v18, 16  ;;  %v8024_v33 = vld [vmem:[#allocation2 + $0x24] sm:$0xf]  ;;  %v6576_v35 = vcombine.low %v7996_v13, %v8001_v18  ;;  %v8032_v38 = vld [vmem:[#allocation2 + $0x28] sm:$0xf] }
 0x1e9   : > { %7086 = vmatpush3.bf16.msra.mxu1 %v1829_v22  ;;  %v8026_v34 = vrot.slane %v1162_v27, 7  ;;  %v1322_v36 = vshrl.u32 %v8007_v23, 16  ;;  %v1331_v40 = vshrl.u32 %v8016_v28, 16  ;;  %v6584_v42 = vcombine.low %v8007_v23, %v8016_v28  ;;  %v8040_v43 = vld [vmem:[#allocation2 + $0x84] sm:$0xf] }
 0x1ea   : > { %v8034_v39 = vrot.slane %v1171_v31, 7  ;;  %10110 = vst [vmem:[#allocation7_spill] sm:$0xff] %v8040_v43  ;;  %7057 = vmatprep.mubr.msk.bf16.mxu0 %vm1518_vm11, %v6576_v35  ;;  %v1180_v45 = vshrl.u32 %v8024_v33, 16  ;;  %v1189_v48 = vshrl.u32 %v8032_v38, 16  ;;  %v8048_v49 = vld [vmem:[#allocation2 + $0x88] sm:$0xf]  ;;  %v6577_v53 = vcombine.low %v8024_v33, %v8032_v38 }
 0x1eb   : > { %v8043_v44 = vrot.slane %v1322_v36, 7  ;;  %10111 = vst [vmem:[#allocation8_spill] sm:$0xff] %v8048_v49  ;;  %v8050_v50 = vrot.slane %v1331_v40, 7  ;;  %7073 = vmatprep.mubr.msk.bf16.mxu1 %vm1518_vm11, %v6584_v42  ;;  %v1340_v54 = vshrl.u32 %v8040_v43, 16  ;;  %v8057_v55 = vld [vmem:[#allocation2 + $0x34] sm:$0xf]  ;;  %v6585_v15 = vcombine.low %v8040_v43, %v8048_v49 }
 0x1ec   : > { %v8059_v56 = vrot.slane %v1180_v45, 7  ;;  %v8061_v1 = vrot.slane %v1189_v48, 7  ;;  %v1349_v8 = vshrl.u32 %v8048_v49, 16  ;;  %v8065_v11 = vld [vmem:[#allocation2 + $0x38] sm:$0xf]  ;;  %v1202_v17 = vshrl.u32 %v8057_v55, 16 }
 0x1ed   : > { %v8067_v12 = vrot.slane %v1340_v54, 7  ;;  %v8073_v19 = vld [vmem:[#allocation2 + $0x94] sm:$0xf]  ;;  %v1211_v26 = vshrl.u32 %v8065_v11, 16  ;;  %v8081_v31 = vld [vmem:[#allocation2 + $0x98] sm:$0xf]  ;;  %v6578_v36 = vcombine.low %v8057_v55, %v8065_v11 }
 0x1ee   : > { %10113 = vst [vmem:[#allocation10_spill] sm:$0xff] %v8073_v19  ;;  %7058 = vmatmul.mubr.msk.bf16.gmra.mxu0 %vm1518_vm11, %v6577_v53  ;;  %v8076_v21 = vrot.slane %v1349_v8, 7  ;;  %10115 = vst [vmem:[#allocation12_spill] sm:$0xff] %v8081_v31  ;;  %v8084_v35 = vrot.slane %v1202_v17, 7  ;;  %v1362_v40 = vshrl.u32 %v8073_v19, 16  ;;  %v1371_v53 = vshrl.u32 %v8081_v31, 16 }
 0x1ef   : > { %10112 = vst [vmem:[#allocation9_spill] sm:$0xff] %v8067_v12  ;;  %v8090_v45 = vld [vmem:[#allocation2 + $0x3c] sm:$0xf]  ;;  %v8092_v48 = vrot.slane %v1211_v26, 7  ;;  %v6586_v8 = vcombine.low %v8073_v19, %v8081_v31  ;;  %7061 = vmatprep.mubr.msk.bf16.mxu0 %vm1518_vm11, %v6578_v36  ;;  %v8114_v36 = vld [vmem:[#allocation2 + $0xa0] sm:$0xf] }
 0x1f0   : > { %10114 = vst [vmem:[#allocation11_spill] sm:$0xff] %v8076_v21  ;;  %7074 = vmatmul.mubr.msk.bf16.gmra.mxu1 %vm1518_vm11, %v6585_v15  ;;  %v8098_v15 = vld [vmem:[#allocation2 + $0x40] sm:$0xf]  ;;  %v8101_v17 = vrot.slane %v1362_v40, 7  ;;  %v1220_v14 = vshrl.u32 %v8090_v45, 16  ;;  %v8108_v41 = vrot.slane %v1371_v53, 7 }
 0x1f1   : > { %v1229_v26 = vshrl.u32 %v8098_v15, 16  ;;  %v8106_v7 = vld [vmem:[#allocation2 + $0x9c] sm:$0xf]  ;;  %7077 = vmatprep.mubr.msk.bf16.mxu1 %vm1518_vm11, %v6586_v8  ;;  %v6579_v37 = vcombine.low %v8090_v45, %v8098_v15  ;;  %10119 = vst [vmem:[#allocation16_spill] sm:$0xff] %v8114_v36  ;;  %v1389_v53 = vshrl.u32 %v8114_v36, 16 }
 0x1f2   : > { %10116 = vst [vmem:[#allocation13_spill] sm:$0xff] %v8101_v17  ;;  %10117 = vst [vmem:[#allocation14_spill] sm:$0xff] %v8106_v7  ;;  %v1380_v40 = vshrl.u32 %v8106_v7, 16  ;;  %v8117_v6 = vrot.slane %v1220_v14, 7  ;;  %v8123_v4 = vld [vmem:[#allocation2 + $0x4c] sm:$0xf]  ;;  %v6587_v42 = vcombine.low %v8106_v7, %v8114_v36 }
 0x1f3   : > { %10118 = vst [vmem:[#allocation15_spill] sm:$0xff] %v8108_v41  ;;  %v8119_v20 = vrot.slane %v1229_v26, 7  ;;  %v8130_v27 = vld [vmem:[#allocation2 + $0x50] sm:$0xf]  ;;  %v1242_v14 = vshrl.u32 %v8123_v4, 16  ;;  %v8133_v22 = vrot.slane %v1389_v53, 7 }
 0x1f4   : > { %v8125_v8 = vrot.slane %v1380_v40, 7  ;;  %v1251_v16 = vshrl.u32 %v8130_v27, 16  ;;  %v8138_v63 = vld [vmem:[#allocation2 + $0xac] sm:$0xf]  ;;  %v6580_v54 = vcombine.low %v8123_v4, %v8130_v27  ;;  %v8145_v58 = vld [vmem:[#allocation2 + $0xb0] sm:$0xf] }
 0x1f5   : > { %10121 = vst [vmem:[#allocation18_spill] sm:$0xff] %v8133_v22  ;;  %10122 = vst [vmem:[#allocation19_spill] sm:$0xff] %v8138_v63  ;;  %v8141_v40 = vrot.slane %v1242_v14, 7  ;;  %v1402_v53 = vshrl.u32 %v8138_v63, 16  ;;  %v1411_v10 = vshrl.u32 %v8145_v58, 16 }
 0x1f6   : > { %10120 = vst [vmem:[#allocation17_spill] sm:$0xff] %v8125_v8  ;;  %7062 = vmatmul.mubr.msk.bf16.gmra.mxu0 %vm1518_vm11, %v6579_v37  ;;  %10123 = vst [vmem:[#allocation20_spill] sm:$0xff] %v8145_v58  ;;  %v8150_v26 = vrot.slane %v1251_v16, 7  ;;  %v6588_v37 = vcombine.low %v8138_v63, %v8145_v58  ;;  %v8156_v14 = vld [vmem:[#allocation2 + $0x54] sm:$0xf] }
 0x1f7   : > { %7065 = vmatprep.mubr.msk.bf16.mxu0 %vm1518_vm11, %v6580_v54  ;;  %v8159_v32 = vrot.slane %v1402_v53, 7  ;;  %v8161_v30 = vld [vmem:[#allocation2 + $0x58] sm:$0xf]  ;;  %v1260_v51 = vshrl.u32 %v8156_v14, 16  ;;  %v8170_v46 = vrot.slane %v1411_v10, 7  ;;  %v10130_v10 = vshll.u32 %v8001_v18, 16 }
 0x1f8   : > { %7078 = vmatmul.mubr.msk.bf16.gmra.mxu1 %vm1518_vm11, %v6587_v42  ;;  %v10125_v42 = vshll.u32 %v7996_v13, 16  ;;  %v1269_v58 = vshrl.u32 %v8161_v30, 16  ;;  %v6581_v53 = vcombine.low %v8156_v14, %v8161_v30  ;;  %v8177_v63 = vld [vmem:[#allocation2 + $0xb4] sm:$0xf]  ;;  %v8181_v16 = vld [vmem:[#allocation2 + $0xb8] sm:$0xf] }
 0x1f9   : > { %10124 = vst [vmem:[#allocation21_spill] sm:$0xff] %v8159_v32  ;;  %10126 = vst [vmem:[#allocation22_spill] sm:$0xff] %v8170_v46  ;;  %7081 = vmatprep.mubr.msk.bf16.mxu1 %vm1518_vm11, %v6588_v37  ;;  %v8179_v32 = vrot.slane %v1260_v51, 7  ;;  %v1420_v13 = vshrl.u32 %v8177_v63, 16  ;;  %v1429_v46 = vshrl.u32 %v8181_v16, 16  ;;  %v6589_v22 = vcombine.low %v8177_v63, %v8181_v16 }
 0x1fa   : > { %v8168_v36 = vor.u32 %v10125_v42, %v8026_v34  ;;  %10127 = vst [vmem:[#allocation23_spill] sm:$0xff] %v8177_v63  ;;  %10128 = vst [vmem:[#allocation24_spill] sm:$0xff] %v8181_v16  ;;  %v8186_v37 = vrot.slane %v1269_v58, 7  ;;  %v1074_v7 = vld [vmem:[#allocation2] sm:$0x8]  ;;  %v1176_v41 = vor.u32 %v10130_v10, %v8034_v39  ;;  %v10136_v10 = vrot.slane %v7952_v47, 4 }
 0x1fb   : > { %v8192_v51 = vrot.slane %v1420_v13, 7  ;;  %vm1114_vm12 = vsmask.f32 4368  ;;  %v1117_v8 = vshrl.u32 %v1074_v7, 16  ;;  %v1992_v31 = vld [vmem:[#allocation2 + $0x4] sm:$0xf] }
 0x1fc   : > { %v8197_v42 = vrot.slane %v1429_v46, 7  ;;  %vm8200_vm13 = vmor %vm691_vm5, %vm1114_vm12  ;;  %v1993_v54 = vld [vmem:[#allocation2 + $0x8] sm:$0xf]  ;;  %v1994_v19 = vld [vmem:[#allocation2 + $0xc] sm:$0xf]  ;;  %v2036_v16 = vshrl.u32 %v1992_v31, 16 }
 0x1fd   : > { %10129 = vst [vmem:[#allocation25_spill] sm:$0xff] %v8192_v51  ;;  %v10134_v13 = vshll.u32 %v8024_v33, 16  ;;  %v10135_v7 = vshll.u32 %v8032_v38, 16  ;;  %v6566_v46 = vrot.slane %v1117_v8, 11  ;;  %vm2032_vm14 = vsmask.f32 3328 }
 0x1fe   : > { %10131 = vst [vmem:[#allocation26_spill] sm:$0xff] %v8197_v42  ;;  %7066 = vmatmul.mubr.msk.bf16.gmra.mxu0 %vm1518_vm11, %v6581_v53  ;;  %v1137_v42 = vsel %vm8200_vm13, %v10136_v10, %v7968_v62  ;;  %vm2033_vm15 = vsmask.f32 7440  ;;  %v2038_v33 = vrot.slane %v2036_v16, 4  ;;  %v2045_v51 = vshll.u32 %v1993_v54, 16 }
 0x1ff   : > { %v8207_v63 = vor.u32 %v10134_v13, %v8059_v56  ;;  %v8212_v18 = vor.u32 %v10135_v7, %v8061_v1  ;;  %v2039_v13 = vshll.u32 %v1992_v31, 16  ;;  %v2049_v17 = vshrl.u32 %v1993_v54, 16  ;;  %v1995_v38 = vld [vmem:[#allocation2 + $0x10] sm:$0xf]  ;;  %v1996_v7 = vld [vmem:[#allocation2 + $0x14] sm:$0x1]  ;;  %vm8245_vm0 = vmor %vm2032_vm14, %vm2033_vm15 }
 0x200   : > { %7082 = vmatmul.mubr.msk.bf16.gmra.mxu1 %vm1518_vm11, %v6589_v22  ;;  %v1128_v1 = vsel %vm8200_vm13, %v6566_v46, %v7958_v57  ;;  %v2055_v8 = vshll.u32 %v1994_v19, 16  ;;  %v2059_v53 = vshrl.u32 %v1994_v19, 16  ;;  %v10137_v47 = vrot.slane %v7954_v52, 4  ;;  %v3040_v22 = vld [vmem:[%s10069_s6 + $0xc] sm:$0xf] }
 0x201   : > { %v6606_v31 = vcombine.low %v1128_v1, %v1137_v42  ;;  %v2041_v16 = vrot.slane %v2039_v13, 5  ;;  %v2047_v54 = vrot.slane %v2045_v51, 5  ;;  %v2051_v10 = vrot.slane %v2049_v17, 4  ;;  %7363 = vmatprep.subr.msk.bf16.mxu1 %vm1567_vm10, %v3040_v22  ;;  %v3333_v57 = vld [vmem:[%s10069_s6 + $0x10] sm:$0xf] }
 0x202   : > { %v1146_v62 = vsel %vm8200_vm13, %v10137_v47, %v7991_v9  ;;  %v2057_v19 = vrot.slane %v2055_v8, 5  ;;  %v2061_v52 = vrot.slane %v2059_v53, 4  ;;  %v10138_v9 = vrot.slane %v7972_v0, 4  ;;  %7364 = vmatprep.subr.msk.bf16.mxu0 %vm1567_vm10, %v3333_v57  ;;  %v1079_v1 = vld [vmem:[#allocation2 + $0x18] sm:$0x8] }
 0x203   : > { %v2065_v47 = vshll.u32 %v1995_v38, 16  ;;  %7087 = vmatprep.mubr.msk.bf16.mxu1 %vm1518_vm11, %v6606_v31  ;;  %v2042_v17 = vor.u32 %v2041_v16, %v2038_v33  ;;  %v2052_v42 = vor.u32 %v2051_v10, %v2047_v54  ;;  %v2069_v13 = vshrl.u32 %v1995_v38, 16  ;;  %v1998_v12 = vld [vmem:[#allocation2 + $0x20] sm:$0xf] }
 0x204   : > { %v1155_v46 = vsel %vm8200_vm13, %v10138_v9, %v8018_v29  ;;  %v2062_v0 = vor.u32 %v2061_v52, %v2057_v19  ;;  %v2075_v49 = vshll.u32 %v1996_v7, 16  ;;  %v3138_v29 = vsel %vm1567_vm10, %v3040_v22, 0  ;;  %v1997_v9 = vld [vmem:[#allocation2 + $0x1c] sm:$0xf] }
 0x205   : > { %v6607_v51 = vcombine.low %v1146_v62, %v1155_v46  ;;  %v2067_v53 = vrot.slane %v2065_v47, 5  ;;  %v2043_v21 = vrot.slane %v2042_v17, 4  ;;  %v2053_v43 = vrot.slane %v2052_v42, 4  ;;  %v1999_v47 = vld [vmem:[#allocation2 + $0x24] sm:$0xf] }
 0x206   : > { %v2071_v31 = vrot.slane %v2069_v13, 4  ;;  %v3463_v33 = vsel %vm1567_vm10, %v3333_v57, 0  ;;  %v2063_v62 = vrot.slane %v2062_v0, 4  ;;  %v2077_v38 = vrot.slane %v2075_v49, 5 }
 0x207   : > { %v1157_v16 = vshrl.u32 %v1079_v1, 16  ;;  %v10141_v10 = vrot.slane %v8026_v34, 4  ;;  %v2048_v7 = vsel %vm8245_vm0, %v2043_v21, %v2047_v54  ;;  %v2058_v22 = vsel %vm8245_vm0, %v2053_v43, %v2057_v19 }
 0x208   : > { %7088 = vmatmul.mubr.msk.bf16.vlgmr.msra.gmra.mxu1 %vm1518_vm11, %v6607_v51  ;;  %v2072_v52 = vor.u32 %v2071_v31, %v2067_v53  ;;  %v2080_v57 = vshrl.u32 %v1997_v9, 16  ;;  %v6638_v17 = vcombine.low %v2048_v7, %v2058_v22  ;;  %v2068_v49 = vsel %vm8245_vm0, %v2063_v62, %v2067_v53  ;;  %v2000_v51 = vld [vmem:[#allocation2 + $0x28] sm:$0xf]  ;;  %v2001_v62 = vld [vmem:[#allocation2 + $0x2c] sm:$0x1] }
 0x209   : > { %v1177_v46 = vsel %vm8200_vm13, %v10141_v10, %v1176_v41  ;;  %7154 = vmatpush3.bf16.msra.mxu1 %v3138_v29  ;;  %v6567_v34 = vrot.slane %v1157_v16, 11  ;;  %v2083_v42 = vshll.u32 %v1997_v9, 16  ;;  %v2089_v1 = vshll.u32 %v1998_v12, 16 }
 0x20a   : > { %v2073_v41 = vrot.slane %v2072_v52, 4  ;;  %v2082_v13 = vrot.slane %v2080_v57, 4  ;;  %v2093_v0 = vshrl.u32 %v1998_v12, 16  ;;  %7121 = vmatprep.mubr.msk.bf16.mxu0 %vm1518_vm11, %v6638_v17  ;;  %v2099_v54 = vshll.u32 %v1999_v47, 16 }
 0x20b   : > { %v1168_v43 = vsel %vm8200_vm13, %v6567_v34, %v8168_v36  ;;  %v2085_v21 = vrot.slane %v2083_v42, 5  ;;  %v2103_v19 = vshrl.u32 %v1999_v47, 16  ;;  %v2091_v31 = vrot.slane %v2089_v1, 5 }
 0x20c   : > { %v2078_v53 = vsel %vm8245_vm0, %v2073_v41, %v2077_v38  ;;  %v6608_v29 = vcombine.low %v1168_v43, %v1177_v46  ;;  %v2095_v9 = vrot.slane %v2093_v0, 4  ;;  %v2101_v12 = vrot.slane %v2099_v54, 5  ;;  %v2002_v43 = vld [vmem:[#allocation2 + $0x34] sm:$0xf] }
 0x20d   : > { %v6639_v16 = vcombine.low %v2068_v49, %v2078_v53  ;;  %v2086_v10 = vor.u32 %v2085_v21, %v2082_v13  ;;  %v1178_v7 = vrot.slane %v8034_v39, 4  ;;  %v1187_v36 = vrot.slane %v8059_v56, 4  ;;  %v1084_v49 = vld [vmem:[#allocation2 + $0x30] sm:$0x8] }
 0x20e   : > { %7091 = vmatprep.mubr.msk.bf16.mxu1 %vm1518_vm11, %v6608_v29  ;;  %v2096_v22 = vor.u32 %v2095_v9, %v2091_v31  ;;  %v2105_v52 = vrot.slane %v2103_v19, 4  ;;  %v2109_v47 = vshll.u32 %v2000_v51, 16  ;;  %v2113_v46 = vshrl.u32 %v2000_v51, 16  ;;  %v2003_v51 = vld [vmem:[#allocation2 + $0x38] sm:$0xf] }
 0x20f   : > { %7122 = vmatmul.mubr.msk.bf16.vlgmr.msra.gmra.mxu0 %vm1518_vm11, %v6639_v16  ;;  %v2087_v57 = vrot.slane %v2086_v10, 4  ;;  %v1186_v38 = vsel %vm8200_vm13, %v1178_v7, %v8207_v63  ;;  %v2119_v17 = vshll.u32 %v2001_v62, 16  ;;  %v1195_v39 = vsel %vm8200_vm13, %v1187_v36, %v8212_v18  ;;  %v2004_v62 = vld [vmem:[#allocation2 + $0x3c] sm:$0xf] }
 0x210   : > { %7188 = vmatpush3.bf16.msra.mxu0 %v3463_v33  ;;  %v2097_v34 = vrot.slane %v2096_v22, 4  ;;  %v2106_v42 = vor.u32 %v2105_v52, %v2101_v12  ;;  %v2111_v56 = vrot.slane %v2109_v47, 5  ;;  %v6609_v13 = vcombine.low %v1186_v38, %v1195_v39 }
 0x211   : > { %v2092_v41 = vsel %vm8245_vm0, %v2087_v57, %v2091_v31  ;;  %v2115_v1 = vrot.slane %v2113_v46, 4  ;;  %v2121_v0 = vrot.slane %v2119_v17, 5  ;;  %v1197_v54 = vshrl.u32 %v1084_v49, 16 }
 0x212   : > { %v2102_v63 = vsel %vm8245_vm0, %v2097_v34, %v2101_v12  ;;  %v2107_v21 = vrot.slane %v2106_v42, 4  ;;  %v10142_v33 = vshll.u32 %v8057_v55, 16  ;;  %7092 = vmatmul.mubr.msk.bf16.gmra.mxu1 %vm1518_vm11, %v6609_v13  ;;  %v1209_v29 = vrot.slane %v8084_v35, 4  ;;  %v2005_v34 = vld [vmem:[#allocation2 + $0x40] sm:$0xf] }
 0x213   : > { %v6640_v18 = vcombine.low %v2092_v41, %v2102_v63  ;;  %v2116_v53 = vor.u32 %v2115_v1, %v2111_v56  ;;  %v10143_v31 = vshll.u32 %v8065_v11, 16  ;;  %v6568_v10 = vrot.slane %v1197_v54, 11  ;;  %v2006_v13 = vld [vmem:[#allocation2 + $0x44] sm:$0x1] }
 0x214   : > { %v1207_v19 = vor.u32 %v10142_v33, %v8084_v35  ;;  %v2112_v16 = vsel %vm8245_vm0, %v2107_v21, %v2111_v56  ;;  %v2124_v12 = vshrl.u32 %v2002_v43, 16  ;;  %v2127_v7 = vshll.u32 %v2002_v43, 16 }
 0x215   : > { %v1216_v9 = vor.u32 %v10143_v31, %v8092_v48  ;;  %7125 = vmatprep.mubr.msk.bf16.mxu0 %vm1518_vm11, %v6640_v18  ;;  %v2117_v55 = vrot.slane %v2116_v53, 4  ;;  %v2133_v36 = vshll.u32 %v2003_v51, 16  ;;  %v2137_v52 = vshrl.u32 %v2003_v51, 16 }
 0x216   : > { %v1208_v35 = vsel %vm8200_vm13, %v6568_v10, %v1207_v19  ;;  %v2126_v11 = vrot.slane %v2124_v12, 4  ;;  %v2129_v47 = vrot.slane %v2127_v7, 5  ;;  %v2143_v57 = vshll.u32 %v2004_v62, 16  ;;  %v2007_v10 = vld [vmem:[#allocation2 + $0x4c] sm:$0xf] }
 0x217   : > { %v1217_v22 = vsel %vm8200_vm13, %v1209_v29, %v1216_v9  ;;  %v2122_v38 = vsel %vm8245_vm0, %v2117_v55, %v2121_v0  ;;  %v2135_v17 = vrot.slane %v2133_v36, 5  ;;  %v2139_v49 = vrot.slane %v2137_v52, 4  ;;  %v1089_v9 = vld [vmem:[#allocation2 + $0x48] sm:$0x8]  ;;  %v2008_v55 = vld [vmem:[#allocation2 + $0x50] sm:$0xf] }
 0x218   : > { %v6610_v46 = vcombine.low %v1208_v35, %v1217_v22  ;;  %v6641_v39 = vcombine.low %v2112_v16, %v2122_v38  ;;  %v2130_v42 = vor.u32 %v2129_v47, %v2126_v11  ;;  %v2145_v56 = vrot.slane %v2143_v57, 5 }
 0x219   : > { %v2147_v41 = vshrl.u32 %v2004_v62, 16  ;;  %v2140_v1 = vor.u32 %v2139_v49, %v2135_v17  ;;  %v1218_v43 = vrot.slane %v8092_v48, 4  ;;  %v10144_v63 = vshll.u32 %v8090_v45, 16 }
 0x21a   : > { %7095 = vmatprep.mubr.msk.bf16.mxu1 %vm1518_vm11, %v6610_v46  ;;  %v1227_v0 = vrot.slane %v8117_v6, 4  ;;  %7126 = vmatmul.mubr.msk.bf16.gmra.mxu0 %vm1518_vm11, %v6641_v39  ;;  %v2131_v54 = vrot.slane %v2130_v42, 4  ;;  %v10145_v33 = vshll.u32 %v8098_v15, 16  ;;  %v2153_v18 = vshll.u32 %v2005_v34, 16 }
 0x21b   : > { %v1225_v21 = vor.u32 %v10144_v63, %v8117_v6  ;;  %v2149_v51 = vrot.slane %v2147_v41, 4  ;;  %v2141_v53 = vrot.slane %v2140_v1, 4  ;;  %v2157_v48 = vshrl.u32 %v2005_v34, 16 }
 0x21c   : > { %v1234_v19 = vor.u32 %v10145_v33, %v8119_v20  ;;  %v2163_v31 = vshll.u32 %v2006_v13, 16  ;;  %v2136_v45 = vsel %vm8245_vm0, %v2131_v54, %v2135_v17  ;;  %v2155_v16 = vrot.slane %v2153_v18, 5  ;;  %v2009_v17 = vld [vmem:[#allocation2 + $0x54] sm:$0xf]  ;;  %v8344_v18 = vld [vmem:[%s10069_s6 + $0x18] sm:$0xf] }
 0x21d   : > { %v1226_v29 = vsel %vm8200_vm13, %v1218_v43, %v1225_v21  ;;  %v2150_v62 = vor.u32 %v2149_v51, %v2145_v56  ;;  %v2146_v20 = vsel %vm8245_vm0, %v2141_v53, %v2145_v56  ;;  %v2159_v12 = vrot.slane %v2157_v48, 4  ;;  %v8335_v21 = vld [vmem:[%s10069_s6 + $0x14] sm:$0xf]  ;;  %v2010_v51 = vld [vmem:[#allocation2 + $0x58] sm:$0xf]  ;;  %7366 = vmatprep.subr.msk.bf16.mxu0 %vm1567_vm10, %v8344_v18 }
 0x21e   : > { %v1235_v6 = vsel %vm8200_vm13, %v1227_v0, %v1234_v19  ;;  %v2165_v7 = vrot.slane %v2163_v31, 5  ;;  %v6642_v22 = vcombine.low %v2136_v45, %v2146_v20  ;;  %v1237_v52 = vshrl.u32 %v1089_v9, 16  ;;  %7365 = vmatprep.subr.msk.bf16.mxu1 %vm1567_vm10, %v8335_v21  ;;  %v2011_v9 = vld [vmem:[#allocation2 + $0x5c] sm:$0x1] }
 0x21f   : > { %v6611_v15 = vcombine.low %v1226_v29, %v1235_v6  ;;  %v2151_v36 = vrot.slane %v2150_v62, 4  ;;  %v10146_v35 = vshll.u32 %v8123_v4, 16  ;;  %v2160_v47 = vor.u32 %v2159_v12, %v2155_v16 }
 0x220   : > { %v1249_v57 = vrot.slane %v8141_v40, 4  ;;  %v10147_v38 = vshll.u32 %v8130_v27, 16  ;;  %v2168_v49 = vshrl.u32 %v2007_v10, 16  ;;  %7129 = vmatprep.mubr.msk.bf16.mxu0 %vm1518_vm11, %v6642_v22  ;;  %v6569_v39 = vrot.slane %v1237_v52, 11 }
 0x221   : > { %v1247_v11 = vor.u32 %v10146_v35, %v8141_v40  ;;  %7096 = vmatmul.mubr.msk.bf16.gmra.mxu1 %vm1518_vm11, %v6611_v15  ;;  %v2156_v34 = vsel %vm8245_vm0, %v2151_v36, %v2155_v16  ;;  %v2171_v42 = vshll.u32 %v2007_v10, 16  ;;  %v2177_v4 = vshll.u32 %v2008_v55, 16 }
 0x222   : > { %v1256_v46 = vor.u32 %v10147_v38, %v8150_v26  ;;  %v2161_v56 = vrot.slane %v2160_v47, 4  ;;  %v2170_v13 = vrot.slane %v2168_v49, 4  ;;  %v2181_v40 = vshrl.u32 %v2008_v55, 16  ;;  %v1094_v55 = vld [vmem:[#allocation2 + $0x60] sm:$0x8] }
 0x223   : > { %v1248_v27 = vsel %vm8200_vm13, %v6569_v39, %v1247_v11  ;;  %v2173_v1 = vrot.slane %v2171_v42, 5  ;;  %v2179_v43 = vrot.slane %v2177_v4, 5  ;;  %v2187_v63 = vshll.u32 %v2009_v17, 16  ;;  %v2013_v47 = vld [vmem:[#allocation2 + $0x68] sm:$0xf] }
 0x224   : > { %v1257_v41 = vsel %vm8200_vm13, %v1249_v57, %v1256_v46  ;;  %v2166_v0 = vsel %vm8245_vm0, %v2161_v56, %v2165_v7  ;;  %v2183_v33 = vrot.slane %v2181_v40, 4  ;;  %v2191_v19 = vshrl.u32 %v2009_v17, 16  ;;  %v2014_v49 = vld [vmem:[#allocation2 + $0x6c] sm:$0xf] }
 0x225   : > { %v6612_v54 = vcombine.low %v1248_v27, %v1257_v41  ;;  %v6643_v53 = vcombine.low %v2156_v34, %v2166_v0  ;;  %v2174_v29 = vor.u32 %v2173_v1, %v2170_v13  ;;  %v2189_v48 = vrot.slane %v2187_v63, 5 }
 0x226   : > { %v1258_v31 = vrot.slane %v8150_v26, 4  ;;  %v2184_v45 = vor.u32 %v2183_v33, %v2179_v43  ;;  %v10148_v6 = vshll.u32 %v8156_v14, 16  ;;  %v1267_v16 = vrot.slane %v8179_v32, 4 }
 0x227   : > { %7099 = vmatprep.mubr.msk.bf16.mxu1 %vm1518_vm11, %v6612_v54  ;;  %v10149_v10 = vshll.u32 %v8161_v30, 16  ;;  %7130 = vmatmul.mubr.msk.bf16.gmra.mxu0 %vm1518_vm11, %v6643_v53  ;;  %v2175_v26 = vrot.slane %v2174_v29, 4  ;;  %v2193_v15 = vrot.slane %v2191_v19, 4  ;;  %v2197_v12 = vshll.u32 %v2010_v51, 16 }
 0x228   : > { %v1265_v62 = vor.u32 %v10148_v6, %v8179_v32  ;;  %v2201_v7 = vshrl.u32 %v2010_v51, 16  ;;  %v2185_v22 = vrot.slane %v2184_v45, 4  ;;  %v2207_v52 = vshll.u32 %v2011_v9, 16  ;;  %v2012_v32 = vld [vmem:[#allocation2 + $0x64] sm:$0xf] }
 0x229   : > { %v1274_v20 = vor.u32 %v10149_v10, %v8186_v37  ;;  %v2180_v30 = vsel %vm8245_vm0, %v2175_v26, %v2179_v43  ;;  %v2194_v35 = vor.u32 %v2193_v15, %v2189_v48  ;;  %v2199_v11 = vrot.slane %v2197_v12, 5 }
 0x22a   : > { %v1266_v36 = vsel %vm8200_vm13, %v1258_v31, %v1265_v62  ;;  %v2190_v57 = vsel %vm8245_vm0, %v2185_v22, %v2189_v48  ;;  %v2203_v38 = vrot.slane %v2201_v7, 4  ;;  %v2209_v46 = vrot.slane %v2207_v52, 5  ;;  %v2015_v48 = vld [vmem:[#allocation2 + $0x70] sm:$0xf] }
 0x22b   : > { %v1275_v14 = vsel %vm8200_vm13, %v1267_v16, %v1274_v20  ;;  %v1277_v17 = vshrl.u32 %v1094_v55, 16  ;;  %v6644_v34 = vcombine.low %v2180_v30, %v2190_v57  ;;  %v2195_v39 = vrot.slane %v2194_v35, 4  ;;  %v2016_v16 = vld [vmem:[#allocation2 + $0x74] sm:$0x1] }
 0x22c   : > { %v6613_v37 = vcombine.low %v1266_v36, %v1275_v14  ;;  %v10150_v42 = vrot.slane %v7961_v59, 4  ;;  %v2212_v56 = vshrl.u32 %v2012_v32, 16  ;;  %v2204_v41 = vor.u32 %v2203_v38, %v2199_v11  ;;  %v1099_v36 = vld [vmem:[#allocation2 + $0x78] sm:$0x8]  ;;  %v2018_v38 = vld [vmem:[#allocation2 + $0x80] sm:$0xf] }
 0x22d   : > { %v6570_v13 = vrot.slane %v1277_v17, 11  ;;  %v2215_v40 = vshll.u32 %v2012_v32, 16  ;;  %v2221_v27 = vshll.u32 %v2013_v47, 16  ;;  %7133 = vmatprep.mubr.msk.bf16.mxu0 %vm1518_vm11, %v6644_v34  ;;  %v2200_v1 = vsel %vm8245_vm0, %v2195_v39, %v2199_v11 }
 0x22e   : > { %7100 = vmatmul.mubr.msk.bf16.gmra.mxu1 %vm1518_vm11, %v6613_v37  ;;  %v1297_v4 = vsel %vm8200_vm13, %v10150_v42, %v7981_v5  ;;  %v2214_v43 = vrot.slane %v2212_v56, 4  ;;  %v2225_v63 = vshrl.u32 %v2013_v47, 16  ;;  %v2231_v0 = vshll.u32 %v2014_v49, 16  ;;  %v2017_v37 = vld [vmem:[#allocation2 + $0x7c] sm:$0xf] }
 0x22f   : > { %v2205_v54 = vrot.slane %v2204_v41, 4  ;;  %v1288_v59 = vsel %vm8200_vm13, %v6570_v13, %v7977_v3  ;;  %v2217_v33 = vrot.slane %v2215_v40, 5  ;;  %v2223_v5 = vrot.slane %v2221_v27, 5  ;;  %v2019_v42 = vld [vmem:[#allocation2 + $0x84] sm:$0xf] }
 0x230   : > { %v6614_v19 = vcombine.low %v1288_v59, %v1297_v4  ;;  %v2227_v51 = vrot.slane %v2225_v63, 4  ;;  %v2233_v53 = vrot.slane %v2231_v0, 5  ;;  %v2235_v29 = vshrl.u32 %v2014_v49, 16 }
 0x231   : > { %v2210_v31 = vsel %vm8245_vm0, %v2205_v54, %v2209_v46  ;;  %v2218_v9 = vor.u32 %v2217_v33, %v2214_v43  ;;  %v10151_v45 = vshll.u32 %v7965_v61, 16  ;;  %v1307_v62 = vrot.slane %v8010_v24, 4 }
 0x232   : > { %v6645_v10 = vcombine.low %v2200_v1, %v2210_v31  ;;  %7103 = vmatprep.mubr.msk.bf16.mxu1 %vm1518_vm11, %v6614_v19  ;;  %v2228_v3 = vor.u32 %v2227_v51, %v2223_v5  ;;  %v10152_v20 = vshll.u32 %v7974_v2, 16  ;;  %v2237_v15 = vrot.slane %v2235_v29, 4  ;;  %v2020_v19 = vld [vmem:[#allocation2 + $0x88] sm:$0xf]  ;;  %v2021_v31 = vld [vmem:[#allocation2 + $0x8c] sm:$0x1] }
 0x233   : > { %v1305_v6 = vor.u32 %v10151_v45, %v8010_v24  ;;  %v2219_v12 = vrot.slane %v2218_v9, 4  ;;  %v10153_v7 = vrot.slane %v7963_v60, 4  ;;  %v2241_v61 = vshll.u32 %v2015_v48, 16 }
 0x234   : > { %v1314_v26 = vor.u32 %v10152_v20, %v8012_v25  ;;  %v2245_v22 = vshrl.u32 %v2015_v48, 16  ;;  %7134 = vmatmul.mubr.msk.bf16.gmra.mxu0 %vm1518_vm11, %v6645_v10  ;;  %v2229_v24 = vrot.slane %v2228_v3, 4  ;;  %v2238_v52 = vor.u32 %v2237_v15, %v2233_v53  ;;  %v10160_v15 = vld [vmem:[#allocation8_spill] sm:$0xff] }
 0x235   : > { %v1306_v55 = vsel %vm8200_vm13, %v10153_v7, %v1305_v6  ;;  %v2251_v32 = vshll.u32 %v2016_v16, 16  ;;  %v2224_v2 = vsel %vm8245_vm0, %v2219_v12, %v2223_v5  ;;  %v2243_v30 = vrot.slane %v2241_v61, 5  ;;  %v10156_v6 = vld [vmem:[#allocation9_spill] sm:$0xff] }
 0x236   : > { %v1315_v14 = vsel %vm8200_vm13, %v1307_v62, %v1314_v26  ;;  %v2247_v60 = vrot.slane %v2245_v22, 4  ;;  %v2234_v35 = vsel %vm8245_vm0, %v2229_v24, %v2233_v53  ;;  %v2239_v11 = vrot.slane %v2238_v52, 4  ;;  %v10157_v62 = vld [vmem:[#allocation7_spill] sm:$0xff] }
 0x237   : > { %v6615_v25 = vcombine.low %v1306_v55, %v1315_v14  ;;  %v2253_v47 = vrot.slane %v2251_v32, 5  ;;  %v1317_v57 = vshrl.u32 %v1099_v36, 16  ;;  %v6646_v46 = vcombine.low %v2224_v2, %v2234_v35  ;;  %v10159_v26 = vld [vmem:[#allocation11_spill] sm:$0xff] }
 0x238   : > { %v2248_v17 = vor.u32 %v2247_v60, %v2243_v30  ;;  %v10154_v49 = vshll.u32 %v8007_v23, 16  ;;  %v1329_v39 = vrot.slane %v8043_v44, 4  ;;  %v2244_v4 = vsel %vm8245_vm0, %v2239_v11, %v2243_v30  ;;  %v1104_v14 = vld [vmem:[#allocation2 + $0x90] sm:$0x8]  ;;  %v2022_v11 = vld [vmem:[#allocation2 + $0x94] sm:$0xf] }
 0x239   : > { %7104 = vmatmul.mubr.msk.bf16.gmra.mxu1 %vm1518_vm11, %v6615_v25  ;;  %v6571_v56 = vrot.slane %v1317_v57, 11  ;;  %v10155_v41 = vshll.u32 %v8016_v28, 16  ;;  %v2256_v40 = vshrl.u32 %v2017_v37, 16  ;;  %7137 = vmatprep.mubr.msk.bf16.mxu0 %vm1518_vm11, %v6646_v46  ;;  %v2259_v1 = vshll.u32 %v2017_v37, 16  ;;  %v10162_v46 = vld [vmem:[#allocation13_spill] sm:$0xff] }
 0x23a   : > { %v1327_v34 = vor.u32 %v10154_v49, %v8043_v44  ;;  %v2249_v27 = vrot.slane %v2248_v17, 4  ;;  %v2265_v43 = vshll.u32 %v2018_v38, 16  ;;  %v2269_v63 = vshrl.u32 %v2018_v38, 16  ;;  %v10163_v17 = vld [vmem:[#allocation10_spill] sm:$0xff] }
 0x23b   : > { %v1336_v13 = vor.u32 %v10155_v41, %v8050_v50  ;;  %v2258_v0 = vrot.slane %v2256_v40, 4  ;;  %v2275_v54 = vshll.u32 %v2019_v42, 16  ;;  %v2261_v33 = vrot.slane %v2259_v1, 5  ;;  %v10165_v41 = vld [vmem:[#allocation15_spill] sm:$0xff]  ;;  %v2024_v1 = vld [vmem:[#allocation2 + $0x9c] sm:$0xf] }
 0x23c   : > { %v1328_v23 = vsel %vm8200_vm13, %v6571_v56, %v1327_v34  ;;  %v2254_v59 = vsel %vm8245_vm0, %v2249_v27, %v2253_v47  ;;  %v2267_v5 = vrot.slane %v2265_v43, 5  ;;  %v2271_v53 = vrot.slane %v2269_v63, 4 }
 0x23d   : > { %v1337_v44 = vsel %vm8200_vm13, %v1329_v39, %v1336_v13  ;;  %v6647_v51 = vcombine.low %v2244_v4, %v2254_v59  ;;  %v2277_v29 = vrot.slane %v2275_v54, 5  ;;  %v2279_v48 = vshrl.u32 %v2019_v42, 16  ;;  %v2023_v39 = vld [vmem:[#allocation2 + $0x98] sm:$0xf] }
 0x23e   : > { %v6616_v28 = vcombine.low %v1328_v23, %v1337_v44  ;;  %v2262_v9 = vor.u32 %v2261_v33, %v2258_v0  ;;  %v1338_v45 = vrot.slane %v8050_v50, 4  ;;  %v10158_v16 = vshll.u32 %v10157_v62, 16  ;;  %v10166_v13 = vld [vmem:[#allocation12_spill] sm:$0xff] }
 0x23f   : > { %v1347_v3 = vrot.slane %v10156_v6, 4  ;;  %7138 = vmatmul.mubr.msk.bf16.gmra.mxu0 %vm1518_vm11, %v6647_v51  ;;  %v2272_v20 = vor.u32 %v2271_v53, %v2267_v5  ;;  %v10161_v12 = vshll.u32 %v10160_v15, 16  ;;  %v2281_v55 = vrot.slane %v2279_v48, 4  ;;  %v10169_v15 = vld [vmem:[#allocation14_spill] sm:$0xff] }
 0x240   : > { %7107 = vmatprep.mubr.msk.bf16.mxu1 %vm1518_vm11, %v6616_v28  ;;  %v1345_v10 = vor.u32 %v10158_v16, %v10156_v6  ;;  %v2285_v61 = vshll.u32 %v2020_v19, 16  ;;  %v2263_v22 = vrot.slane %v2262_v9, 4  ;;  %v2289_v50 = vshrl.u32 %v2020_v19, 16  ;;  %v2025_v9 = vld [vmem:[#allocation2 + $0xa0] sm:$0xf] }
 0x241   : > { %v1354_v7 = vor.u32 %v10161_v12, %v10159_v26  ;;  %v2295_v24 = vshll.u32 %v2021_v31, 16  ;;  %v2273_v52 = vrot.slane %v2272_v20, 4  ;;  %v2282_v2 = vor.u32 %v2281_v55, %v2277_v29  ;;  %v10168_v26 = vld [vmem:[#allocation17_spill] sm:$0xff] }
 0x242   : > { %v1346_v36 = vsel %vm8200_vm13, %v1338_v45, %v1345_v10  ;;  %v2287_v25 = vrot.slane %v2285_v61, 5  ;;  %v2268_v30 = vsel %vm8245_vm0, %v2263_v22, %v2267_v5  ;;  %v2291_v37 = vrot.slane %v2289_v50, 4  ;;  %v2026_v10 = vld [vmem:[#allocation2 + $0xa4] sm:$0x1]  ;;  %v10171_v22 = vld [vmem:[#allocation18_spill] sm:$0xff] }
 0x243   : > { %v1355_v32 = vsel %vm8200_vm13, %v1347_v3, %v1354_v7  ;;  %v2297_v35 = vrot.slane %v2295_v24, 5  ;;  %v2278_v47 = vsel %vm8245_vm0, %v2273_v52, %v2277_v29  ;;  %v2283_v57 = vrot.slane %v2282_v2, 4 }
 0x244   : > { %v6617_v60 = vcombine.low %v1346_v36, %v1355_v32  ;;  %v1357_v38 = vshrl.u32 %v1104_v14, 16  ;;  %v10164_v49 = vshll.u32 %v10163_v17, 16  ;;  %v6648_v42 = vcombine.low %v2268_v30, %v2278_v47  ;;  %v10172_v36 = vld [vmem:[#allocation16_spill] sm:$0xff] }
 0x245   : > { %v2292_v4 = vor.u32 %v2291_v37, %v2287_v25  ;;  %v1369_v56 = vrot.slane %v10162_v46, 4  ;;  %v10167_v40 = vshll.u32 %v10166_v13, 16  ;;  %v2288_v43 = vsel %vm8245_vm0, %v2283_v57, %v2287_v25  ;;  %v2027_v57 = vld [vmem:[#allocation2 + $0xac] sm:$0xf] }
 0x246   : > { %v1367_v34 = vor.u32 %v10164_v49, %v10162_v46  ;;  %7108 = vmatmul.mubr.msk.bf16.gmra.mxu1 %vm1518_vm11, %v6617_v60  ;;  %v6572_v63 = vrot.slane %v1357_v38, 11  ;;  %v2300_v23 = vshrl.u32 %v2022_v11, 16  ;;  %v2303_v44 = vshll.u32 %v2022_v11, 16  ;;  %7141 = vmatprep.mubr.msk.bf16.mxu0 %vm1518_vm11, %v6648_v42  ;;  %v1109_v60 = vld [vmem:[#allocation2 + $0xa8] sm:$0x8] }
 0x247   : > { %v1376_v27 = vor.u32 %v10167_v40, %v10165_v41  ;;  %v2293_v0 = vrot.slane %v2292_v4, 4  ;;  %v2309_v59 = vshll.u32 %v2023_v39, 16  ;;  %v2313_v28 = vshrl.u32 %v2023_v39, 16 }
 0x248   : > { %v1368_v33 = vsel %vm8200_vm13, %v6572_v63, %v1367_v34  ;;  %v2302_v5 = vrot.slane %v2300_v23, 4  ;;  %v2305_v19 = vrot.slane %v2303_v44, 5  ;;  %v2319_v51 = vshll.u32 %v2024_v1, 16  ;;  %v2028_v34 = vld [vmem:[#allocation2 + $0xb0] sm:$0xf]  ;;  %v10178_v63 = vld [vmem:[#allocation20_spill] sm:$0xff] }
 0x249   : > { %v1377_v54 = vsel %vm8200_vm13, %v1369_v56, %v1376_v27  ;;  %v2298_v53 = vsel %vm8245_vm0, %v2293_v0, %v2297_v35  ;;  %v2311_v48 = vrot.slane %v2309_v59, 5  ;;  %v2315_v31 = vrot.slane %v2313_v28, 4  ;;  %v10174_v56 = vld [vmem:[#allocation21_spill] sm:$0xff]  ;;  %v2029_v0 = vld [vmem:[#allocation2 + $0xb4] sm:$0xf] }
 0x24a   : > { %v6618_v29 = vcombine.low %v1368_v33, %v1377_v54  ;;  %v6649_v45 = vcombine.low %v2288_v43, %v2298_v53  ;;  %v2306_v6 = vor.u32 %v2305_v19, %v2302_v5  ;;  %v2321_v62 = vrot.slane %v2319_v51, 5  ;;  %v10177_v43 = vld [vmem:[#allocation22_spill] sm:$0xff] }
 0x24b   : > { %v2323_v16 = vshrl.u32 %v2024_v1, 16  ;;  %v2316_v3 = vor.u32 %v2315_v31, %v2311_v48  ;;  %v1378_v20 = vrot.slane %v10165_v41, 4  ;;  %v10170_v12 = vshll.u32 %v10169_v15, 16  ;;  %v10175_v41 = vld [vmem:[#allocation19_spill] sm:$0xff] }
 0x24c   : > { %7111 = vmatprep.mubr.msk.bf16.mxu1 %vm1518_vm11, %v6618_v29  ;;  %v1387_v55 = vrot.slane %v10168_v26, 4  ;;  %7142 = vmatmul.mubr.msk.bf16.gmra.mxu0 %vm1518_vm11, %v6649_v45  ;;  %v2307_v61 = vrot.slane %v2306_v6, 4  ;;  %v10173_v50 = vshll.u32 %v10172_v36, 16  ;;  %v2329_v52 = vshll.u32 %v2025_v9, 16 }
 0x24d   : > { %v1385_v7 = vor.u32 %v10170_v12, %v10168_v26  ;;  %v2325_v14 = vrot.slane %v2323_v16, 4  ;;  %v2317_v32 = vrot.slane %v2316_v3, 4  ;;  %v2333_v25 = vshrl.u32 %v2025_v9, 16  ;;  %v2030_v3 = vld [vmem:[#allocation2 + $0xb8] sm:$0xf] }
 0x24e   : > { %v1394_v24 = vor.u32 %v10173_v50, %v10171_v22  ;;  %v2339_v30 = vshll.u32 %v2026_v10, 16  ;;  %v2312_v37 = vsel %vm8245_vm0, %v2307_v61, %v2311_v48  ;;  %v2331_v47 = vrot.slane %v2329_v52, 5  ;;  %v10180_v61 = vld [vmem:[#allocation25_spill] sm:$0xff]  ;;  %v10181_v22 = vld [vmem:[#allocation23_spill] sm:$0xff]  ;;  %v10184_v52 = vld [vmem:[#allocation24_spill] sm:$0xff] }
 0x24f   : > { %v1386_v2 = vsel %vm8200_vm13, %v1378_v20, %v1385_v7  ;;  %v2326_v11 = vor.u32 %v2325_v14, %v2321_v62  ;;  %v2322_v38 = vsel %vm8245_vm0, %v2317_v32, %v2321_v62  ;;  %v2335_v17 = vrot.slane %v2333_v25, 4  ;;  %v2031_v7 = vld [vmem:[#allocation2 + $0xbc] sm:$0x1]  ;;  %v10183_v14 = vld [vmem:[#allocation26_spill] sm:$0xff] }
 0x250   : > { %v1395_v35 = vsel %vm8200_vm13, %v1387_v55, %v1394_v24  ;;  %v2341_v49 = vrot.slane %v2339_v30, 5  ;;  %v6650_v39 = vcombine.low %v2312_v37, %v2322_v38  ;;  %v1397_v4 = vshrl.u32 %v1109_v60, 16 }
 0x251   : > { %v6619_v46 = vcombine.low %v1386_v2, %v1395_v35  ;;  %v2327_v42 = vrot.slane %v2326_v11, 4  ;;  %v10176_v13 = vshll.u32 %v10175_v41, 16  ;;  %v2336_v27 = vor.u32 %v2335_v17, %v2331_v47  ;;  %v2680_v35 = vld [vmem:[#allocation2 + $0x18] sm:$0x8] }
 0x252   : > { %v1409_v1 = vrot.slane %v10174_v56, 4  ;;  %v10179_v23 = vshll.u32 %v10178_v63, 16  ;;  %v2344_v54 = vshrl.u32 %v2027_v57, 16  ;;  %7145 = vmatprep.mubr.msk.bf16.mxu0 %vm1518_vm11, %v6650_v39  ;;  %v6573_v28 = vrot.slane %v1397_v4, 11 }
 0x253   : > { %v1407_v40 = vor.u32 %v10176_v13, %v10174_v56  ;;  %7112 = vmatmul.mubr.msk.bf16.gmra.mxu1 %vm1518_vm11, %v6619_v46  ;;  %v2332_v59 = vsel %vm8245_vm0, %v2327_v42, %v2331_v47  ;;  %v2347_v33 = vshll.u32 %v2027_v57, 16  ;;  %v2353_v5 = vshll.u32 %v2028_v34, 16  ;;  %v2681_v46 = vld [vmem:[#allocation2 + $0x1c] sm:$0xf]  ;;  %v2682_v42 = vld [vmem:[#allocation2 + $0x20] sm:$0xf] }
 0x254   : > { %v1416_v44 = vor.u32 %v10179_v23, %v10177_v43  ;;  %v2337_v19 = vrot.slane %v2336_v27, 4  ;;  %v2346_v53 = vrot.slane %v2344_v54, 4  ;;  %v2357_v29 = vshrl.u32 %v2028_v34, 16  ;;  %v8507_v23 = vld [vmem:[#allocation2 + $0x28] sm:$0xf] }
 0x255   : > { %v1408_v48 = vsel %vm8200_vm13, %v6573_v28, %v1407_v40  ;;  %v2349_v31 = vrot.slane %v2347_v33, 5  ;;  %v2355_v9 = vrot.slane %v2353_v5, 5  ;;  %v2363_v45 = vshll.u32 %v2029_v0, 16  ;;  %v8504_v40 = vld [vmem:[#allocation2 + $0x24] sm:$0xf] }
 0x256   : > { %v1417_v51 = vsel %vm8200_vm13, %v1409_v1, %v1416_v44  ;;  %v2342_v6 = vsel %vm8245_vm0, %v2337_v19, %v2341_v49  ;;  %v2359_v16 = vrot.slane %v2357_v29, 4  ;;  %v2367_v10 = vshrl.u32 %v2029_v0, 16 }
 0x257   : > { %v6620_v62 = vcombine.low %v1408_v48, %v1417_v51  ;;  %v6651_v20 = vcombine.low %v2332_v59, %v2342_v6  ;;  %v2350_v26 = vor.u32 %v2349_v31, %v2346_v53  ;;  %v2365_v15 = vrot.slane %v2363_v45, 5 }
 0x258   : > { %v1418_v12 = vrot.slane %v10177_v43, 4  ;;  %v2360_v55 = vor.u32 %v2359_v16, %v2355_v9  ;;  %v10182_v36 = vshll.u32 %v10181_v22, 16  ;;  %v1427_v24 = vrot.slane %v10180_v61, 4 }
 0x259   : > { %7115 = vmatprep.mubr.msk.bf16.mxu1 %vm1518_vm11, %v6620_v62  ;;  %v10185_v32 = vshll.u32 %v10184_v52, 16  ;;  %7146 = vmatmul.mubr.msk.bf16.gmra.mxu0 %vm1518_vm11, %v6651_v20  ;;  %v2351_v25 = vrot.slane %v2350_v26, 4  ;;  %v2369_v30 = vrot.slane %v2367_v10, 4  ;;  %v2373_v60 = vshll.u32 %v2030_v3, 16  ;;  %v2685_v20 = vld [vmem:[#allocation2 + $0x30] sm:$0x8] }
 0x25a   : > { %v1425_v50 = vor.u32 %v10182_v36, %v10180_v61  ;;  %v2377_v37 = vshrl.u32 %v2030_v3, 16  ;;  %v2361_v11 = vrot.slane %v2360_v55, 4  ;;  %v2383_v38 = vshll.u32 %v2031_v7, 16  ;;  %v2686_v55 = vld [vmem:[#allocation2 + $0x34] sm:$0xf] }
 0x25b   : > { %v1434_v2 = vor.u32 %v10185_v32, %v10183_v14  ;;  %v2356_v17 = vsel %vm8245_vm0, %v2351_v25, %v2355_v9  ;;  %v2370_v34 = vor.u32 %v2369_v30, %v2365_v15  ;;  %v2375_v39 = vrot.slane %v2373_v60, 5  ;;  %v2687_v61 = vld [vmem:[#allocation2 + $0x38] sm:$0xf]  ;;  %v8531_v25 = vld [vmem:[#allocation2 + $0x3c] sm:$0xf] }
 0x25c   : > { %v1426_v47 = vsel %vm8200_vm13, %v1418_v12, %v1425_v50  ;;  %v2366_v4 = vsel %vm8245_vm0, %v2361_v11, %v2365_v15  ;;  %v2379_v56 = vrot.slane %v2377_v37, 4  ;;  %v2385_v41 = vrot.slane %v2383_v38, 5  ;;  %v8533_v30 = vld [vmem:[#allocation2 + $0x40] sm:$0xf]  ;;  %v2690_v11 = vld [vmem:[#allocation2 + $0x48] sm:$0x8] }
 0x25d   : > { %v1435_v57 = vsel %vm8200_vm13, %v1427_v24, %v1434_v2  ;;  %v2721_v13 = vshrl.u32 %v2680_v35, 16  ;;  %v6652_v27 = vcombine.low %v2356_v17, %v2366_v4  ;;  %v2371_v1 = vrot.slane %v2370_v34, 4 }
 0x25e   : > { %v6621_v49 = vcombine.low %v1426_v47, %v1435_v57  ;;  %v2726_v43 = vshrl.u32 %v2681_v46, 16  ;;  %v2729_v63 = vshll.u32 %v2681_v46, 16  ;;  %v2380_v44 = vor.u32 %v2379_v56, %v2375_v39 }
 0x25f   : > { %v6670_v0 = vrot.slane %v2721_v13, 11  ;;  %v2735_v54 = vshrl.u32 %v2682_v42, 16  ;;  %v2738_v59 = vshll.u32 %v2682_v42, 16  ;;  %7149 = vmatprep.mubr.msk.bf16.mxu0 %vm1518_vm11, %v6652_v27  ;;  %v2376_v28 = vsel %vm8245_vm0, %v2371_v1, %v2375_v39  ;;  %v8553_v13 = vld [vmem:[#allocation2 + $0x50] sm:$0xf] }
 0x260   : > { %7116 = vmatmul.mubr.msk.bf16.gmra.mxu1 %vm1518_vm11, %v6621_v49  ;;  %v2728_v33 = vrot.slane %v2726_v43, 7  ;;  %v6710_v5 = vcombine.low %v2681_v46, %v2682_v42  ;;  %v2744_v19 = vshrl.u32 %v8504_v40, 16  ;;  %v2381_v51 = vrot.slane %v2380_v44, 4  ;;  %v8539_v46 = vld [vmem:[#allocation2 + $0x4c] sm:$0xf] }
 0x261   : > { %v2737_v53 = vrot.slane %v2735_v54, 7  ;;  %v2747_v29 = vshll.u32 %v8504_v40, 16  ;;  %v2753_v48 = vshrl.u32 %v8507_v23, 16  ;;  %v2756_v6 = vshll.u32 %v8507_v23, 16  ;;  %v8546_v42 = vld [vmem:[%s10069_s6 + $0x1c] sm:$0xf] }
 0x262   : > { %v2731_v31 = vor.u32 %v2729_v63, %v2728_v33  ;;  %v2733_v9 = vrot.slane %v2728_v33, 4  ;;  %v2746_v45 = vrot.slane %v2744_v19, 7  ;;  %v2386_v62 = vsel %vm8245_vm0, %v2381_v51, %v2385_v41  ;;  %v8564_v19 = vld [vmem:[#allocation2 + $0x54] sm:$0xf]  ;;  %v8569_v51 = vld [vmem:[%s10069_s6 + $0x20] sm:$0xf] }
 0x263   : > { %v2740_v16 = vor.u32 %v2738_v59, %v2737_v53  ;;  %v2742_v10 = vrot.slane %v2737_v53, 4  ;;  %v2755_v3 = vrot.slane %v2753_v48, 7  ;;  %v6653_v26 = vcombine.low %v2376_v28, %v2386_v62 }
 0x264   : > { %v2732_v15 = vsel %vm8200_vm13, %v6670_v0, %v2731_v31  ;;  %v2749_v12 = vor.u32 %v2747_v29, %v2746_v45  ;;  %v2751_v7 = vrot.slane %v2746_v45, 4  ;;  %v6711_v50 = vcombine.low %v8504_v40, %v8507_v23 }
 0x265   : > { %v2741_v22 = vsel %vm8200_vm13, %v2733_v9, %v2740_v16  ;;  %v2758_v36 = vor.u32 %v2756_v6, %v2755_v3  ;;  %v4148_v24 = vsel %vm1567_vm10, %v8335_v21, 0  ;;  %7150 = vmatmul.mubr.msk.bf16.gmra.mxu0 %vm1518_vm11, %v6653_v26  ;;  %v4802_v32 = vsel %vm1567_vm10, %v8344_v18, 0  ;;  %v8576_v16 = vld [vmem:[#allocation2 + $0x58] sm:$0xf] }
 0x266   : > { %v6678_v14 = vcombine.low %v2732_v15, %v2741_v22  ;;  %v2750_v52 = vsel %vm8200_vm13, %v2742_v10, %v2749_v12  ;;  %v2761_v2 = vshrl.u32 %v2685_v20, 16  ;;  %7189 = vmatprep.mubr.msk.bf16.mxu0 %vm1518_vm11, %v6710_v5  ;;  %v2766_v21 = vshrl.u32 %v2686_v55, 16  ;;  %v2695_v15 = vld [vmem:[#allocation2 + $0x60] sm:$0x8]  ;;  %v8587_v22 = vld [vmem:[#allocation2 + $0x64] sm:$0xf] }
 0x267   : > { %v2759_v60 = vsel %vm8200_vm13, %v2751_v7, %v2758_v36  ;;  %v2769_v37 = vshll.u32 %v2686_v55, 16  ;;  %v2775_v35 = vshrl.u32 %v2687_v61, 16  ;;  %v2778_v38 = vshll.u32 %v2687_v61, 16 }
 0x268   : > { %7155 = vmatprep.mubr.msk.bf16.mxu1 %vm1518_vm11, %v6678_v14  ;;  %v6679_v47 = vcombine.low %v2750_v52, %v2759_v60  ;;  %v6671_v57 = vrot.slane %v2761_v2, 11  ;;  %v6712_v18 = vcombine.low %v2686_v55, %v2687_v61  ;;  %v2768_v17 = vrot.slane %v2766_v21, 7  ;;  %v8591_v52 = vld [vmem:[#allocation2 + $0x68] sm:$0xf] }
 0x269   : > { %v2777_v49 = vrot.slane %v2775_v35, 7  ;;  %v2784_v34 = vshrl.u32 %v8531_v25, 16  ;;  %v2787_v39 = vshll.u32 %v8531_v25, 16  ;;  %v2793_v4 = vshrl.u32 %v8533_v30, 16 }
 0x26a   : > { %7156 = vmatmul.mubr.msk.bf16.vlgmr.msra.gmra.mxu1 %vm1518_vm11, %v6679_v47  ;;  %v2796_v56 = vshll.u32 %v8533_v30, 16  ;;  %v6713_v41 = vcombine.low %v8531_v25, %v8533_v30  ;;  %v2801_v40 = vshrl.u32 %v2690_v11, 16  ;;  %v2771_v27 = vor.u32 %v2769_v37, %v2768_v17  ;;  %v2700_v30 = vld [vmem:[#allocation2 + $0x78] sm:$0x8] }
 0x26b   : > { %7222 = vmatpush3.bf16.msra.mxu1 %v4148_v24  ;;  %v2773_v1 = vrot.slane %v2768_v17, 4  ;;  %v2780_v43 = vor.u32 %v2778_v38, %v2777_v49  ;;  %v2782_v63 = vrot.slane %v2777_v49, 4  ;;  %v2786_v23 = vrot.slane %v2784_v34, 7  ;;  %v8605_v49 = vld [vmem:[#allocation2 + $0x70] sm:$0xf] }
 0x26c   : > { %v2795_v44 = vrot.slane %v2793_v4, 7  ;;  %v6672_v0 = vrot.slane %v2801_v40, 11  ;;  %v2806_v54 = vshrl.u32 %v8539_v46, 16  ;;  %7367 = vmatprep.subr.msk.bf16.mxu1 %vm1567_vm10, %v8546_v42  ;;  %v2772_v59 = vsel %vm8200_vm13, %v6671_v57, %v2771_v27  ;;  %v8600_v57 = vld [vmem:[#allocation2 + $0x6c] sm:$0xf] }
 0x26d   : > { %v2781_v28 = vsel %vm8200_vm13, %v2773_v1, %v2780_v43  ;;  %v2809_v33 = vshll.u32 %v8539_v46, 16  ;;  %v2815_v5 = vshrl.u32 %v8553_v13, 16  ;;  %7190 = vmatmul.mubr.msk.bf16.vlgmr.msra.gmra.mxu0 %vm1518_vm11, %v6711_v50  ;;  %v2789_v29 = vor.u32 %v2787_v39, %v2786_v23 }
 0x26e   : > { %v6680_v53 = vcombine.low %v2772_v59, %v2781_v28  ;;  %v2791_v48 = vrot.slane %v2786_v23, 4  ;;  %v2798_v31 = vor.u32 %v2796_v56, %v2795_v44  ;;  %7256 = vmatpush3.bf16.msra.mxu0 %v4802_v32  ;;  %7193 = vmatprep.mubr.msk.bf16.mxu0 %vm1518_vm11, %v6712_v18  ;;  %v2808_v9 = vrot.slane %v2806_v54, 7  ;;  %v8626_v23 = vld [vmem:[#allocation2 + $0x7c] sm:$0xf] }
 0x26f   : > { %v2817_v45 = vrot.slane %v2815_v5, 7  ;;  %v2818_v6 = vshll.u32 %v8553_v13, 16  ;;  %v6714_v62 = vcombine.low %v8539_v46, %v8553_v13  ;;  %v2790_v10 = vsel %vm8200_vm13, %v2782_v63, %v2789_v29  ;;  %7368 = vmatprep.subr.msk.bf16.mxu0 %vm1567_vm10, %v8569_v51 }
 0x270   : > { %7159 = vmatprep.mubr.msk.bf16.mxu1 %vm1518_vm11, %v6680_v53  ;;  %v2799_v3 = vsel %vm8200_vm13, %v2791_v48, %v2798_v31  ;;  %v2824_v20 = vshrl.u32 %v8564_v19, 16  ;;  %v2827_v26 = vshll.u32 %v8564_v19, 16  ;;  %v2811_v7 = vor.u32 %v2809_v33, %v2808_v9 }
 0x271   : > { %v6681_v12 = vcombine.low %v2790_v10, %v2799_v3  ;;  %v2813_v55 = vrot.slane %v2808_v9, 4  ;;  %v2820_v61 = vor.u32 %v2818_v6, %v2817_v45  ;;  %v2822_v36 = vrot.slane %v2817_v45, 4  ;;  %v8637_v45 = vld [vmem:[#allocation2 + $0x84] sm:$0xf] }
 0x272   : > { %v2826_v50 = vrot.slane %v2824_v20, 7  ;;  %v2833_v24 = vshrl.u32 %v8576_v16, 16  ;;  %v2836_v14 = vshll.u32 %v8576_v16, 16  ;;  %v2812_v32 = vsel %vm8200_vm13, %v6672_v0, %v2811_v7 }
 0x273   : > { %7160 = vmatmul.mubr.msk.bf16.gmra.mxu1 %vm1518_vm11, %v6681_v12  ;;  %v2821_v2 = vsel %vm8200_vm13, %v2813_v55, %v2820_v61  ;;  %v6715_v60 = vcombine.low %v8564_v19, %v8576_v16  ;;  %v2841_v21 = vshrl.u32 %v2695_v15, 16  ;;  %v2846_v18 = vshrl.u32 %v8587_v22, 16  ;;  %v8628_v19 = vld [vmem:[#allocation2 + $0x80] sm:$0xf]  ;;  %v8641_v12 = vld [vmem:[#allocation2 + $0x88] sm:$0xf] }
 0x274   : > { %v6682_v37 = vcombine.low %v2812_v32, %v2821_v2  ;;  %v2829_v35 = vor.u32 %v2827_v26, %v2826_v50  ;;  %v2831_v11 = vrot.slane %v2826_v50, 4  ;;  %v2835_v47 = vrot.slane %v2833_v24, 7  ;;  %v8653_v32 = vld [vmem:[#allocation2 + $0x94] sm:$0xf] }
 0x275   : > { %v6673_v38 = vrot.slane %v2841_v21, 11  ;;  %v2849_v46 = vshll.u32 %v8587_v22, 16  ;;  %v2855_v17 = vshrl.u32 %v8591_v52, 16  ;;  %7194 = vmatmul.mubr.msk.bf16.gmra.mxu0 %vm1518_vm11, %v6713_v41  ;;  %v2858_v4 = vshll.u32 %v8591_v52, 16 }
 0x276   : > { %7163 = vmatprep.mubr.msk.bf16.mxu1 %vm1518_vm11, %v6682_v37  ;;  %v2830_v34 = vsel %vm8200_vm13, %v2822_v36, %v2829_v35  ;;  %v2838_v39 = vor.u32 %v2836_v14, %v2835_v47  ;;  %v6716_v56 = vcombine.low %v8587_v22, %v8591_v52  ;;  %7197 = vmatprep.mubr.msk.bf16.mxu0 %vm1518_vm11, %v6714_v62  ;;  %v2848_v13 = vrot.slane %v2846_v18, 7  ;;  %v2705_v52 = vld [vmem:[#allocation2 + $0x90] sm:$0x8]  ;;  %v8658_v35 = vld [vmem:[#allocation2 + $0x98] sm:$0xf] }
 0x277   : > { %v2857_v40 = vrot.slane %v2855_v17, 7  ;;  %v2864_v27 = vshrl.u32 %v8600_v57, 16  ;;  %v2867_v25 = vshll.u32 %v8600_v57, 16  ;;  %v2873_v1 = vshrl.u32 %v8605_v49, 16 }
 0x278   : > { %v2839_v41 = vsel %vm8200_vm13, %v2831_v11, %v2838_v39  ;;  %v2876_v43 = vshll.u32 %v8605_v49, 16  ;;  %v6717_v63 = vcombine.low %v8600_v57, %v8605_v49  ;;  %v2851_v0 = vor.u32 %v2849_v46, %v2848_v13  ;;  %v8690_v49 = vld [vmem:[#allocation2 + $0xac] sm:$0xf] }
 0x279   : > { %v6683_v44 = vcombine.low %v2830_v34, %v2839_v41  ;;  %v2853_v54 = vrot.slane %v2848_v13, 4  ;;  %v2860_v59 = vor.u32 %v2858_v4, %v2857_v40  ;;  %v2862_v28 = vrot.slane %v2857_v40, 4  ;;  %v8664_v4 = vld [vmem:[#allocation2 + $0x9c] sm:$0xf] }
 0x27a   : > { %v2866_v33 = vrot.slane %v2864_v27, 7  ;;  %v2875_v5 = vrot.slane %v2873_v1, 7  ;;  %v2881_v53 = vshrl.u32 %v2700_v30, 16  ;;  %v2852_v29 = vsel %vm8200_vm13, %v6673_v38, %v2851_v0 }
 0x27b   : > { %7164 = vmatmul.mubr.msk.bf16.gmra.mxu1 %vm1518_vm11, %v6683_v44  ;;  %v2861_v48 = vsel %vm8200_vm13, %v2853_v54, %v2860_v59  ;;  %v2886_v31 = vshrl.u32 %v8626_v23, 16  ;;  %v2889_v9 = vshll.u32 %v8626_v23, 16  ;;  %v2895_v26 = vshrl.u32 %v8628_v19, 16 }
 0x27c   : > { %v6684_v6 = vcombine.low %v2852_v29, %v2861_v48  ;;  %v2869_v62 = vor.u32 %v2867_v25, %v2866_v33  ;;  %v2871_v16 = vrot.slane %v2866_v33, 4  ;;  %v2878_v10 = vor.u32 %v2876_v43, %v2875_v5  ;;  %v8672_v25 = vld [vmem:[#allocation2 + $0xa0] sm:$0xf] }
 0x27d   : > { %v6674_v3 = vrot.slane %v2881_v53, 11  ;;  %v2888_v20 = vrot.slane %v2886_v31, 7  ;;  %v2898_v15 = vshll.u32 %v8628_v19, 16  ;;  %7198 = vmatmul.mubr.msk.bf16.gmra.mxu0 %vm1518_vm11, %v6715_v60  ;;  %v6718_v61 = vcombine.low %v8626_v23, %v8628_v19  ;;  %v2710_v19 = vld [vmem:[#allocation2 + $0xa8] sm:$0x8] }
 0x27e   : > { %7167 = vmatprep.mubr.msk.bf16.mxu1 %vm1518_vm11, %v6684_v6  ;;  %v2870_v7 = vsel %vm8200_vm13, %v2862_v28, %v2869_v62  ;;  %v2879_v55 = vsel %vm8200_vm13, %v2871_v16, %v2878_v10  ;;  %v2904_v22 = vshrl.u32 %v8637_v45, 16  ;;  %7201 = vmatprep.mubr.msk.bf16.mxu0 %vm1518_vm11, %v6716_v56  ;;  %v2897_v14 = vrot.slane %v2895_v26, 7  ;;  %v8693_v62 = vld [vmem:[#allocation2 + $0xb0] sm:$0xf] }
 0x27f   : > { %v6685_v36 = vcombine.low %v2870_v7, %v2879_v55  ;;  %v2891_v50 = vor.u32 %v2889_v9, %v2888_v20  ;;  %v2893_v24 = vrot.slane %v2888_v20, 4  ;;  %v2907_v60 = vshll.u32 %v8637_v45, 16 }
 0x280   : > { %v2906_v2 = vrot.slane %v2904_v22, 7  ;;  %v2913_v21 = vshrl.u32 %v8641_v12, 16  ;;  %v2916_v37 = vshll.u32 %v8641_v12, 16  ;;  %v2900_v47 = vor.u32 %v2898_v15, %v2897_v14 }
 0x281   : > { %v2892_v11 = vsel %vm8200_vm13, %v6674_v3, %v2891_v50  ;;  %v2902_v38 = vrot.slane %v2897_v14, 4  ;;  %v6719_v18 = vcombine.low %v8637_v45, %v8641_v12  ;;  %v2921_v39 = vshrl.u32 %v2705_v52, 16  ;;  %v8707_v14 = vld [vmem:[#allocation2 + $0xb8] sm:$0xf] }
 0x282   : > { %v2909_v46 = vor.u32 %v2907_v60, %v2906_v2  ;;  %v2911_v17 = vrot.slane %v2906_v2, 4  ;;  %v2915_v34 = vrot.slane %v2913_v21, 7  ;;  %v2901_v56 = vsel %vm8200_vm13, %v2893_v24, %v2900_v47  ;;  %v2715_v21 = vld [vmem:[#allocation2 + $0xc0] sm:$0x8] }
 0x283   : > { %7168 = vmatmul.mubr.msk.bf16.gmra.mxu1 %vm1518_vm11, %v6685_v36  ;;  %v2926_v13 = vshrl.u32 %v8653_v32, 16  ;;  %v2929_v40 = vshll.u32 %v8653_v32, 16  ;;  %v2935_v27 = vshrl.u32 %v8658_v35, 16  ;;  %v6686_v30 = vcombine.low %v2892_v11, %v2901_v56  ;;  %v8729_v56 = vld [vmem:[#allocation2 + $0xc8] sm:$0xf] }
 0x284   : > { %v2910_v41 = vsel %vm8200_vm13, %v2902_v38, %v2909_v46  ;;  %v2918_v1 = vor.u32 %v2916_v37, %v2915_v34  ;;  %v6675_v43 = vrot.slane %v2921_v39, 11  ;;  %v2938_v0 = vshll.u32 %v8658_v35, 16  ;;  %v8718_v38 = vld [vmem:[#allocation2 + $0xc4] sm:$0xf] }
 0x285   : > { %v2928_v23 = vrot.slane %v2926_v13, 7  ;;  %v2937_v44 = vrot.slane %v2935_v27, 7  ;;  %v6720_v54 = vcombine.low %v8653_v32, %v8658_v35  ;;  %7202 = vmatmul.mubr.msk.bf16.gmra.mxu0 %vm1518_vm11, %v6717_v63  ;;  %7171 = vmatprep.mubr.msk.bf16.mxu1 %vm1518_vm11, %v6686_v30  ;;  %v2944_v28 = vshrl.u32 %v8664_v4, 16 }
 0x286   : > { %v2919_v59 = vsel %vm8200_vm13, %v2911_v17, %v2918_v1  ;;  %v2947_v33 = vshll.u32 %v8664_v4, 16  ;;  %v2953_v5 = vshrl.u32 %v8672_v25, 16  ;;  %7205 = vmatprep.mubr.msk.bf16.mxu0 %vm1518_vm11, %v6718_v61  ;;  %v2956_v6 = vshll.u32 %v8672_v25, 16  ;;  %v8701_v61 = vld [vmem:[#allocation2 + $0xb4] sm:$0xf] }
 0x287   : > { %v6687_v53 = vcombine.low %v2910_v41, %v2919_v59  ;;  %v2931_v29 = vor.u32 %v2929_v40, %v2928_v23  ;;  %v2933_v48 = vrot.slane %v2928_v23, 4  ;;  %v2940_v57 = vor.u32 %v2938_v0, %v2937_v44  ;;  %v8739_v0 = vld [vmem:[#allocation2 + $0xcc] sm:$0xf] }
 0x288   : > { %v2942_v63 = vrot.slane %v2937_v44, 4  ;;  %v2946_v31 = vrot.slane %v2944_v28, 7  ;;  %v2955_v9 = vrot.slane %v2953_v5, 7  ;;  %v6721_v3 = vcombine.low %v8664_v4, %v8672_v25  ;;  %v3660_v25 = vld [vmem:[#allocation2 + $0x24] sm:$0xf] }
 0x289   : > { %v2932_v16 = vsel %vm8200_vm13, %v6675_v43, %v2931_v29  ;;  %v2941_v10 = vsel %vm8200_vm13, %v2933_v48, %v2940_v57  ;;  %v2961_v20 = vshrl.u32 %v2710_v19, 16  ;;  %v2966_v36 = vshrl.u32 %v8690_v49, 16  ;;  %v8743_v48 = vld [vmem:[#allocation2 + $0xd0] sm:$0xf] }
 0x28a   : > { %v6688_v26 = vcombine.low %v2932_v16, %v2941_v10  ;;  %v2949_v15 = vor.u32 %v2947_v33, %v2946_v31  ;;  %v2951_v7 = vrot.slane %v2946_v31, 4  ;;  %v2958_v55 = vor.u32 %v2956_v6, %v2955_v9  ;;  %v3658_v10 = vld [vmem:[#allocation2 + $0x1c] sm:$0xf] }
 0x28b   : > { %7172 = vmatmul.mubr.msk.bf16.gmra.mxu1 %vm1518_vm11, %v6687_v53  ;;  %v6676_v22 = vrot.slane %v2961_v20, 11  ;;  %v2969_v50 = vshll.u32 %v8690_v49, 16  ;;  %v2975_v24 = vshrl.u32 %v8693_v62, 16  ;;  %v2978_v2 = vshll.u32 %v8693_v62, 16 }
 0x28c   : > { %7175 = vmatprep.mubr.msk.bf16.mxu1 %vm1518_vm11, %v6688_v26  ;;  %v2950_v52 = vsel %vm8200_vm13, %v2942_v63, %v2949_v15  ;;  %v2959_v32 = vsel %vm8200_vm13, %v2951_v7, %v2958_v55  ;;  %v6722_v60 = vcombine.low %v8690_v49, %v8693_v62  ;;  %v2968_v35 = vrot.slane %v2966_v36, 7  ;;  %v3659_v55 = vld [vmem:[#allocation2 + $0x20] sm:$0xf] }
 0x28d   : > { %v6689_v37 = vcombine.low %v2950_v52, %v2959_v32  ;;  %v2977_v11 = vrot.slane %v2975_v24, 7  ;;  %v2984_v47 = vshrl.u32 %v8701_v61, 16  ;;  %7206 = vmatmul.mubr.msk.bf16.gmra.mxu0 %vm1518_vm11, %v6719_v18  ;;  %v2987_v46 = vshll.u32 %v8701_v61, 16 }
 0x28e   : > { %v2993_v17 = vshrl.u32 %v8707_v14, 16  ;;  %v2996_v34 = vshll.u32 %v8707_v14, 16  ;;  %v6723_v39 = vcombine.low %v8701_v61, %v8707_v14  ;;  %7209 = vmatprep.mubr.msk.bf16.mxu0 %vm1518_vm11, %v6720_v54  ;;  %v2971_v13 = vor.u32 %v2969_v50, %v2968_v35 }
 0x28f   : > { %v2973_v40 = vrot.slane %v2968_v35, 4  ;;  %v2980_v27 = vor.u32 %v2978_v2, %v2977_v11  ;;  %v2982_v30 = vrot.slane %v2977_v11, 4  ;;  %v2986_v45 = vrot.slane %v2984_v47, 7  ;;  %v4344_v35 = vld [vmem:[#allocation2 + $0x30] sm:$0x8] }
 0x290   : > { %v2995_v12 = vrot.slane %v2993_v17, 7  ;;  %v3001_v18 = vshrl.u32 %v2715_v21, 16  ;;  %v3006_v41 = vshrl.u32 %v8718_v38, 16  ;;  %v2972_v1 = vsel %vm8200_vm13, %v6676_v22, %v2971_v13  ;;  %v4345_v17 = vld [vmem:[#allocation2 + $0x34] sm:$0xf] }
 0x291   : > { %v2981_v43 = vsel %vm8200_vm13, %v2973_v40, %v2980_v27  ;;  %v3009_v23 = vshll.u32 %v8718_v38, 16  ;;  %v3015_v44 = vshrl.u32 %v8729_v56, 16  ;;  %v2989_v59 = vor.u32 %v2987_v46, %v2986_v45  ;;  %v4346_v27 = vld [vmem:[#allocation2 + $0x38] sm:$0xf] }
 0x292   : > { %v6690_v54 = vcombine.low %v2972_v1, %v2981_v43  ;;  %v2991_v28 = vrot.slane %v2986_v45, 4  ;;  %v2998_v33 = vor.u32 %v2996_v34, %v2995_v12  ;;  %v6677_v5 = vrot.slane %v3001_v18, 11 }
 0x293   : > { %7176 = vmatmul.mubr.msk.bf16.gmra.mxu1 %vm1518_vm11, %v6689_v37  ;;  %v3008_v19 = vrot.slane %v3006_v41, 7  ;;  %v3017_v53 = vrot.slane %v3015_v44, 7  ;;  %v3018_v29 = vshll.u32 %v8729_v56, 16  ;;  %v2990_v57 = vsel %vm8200_vm13, %v2982_v30, %v2989_v59  ;;  %v3661_v44 = vld [vmem:[#allocation2 + $0x28] sm:$0xf] }
 0x294   : > { %7179 = vmatprep.mubr.msk.bf16.mxu1 %vm1518_vm11, %v6690_v54  ;;  %v2999_v49 = vsel %vm8200_vm13, %v2991_v28, %v2998_v33  ;;  %v6724_v63 = vcombine.low %v8718_v38, %v8729_v56  ;;  %v3024_v31 = vshrl.u32 %v8739_v0, 16  ;;  %v3027_v15 = vshll.u32 %v8739_v0, 16 }
 0x295   : > { %v6691_v9 = vcombine.low %v2990_v57, %v2999_v49  ;;  %v3011_v6 = vor.u32 %v3009_v23, %v3008_v19  ;;  %v3013_v62 = vrot.slane %v3008_v19, 4  ;;  %v3020_v16 = vor.u32 %v3018_v29, %v3017_v53  ;;  %7210 = vmatmul.mubr.msk.bf16.gmra.mxu0 %vm1518_vm11, %v6721_v3  ;;  %v3662_v57 = vld [vmem:[#allocation2 + $0x2c] sm:$0x1] }
 0x296   : > { %v3022_v20 = vrot.slane %v3017_v53, 4  ;;  %v3026_v26 = vrot.slane %v3024_v31, 7  ;;  %v3033_v7 = vshrl.u32 %v8743_v48, 16  ;;  %7213 = vmatprep.mubr.msk.bf16.mxu0 %vm1518_vm11, %v6722_v60  ;;  %v3036_v50 = vshll.u32 %v8743_v48, 16 }
 0x297   : > { %v3012_v22 = vsel %vm8200_vm13, %v6677_v5, %v3011_v6  ;;  %v3021_v36 = vsel %vm8200_vm13, %v3013_v62, %v3020_v16  ;;  %v6725_v4 = vcombine.low %v8739_v0, %v8743_v48  ;;  %v3699_v2 = vshrl.u32 %v3658_v10, 16  ;;  %v4347_v62 = vld [vmem:[#allocation2 + $0x3c] sm:$0xf] }
 0x298   : > { %v6692_v3 = vcombine.low %v3012_v22, %v3021_v36  ;;  %v3029_v24 = vor.u32 %v3027_v15, %v3026_v26  ;;  %v3031_v52 = vrot.slane %v3026_v26, 4  ;;  %v3035_v32 = vrot.slane %v3033_v7, 7 }
 0x299   : > { %v3702_v21 = vshll.u32 %v3658_v10, 16  ;;  %v3708_v37 = vshll.u32 %v3659_v55, 16  ;;  %v3712_v60 = vshrl.u32 %v3659_v55, 16  ;;  %v3718_v38 = vshll.u32 %v3660_v25, 16  ;;  %v4348_v10 = vld [vmem:[#allocation2 + $0x40] sm:$0xf] }
 0x29a   : > { %v3030_v11 = vsel %vm8200_vm13, %v3022_v20, %v3029_v24  ;;  %v3038_v47 = vor.u32 %v3036_v50, %v3035_v32  ;;  %v3722_v46 = vshrl.u32 %v3660_v25, 16  ;;  %v3701_v34 = vrot.slane %v3699_v2, 4 }
 0x29b   : > { %7180 = vmatmul.mubr.msk.bf16.gmra.mxu1 %vm1518_vm11, %v6691_v9  ;;  %v3704_v56 = vrot.slane %v3702_v21, 5  ;;  %v3710_v13 = vrot.slane %v3708_v37, 5  ;;  %v3714_v40 = vrot.slane %v3712_v60, 4  ;;  %v3720_v45 = vrot.slane %v3718_v38, 5  ;;  %v3664_v60 = vld [vmem:[#allocation2 + $0x38] sm:$0xf] }
 0x29c   : > { %7183 = vmatprep.mubr.msk.bf16.mxu1 %vm1518_vm11, %v6692_v3  ;;  %v3039_v30 = vsel %vm8200_vm13, %v3031_v52, %v3038_v47  ;;  %v3724_v12 = vrot.slane %v3722_v46, 4  ;;  %v4385_v18 = vshrl.u32 %v4344_v35, 16  ;;  %v4390_v23 = vshrl.u32 %v4345_v17, 16  ;;  %v3663_v52 = vld [vmem:[#allocation2 + $0x34] sm:$0xf] }
 0x29d   : > { %v6693_v41 = vcombine.low %v3030_v11, %v3039_v30  ;;  %v3705_v1 = vor.u32 %v3704_v56, %v3701_v34  ;;  %v3715_v43 = vor.u32 %v3714_v40, %v3710_v13  ;;  %7214 = vmatmul.mubr.msk.bf16.gmra.mxu0 %vm1518_vm11, %v6723_v39  ;;  %v4393_v28 = vshll.u32 %v4345_v17, 16  ;;  %v3665_v46 = vld [vmem:[#allocation2 + $0x3c] sm:$0xf] }
 0x29e   : > { %v3725_v54 = vor.u32 %v3724_v12, %v3720_v45  ;;  %v6774_v59 = vrot.slane %v4385_v18, 11  ;;  %v4399_v33 = vshrl.u32 %v4346_v27, 16  ;;  %7217 = vmatprep.mubr.msk.bf16.mxu0 %vm1518_vm11, %v6724_v63  ;;  %v4392_v53 = vrot.slane %v4390_v23, 7  ;;  %v4350_v12 = vld [vmem:[#allocation2 + $0x4c] sm:$0xf] }
 0x29f   : > { %v3706_v5 = vrot.slane %v3705_v1, 4  ;;  %v3716_v19 = vrot.slane %v3715_v43, 4  ;;  %v4402_v29 = vshll.u32 %v4346_v27, 16  ;;  %v3728_v9 = vshll.u32 %v3661_v44, 16  ;;  %v4351_v23 = vld [vmem:[#allocation2 + $0x50] sm:$0xf] }
 0x2a0   : > { %v3726_v49 = vrot.slane %v3725_v54, 4  ;;  %v4401_v31 = vrot.slane %v4399_v33, 7  ;;  %v3732_v6 = vshrl.u32 %v3661_v44, 16  ;;  %v4395_v39 = vor.u32 %v4393_v28, %v4392_v53  ;;  %v3666_v33 = vld [vmem:[#allocation2 + $0x40] sm:$0xf] }
 0x2a1   : > { %v3711_v61 = vsel %vm8245_vm0, %v3706_v5, %v3710_v13  ;;  %v3721_v14 = vsel %vm8245_vm0, %v3716_v19, %v3720_v45  ;;  %v4397_v16 = vrot.slane %v4392_v53, 4  ;;  %v3730_v15 = vrot.slane %v3728_v9, 5 }
 0x2a2   : > { %v6742_v63 = vcombine.low %v3711_v61, %v3721_v14  ;;  %v4404_v20 = vor.u32 %v4402_v29, %v4401_v31  ;;  %v4406_v26 = vrot.slane %v4401_v31, 4  ;;  %v4396_v7 = vsel %vm8200_vm13, %v6774_v59, %v4395_v39 }
 0x2a3   : > { %7184 = vmatmul.mubr.msk.bf16.gmra.mxu1 %vm1518_vm11, %v6693_v41  ;;  %v3734_v55 = vrot.slane %v3732_v6, 4  ;;  %v3738_v22 = vshll.u32 %v3662_v57, 16  ;;  %v4408_v36 = vshrl.u32 %v4347_v62, 16  ;;  %v3731_v25 = vsel %vm8245_vm0, %v3726_v49, %v3730_v15 }
 0x2a4   : > { %7223 = vmatprep.mubr.msk.bf16.mxu1 %vm1518_vm11, %v6742_v63  ;;  %v4405_v50 = vsel %vm8200_vm13, %v4397_v16, %v4404_v20  ;;  %v4411_v3 = vshll.u32 %v4347_v62, 16  ;;  %v4417_v24 = vshrl.u32 %v4348_v10, 16  ;;  %v4420_v11 = vshll.u32 %v4348_v10, 16  ;;  %v3667_v20 = vld [vmem:[#allocation2 + $0x44] sm:$0x1] }
 0x2a5   : > { %v6782_v32 = vcombine.low %v4396_v7, %v4405_v50  ;;  %v3735_v2 = vor.u32 %v3734_v55, %v3730_v15  ;;  %v3740_v21 = vrot.slane %v3738_v22, 5  ;;  %v4410_v37 = vrot.slane %v4408_v36, 7  ;;  %7218 = vmatmul.mubr.msk.bf16.gmra.mxu0 %vm1518_vm11, %v6725_v4 }
 0x2a6   : > { %v4419_v35 = vrot.slane %v4417_v24, 7  ;;  %v5127_v47 = vsel %vm1567_vm10, %v8546_v42, 0  ;;  %v5812_v38 = vsel %vm1567_vm10, %v8569_v51, 0  ;;  %v3743_v13 = vshrl.u32 %v3663_v52, 16  ;;  %v4349_v51 = vld [vmem:[#allocation2 + $0x48] sm:$0x8]  ;;  %v8806_v6 = vpop.f32.mrf.mxu0 }
 0x2a7   : > { %7257 = vmatprep.mubr.msk.bf16.mxu0 %vm1518_vm11, %v6782_v32  ;;  %v3736_v17 = vrot.slane %v3735_v2, 4  ;;  %v4413_v34 = vor.u32 %v4411_v3, %v4410_v37  ;;  %v4415_v56 = vrot.slane %v4410_v37, 4  ;;  %v3746_v27 = vshll.u32 %v3663_v52, 16 }
 0x2a8   : > { %v4422_v40 = vor.u32 %v4420_v11, %v4419_v35  ;;  %v3752_v0 = vshll.u32 %v3664_v60, 16  ;;  %v3756_v48 = vshrl.u32 %v3664_v60, 16  ;;  %v3745_v30 = vrot.slane %v3743_v13, 4  ;;  %v8809_v16 = vpop.f32.mrf.mxu1  ;;  %v8811_v7 = vpop.f32.mrf.mxu0 }
 0x2a9   : > { %v3741_v4 = vsel %vm8245_vm0, %v3736_v17, %v3740_v21  ;;  %v4414_v42 = vsel %vm8200_vm13, %v4406_v26, %v4413_v34  ;;  %v3762_v45 = vshll.u32 %v3665_v46, 16  ;;  %v3748_v1 = vrot.slane %v3746_v27, 5  ;;  %10186 = vst [vmem:[#allocation9_spill] sm:$0xff] %v8809_v16  ;;  %v4353_v21 = vld [vmem:[#allocation2 + $0x58] sm:$0xf] }
 0x2aa   : > { %v6743_v18 = vcombine.low %v3731_v25, %v3741_v4  ;;  %v4423_v41 = vsel %vm8200_vm13, %v4415_v56, %v4422_v40  ;;  %v3754_v43 = vrot.slane %v3752_v0, 5  ;;  %v3758_v54 = vrot.slane %v3756_v48, 4  ;;  %v4352_v25 = vld [vmem:[#allocation2 + $0x54] sm:$0xf]  ;;  %v8815_v3 = vpop.f32.mrf.mxu1  ;;  %v8819_v37 = vpop.f32.mrf.mxu0  ;;  %v3669_v40 = vld [vmem:[#allocation2 + $0x50] sm:$0xf] }
 0x2ab   : > { %v6783_v44 = vcombine.low %v4414_v42, %v4423_v41  ;;  %v3764_v59 = vrot.slane %v3762_v45, 5  ;;  %v3766_v28 = vshrl.u32 %v3665_v46, 16  ;;  %v3749_v5 = vor.u32 %v3748_v1, %v3745_v30  ;;  %10187 = vst [vmem:[#allocation7_spill] sm:$0xff] %v8815_v3  ;;  %v8995_v3 = vld [vmem:[#allocation2 + $0xb8] sm:$0xf] }
 0x2ac   : > { %7224 = vmatmul.mubr.msk.bf16.vlgmr.msra.gmra.mxu1 %vm1518_vm11, %v6743_v18  ;;  %v4425_v19 = vshrl.u32 %v4349_v51, 16  ;;  %v4430_v53 = vshrl.u32 %v4350_v12, 16  ;;  %v4433_v29 = vshll.u32 %v4350_v12, 16  ;;  %v3759_v57 = vor.u32 %v3758_v54, %v3754_v43  ;;  %v8823_v46 = vpop.f32.mrf.mxu1  ;;  %v8829_v27 = vpop.f32.mrf.mxu0  ;;  %10208 = vst [vmem:[#allocation29_spill] sm:$0xff] %v8995_v3 }
 0x2ad   : > { %7290 = vmatpush3.bf16.msra.mxu1 %v5127_v47  ;;  %v4439_v49 = vshrl.u32 %v4351_v23, 16  ;;  %v4442_v31 = vshll.u32 %v4351_v23, 16  ;;  %v3768_v9 = vrot.slane %v3766_v28, 4  ;;  %7258 = vmatmul.mubr.msk.bf16.vlgmr.msra.gmra.mxu0 %vm1518_vm11, %v6783_v44  ;;  %v3750_v62 = vrot.slane %v3749_v5, 4  ;;  %10188 = vst [vmem:[#allocation11_spill] sm:$0xff] %v8823_v46 }
 0x2ae   : > { %v6775_v61 = vrot.slane %v4425_v19, 11  ;;  %v4432_v14 = vrot.slane %v4430_v53, 7  ;;  %v3772_v39 = vshll.u32 %v3666_v33, 16  ;;  %7324 = vmatpush3.bf16.msra.mxu0 %v5812_v38  ;;  %v3760_v10 = vrot.slane %v3759_v57, 4  ;;  %v3668_v38 = vld [vmem:[#allocation2 + $0x4c] sm:$0xf]  ;;  %v8832_v30 = vpop.f32.mrf.mxu1  ;;  %v8834_v41 = vpop.f32.mrf.mxu0 }
 0x2af   : > { %v4441_v63 = vrot.slane %v4439_v49, 7  ;;  %v3769_v26 = vor.u32 %v3768_v9, %v3764_v59  ;;  %v3776_v15 = vshrl.u32 %v3666_v33, 16  ;;  %v3755_v55 = vsel %vm8245_vm0, %v3750_v62, %v3754_v43  ;;  %10189 = vst [vmem:[#allocation8_spill] sm:$0xff] %v8832_v30  ;;  %v3670_v43 = vld [vmem:[#allocation2 + $0x54] sm:$0xf] }
 0x2b0   : > { %v4435_v22 = vor.u32 %v4433_v29, %v4432_v14  ;;  %v4437_v36 = vrot.slane %v4432_v14, 4  ;;  %v3774_v50 = vrot.slane %v3772_v39, 5  ;;  %v3765_v24 = vsel %vm8245_vm0, %v3760_v10, %v3764_v59  ;;  %v8837_v59 = vpop.f32.mrf.mxu1  ;;  %v4354_v53 = vld [vmem:[#allocation2 + $0x60] sm:$0x8]  ;;  %v4355_v29 = vld [vmem:[#allocation2 + $0x64] sm:$0xf]  ;;  %v8841_v57 = vpop.f32.mrf.mxu0 }
 0x2b1   : > { %v4444_v52 = vor.u32 %v4442_v31, %v4441_v63  ;;  %v3770_v32 = vrot.slane %v3769_v26, 4  ;;  %v3778_v2 = vrot.slane %v3776_v15, 4  ;;  %v6744_v60 = vcombine.low %v3755_v55, %v3765_v24  ;;  %10190 = vst [vmem:[#allocation13_spill] sm:$0xff] %v8837_v59  ;;  %v4371_v30 = vld [vmem:[#allocation2 + $0xb0] sm:$0xf] }
 0x2b2   : > { %v4436_v35 = vsel %vm8200_vm13, %v6775_v61, %v4435_v22  ;;  %v3782_v11 = vshll.u32 %v3667_v20, 16  ;;  %v4446_v47 = vrot.slane %v4441_v63, 4  ;;  %v4448_v13 = vshrl.u32 %v4352_v25, 16  ;;  %v8843_v61 = vpop.f32.mrf.mxu1  ;;  %v4356_v20 = vld [vmem:[#allocation2 + $0x68] sm:$0xf]  ;;  %v8847_v26 = vpop.f32.mrf.mxu0 }
 0x2b3   : > { %v4445_v17 = vsel %vm8200_vm13, %v4437_v36, %v4444_v52  ;;  %v3775_v34 = vsel %vm8245_vm0, %v3770_v32, %v3774_v50  ;;  %v3779_v56 = vor.u32 %v3778_v2, %v3774_v50  ;;  %7227 = vmatprep.mubr.msk.bf16.mxu1 %vm1518_vm11, %v6744_v60  ;;  %v4451_v4 = vshll.u32 %v4352_v25, 16  ;;  %10191 = vst [vmem:[#allocation10_spill] sm:$0xff] %v8843_v61  ;;  %v3671_v50 = vld [vmem:[#allocation2 + $0x58] sm:$0xf] }
 0x2b4   : > { %v6784_v0 = vcombine.low %v4436_v35, %v4445_v17  ;;  %v3784_v48 = vrot.slane %v3782_v11, 5  ;;  %v4457_v42 = vshrl.u32 %v4353_v21, 16  ;;  %v4450_v51 = vrot.slane %v4448_v13, 7  ;;  %v8852_v25 = vpop.f32.mrf.mxu1 }
 0x2b5   : > { %v3780_v45 = vrot.slane %v3779_v56, 4  ;;  %v4460_v12 = vshll.u32 %v4353_v21, 16  ;;  %v3787_v18 = vshrl.u32 %v3668_v38, 16  ;;  %v3790_v23 = vshll.u32 %v3668_v38, 16  ;;  %10192 = vst [vmem:[#allocation15_spill] sm:$0xff] %v8852_v25  ;;  %v8854_v21 = vpop.f32.mrf.mxu0 }
 0x2b6   : > { %7261 = vmatprep.mubr.msk.bf16.mxu0 %vm1518_vm11, %v6784_v0  ;;  %v4459_v1 = vrot.slane %v4457_v42, 7  ;;  %v3796_v44 = vshll.u32 %v3669_v40, 16  ;;  %v3800_v54 = vshrl.u32 %v3669_v40, 16  ;;  %v4453_v33 = vor.u32 %v4451_v4, %v4450_v51  ;;  %v8856_v38 = vpop.f32.mrf.mxu1  ;;  %v3672_v56 = vld [vmem:[#allocation2 + $0x5c] sm:$0x1] }
 0x2b7   : > { %v3785_v28 = vsel %vm8245_vm0, %v3780_v45, %v3784_v48  ;;  %v4455_v5 = vrot.slane %v4450_v51, 4  ;;  %v3789_v19 = vrot.slane %v3787_v18, 4  ;;  %v3792_v9 = vrot.slane %v3790_v23, 5  ;;  %10193 = vst [vmem:[#allocation12_spill] sm:$0xff] %v8856_v38  ;;  %v8859_v0 = vpop.f32.mrf.mxu0  ;;  %v4357_v51 = vld [vmem:[#allocation2 + $0x6c] sm:$0xf] }
 0x2b8   : > { %v6745_v49 = vcombine.low %v3775_v34, %v3785_v28  ;;  %v4462_v31 = vor.u32 %v4460_v12, %v4459_v1  ;;  %v3798_v62 = vrot.slane %v3796_v44, 5  ;;  %v4454_v14 = vsel %vm8200_vm13, %v4446_v47, %v4453_v33  ;;  %v8863_v12 = vpop.f32.mrf.mxu1  ;;  %v4358_v44 = vld [vmem:[#allocation2 + $0x70] sm:$0xf] }
 0x2b9   : > { %v3802_v39 = vrot.slane %v3800_v54, 4  ;;  %v3806_v10 = vshll.u32 %v3670_v43, 16  ;;  %v3810_v63 = vshrl.u32 %v3670_v43, 16  ;;  %v3793_v55 = vor.u32 %v3792_v9, %v3789_v19  ;;  %10194 = vst [vmem:[#allocation17_spill] sm:$0xff] %v8863_v12  ;;  %v8867_v54 = vpop.f32.mrf.mxu0 }
 0x2ba   : > { %7228 = vmatmul.mubr.msk.bf16.gmra.mxu1 %vm1518_vm11, %v6745_v49  ;;  %v4463_v15 = vsel %vm8200_vm13, %v4455_v5, %v4462_v31  ;;  %v4465_v22 = vshrl.u32 %v4354_v53, 16  ;;  %v4470_v36 = vshrl.u32 %v4355_v29, 16  ;;  %v4473_v2 = vshll.u32 %v4355_v29, 16  ;;  %v8871_v53 = vpop.f32.mrf.mxu1 }
 0x2bb   : > { %v6785_v24 = vcombine.low %v4454_v14, %v4463_v15  ;;  %v3803_v52 = vor.u32 %v3802_v39, %v3798_v62  ;;  %v3808_v32 = vrot.slane %v3806_v10, 5  ;;  %v3794_v60 = vrot.slane %v3793_v55, 4  ;;  %10195 = vst [vmem:[#allocation14_spill] sm:$0xff] %v8871_v53  ;;  %v8873_v14 = vpop.f32.mrf.mxu0  ;;  %v3674_v15 = vld [vmem:[#allocation2 + $0x68] sm:$0xf] }
 0x2bc   : > { %v6776_v35 = vrot.slane %v4465_v22, 11  ;;  %v4472_v11 = vrot.slane %v4470_v36, 7  ;;  %v4479_v47 = vshrl.u32 %v4356_v20, 16  ;;  %v4482_v34 = vshll.u32 %v4356_v20, 16  ;;  %v8878_v55 = vpop.f32.mrf.mxu1 }
 0x2bd   : > { %7262 = vmatmul.mubr.msk.bf16.gmra.mxu0 %vm1518_vm11, %v6785_v24  ;;  %v3804_v17 = vrot.slane %v3803_v52, 4  ;;  %v3812_v13 = vrot.slane %v3810_v63, 4  ;;  %v3816_v40 = vshll.u32 %v3671_v50, 16  ;;  %v3799_v48 = vsel %vm8245_vm0, %v3794_v60, %v3798_v62  ;;  %v3673_v62 = vld [vmem:[#allocation2 + $0x64] sm:$0xf]  ;;  %10196 = vst [vmem:[#allocation18_spill] sm:$0xff] %v8878_v55  ;;  %v8882_v52 = vpop.f32.mrf.mxu0 }
 0x2be   : > { %v4475_v4 = vor.u32 %v4473_v2, %v4472_v11  ;;  %v4477_v42 = vrot.slane %v4472_v11, 4  ;;  %v4481_v45 = vrot.slane %v4479_v47, 7  ;;  %v3820_v23 = vshrl.u32 %v3671_v50, 16  ;;  %10197 = vst [vmem:[#allocation16_spill] sm:$0xff] %v8882_v52  ;;  %v3675_v60 = vld [vmem:[#allocation2 + $0x6c] sm:$0xf]  ;;  %v8884_v47 = vpop.f32.mrf.mxu1 }
 0x2bf   : > { %v3809_v18 = vsel %vm8245_vm0, %v3804_v17, %v3808_v32  ;;  %v3813_v1 = vor.u32 %v3812_v13, %v3808_v32  ;;  %v3818_v43 = vrot.slane %v3816_v40, 5  ;;  %v3826_v19 = vshll.u32 %v3672_v56, 16  ;;  %10198 = vst [vmem:[#allocation21_spill] sm:$0xff] %v8884_v47  ;;  %v8887_v40 = vpop.f32.mrf.mxu0  ;;  %v9025_v52 = vld [vmem:[#allocation2 + $0xc8] sm:$0xf] }
 0x2c0   : > { %v6746_v28 = vcombine.low %v3799_v48, %v3809_v18  ;;  %v4476_v33 = vsel %vm8200_vm13, %v6776_v35, %v4475_v4  ;;  %v4484_v5 = vor.u32 %v4482_v34, %v4481_v45  ;;  %v3822_v49 = vrot.slane %v3820_v23, 4  ;;  %10199 = vst [vmem:[#allocation19_spill] sm:$0xff] %v8887_v40  ;;  %v8889_v18 = vpop.f32.mrf.mxu1  ;;  %10213 = vst [vmem:[#allocation34_spill] sm:$0xff] %v9025_v52 }
 0x2c1   : > { %v3814_v29 = vrot.slane %v3813_v1, 4  ;;  %v4486_v31 = vrot.slane %v4481_v45, 4  ;;  %v4488_v9 = vshrl.u32 %v4357_v51, 16  ;;  %v3828_v10 = vrot.slane %v3826_v19, 5  ;;  %10200 = vst [vmem:[#allocation22_spill] sm:$0xff] %v8889_v18 }
 0x2c2   : > { %7231 = vmatprep.mubr.msk.bf16.mxu1 %vm1518_vm11, %v6746_v28  ;;  %v4485_v39 = vsel %vm8200_vm13, %v4477_v42, %v4484_v5  ;;  %v4491_v63 = vshll.u32 %v4357_v51, 16  ;;  %v4497_v20 = vshrl.u32 %v4358_v44, 16  ;;  %v3823_v50 = vor.u32 %v3822_v49, %v3818_v43  ;;  %v4359_v51 = vld [vmem:[#allocation2 + $0x78] sm:$0x8]  ;;  %v4360_v28 = vld [vmem:[#allocation2 + $0x7c] sm:$0xf] }
 0x2c3   : > { %v6786_v22 = vcombine.low %v4476_v33, %v4485_v39  ;;  %v3819_v36 = vsel %vm8245_vm0, %v3814_v29, %v3818_v43  ;;  %v4490_v24 = vrot.slane %v4488_v9, 7  ;;  %v4500_v2 = vshll.u32 %v4358_v44, 16  ;;  %v4361_v49 = vld [vmem:[#allocation2 + $0x80] sm:$0xf]  ;;  %v8897_v9 = vpop.f32.mrf.mxu1 }
 0x2c4   : > { %v4499_v32 = vrot.slane %v4497_v20, 7  ;;  %v3831_v35 = vshrl.u32 %v3673_v62, 16  ;;  %v3834_v11 = vshll.u32 %v3673_v62, 16  ;;  %v3824_v17 = vrot.slane %v3823_v50, 4  ;;  %10201 = vst [vmem:[#allocation20_spill] sm:$0xff] %v8897_v9 }
 0x2c5   : > { %7265 = vmatprep.mubr.msk.bf16.mxu0 %vm1518_vm11, %v6786_v22  ;;  %v4493_v34 = vor.u32 %v4491_v63, %v4490_v24  ;;  %v4495_v56 = vrot.slane %v4490_v24, 4  ;;  %v3840_v13 = vshll.u32 %v3674_v15, 16  ;;  %v3844_v45 = vshrl.u32 %v3674_v15, 16  ;;  %v8899_v15 = vpop.f32.mrf.mxu0  ;;  %v3677_v24 = vld [vmem:[#allocation2 + $0x74] sm:$0x1] }
 0x2c6   : > { %v4502_v48 = vor.u32 %v4500_v2, %v4499_v32  ;;  %v3833_v4 = vrot.slane %v3831_v35, 4  ;;  %v3836_v42 = vrot.slane %v3834_v11, 5  ;;  %v3829_v1 = vsel %vm8245_vm0, %v3824_v17, %v3828_v10  ;;  %v3676_v10 = vld [vmem:[#allocation2 + $0x70] sm:$0xf]  ;;  %10202 = vst [vmem:[#allocation25_spill] sm:$0xff] %v8899_v15  ;;  %v8902_v32 = vpop.f32.mrf.mxu1 }
 0x2c7   : > { %v4494_v43 = vsel %vm8200_vm13, %v4486_v31, %v4493_v34  ;;  %v3842_v23 = vrot.slane %v3840_v13, 5  ;;  %v3850_v44 = vshll.u32 %v3675_v60, 16  ;;  %v6747_v33 = vcombine.low %v3819_v36, %v3829_v1  ;;  %10203 = vst [vmem:[#allocation23_spill] sm:$0xff] %v8902_v32  ;;  %v4362_v1 = vld [vmem:[#allocation2 + $0x84] sm:$0xf] }
 0x2c8   : > { %v4503_v5 = vsel %vm8200_vm13, %v4495_v56, %v4502_v48  ;;  %v3837_v19 = vor.u32 %v3836_v42, %v3833_v4  ;;  %v3846_v29 = vrot.slane %v3844_v45, 4  ;;  %v3854_v63 = vshrl.u32 %v3675_v60, 16  ;;  %v8907_v48 = vpop.f32.mrf.mxu1  ;;  %v4366_v32 = vld [vmem:[#allocation2 + $0x98] sm:$0xf] }
 0x2c9   : > { %v6787_v62 = vcombine.low %v4494_v43, %v4503_v5  ;;  %v3852_v39 = vrot.slane %v3850_v44, 5  ;;  %v4505_v20 = vshrl.u32 %v4359_v51, 16  ;;  %7232 = vmatmul.mubr.msk.bf16.gmra.mxu1 %vm1518_vm11, %v6747_v33  ;;  %v4510_v36 = vshrl.u32 %v4360_v28, 16  ;;  %10204 = vst [vmem:[#allocation26_spill] sm:$0xff] %v8907_v48  ;;  %v8909_v43 = vpop.f32.mrf.mxu0 }
 0x2ca   : > { %v3838_v31 = vrot.slane %v3837_v19, 4  ;;  %v3847_v22 = vor.u32 %v3846_v29, %v3842_v23  ;;  %v4513_v50 = vshll.u32 %v4360_v28, 16  ;;  %v4519_v35 = vshrl.u32 %v4361_v49, 16  ;;  %10205 = vst [vmem:[#allocation24_spill] sm:$0xff] %v8909_v43  ;;  %v8913_v19 = vpop.f32.mrf.mxu1 }
 0x2cb   : > { %7266 = vmatmul.mubr.msk.bf16.gmra.mxu0 %vm1518_vm11, %v6787_v62  ;;  %v6777_v2 = vrot.slane %v4505_v20, 11  ;;  %v4522_v11 = vshll.u32 %v4361_v49, 16  ;;  %v3856_v17 = vrot.slane %v3854_v63, 4  ;;  %v4512_v56 = vrot.slane %v4510_v36, 7  ;;  %v4363_v63 = vld [vmem:[#allocation2 + $0x88] sm:$0xf] }
 0x2cc   : > { %v3843_v60 = vsel %vm8245_vm0, %v3838_v31, %v3842_v23  ;;  %v3848_v34 = vrot.slane %v3847_v22, 4  ;;  %v3860_v13 = vshll.u32 %v3676_v10, 16  ;;  %v4521_v4 = vrot.slane %v4519_v35, 7  ;;  %v3678_v20 = vld [vmem:[#allocation2 + $0x7c] sm:$0xf]  ;;  %v8917_v35 = vpop.f32.mrf.mxu1 }
 0x2cd   : > { %v3857_v42 = vor.u32 %v3856_v17, %v3852_v39  ;;  %v3864_v45 = vshrl.u32 %v3676_v10, 16  ;;  %v3870_v51 = vshll.u32 %v3677_v24, 16  ;;  %v4515_v28 = vor.u32 %v4513_v50, %v4512_v56  ;;  %v3679_v24 = vld [vmem:[#allocation2 + $0x80] sm:$0xf] }
 0x2ce   : > { %v3853_v44 = vsel %vm8245_vm0, %v3848_v34, %v3852_v39  ;;  %v4517_v33 = vrot.slane %v4512_v56, 4  ;;  %v3862_v5 = vrot.slane %v3860_v13, 5  ;;  %v4524_v29 = vor.u32 %v4522_v11, %v4521_v4 }
 0x2cf   : > { %v6748_v23 = vcombine.low %v3843_v60, %v3853_v44  ;;  %v3858_v49 = vrot.slane %v3857_v42, 4  ;;  %v3866_v62 = vrot.slane %v3864_v45, 4  ;;  %v4516_v10 = vsel %vm8200_vm13, %v6777_v2, %v4515_v28  ;;  %v8924_v60 = vpop.f32.mrf.mxu0  ;;  %v3680_v45 = vld [vmem:[#allocation2 + $0x84] sm:$0xf] }
 0x2d0   : > { %v3872_v31 = vrot.slane %v3870_v51, 5  ;;  %v4526_v22 = vrot.slane %v4521_v4, 4  ;;  %v4528_v36 = vshrl.u32 %v4362_v1, 16  ;;  %v4525_v39 = vsel %vm8200_vm13, %v4517_v33, %v4524_v29  ;;  %10206 = vst [vmem:[#allocation27_spill] sm:$0xff] %v8924_v60  ;;  %v8926_v4 = vpop.f32.mrf.mxu1 }
 0x2d1   : > { %7235 = vmatprep.mubr.msk.bf16.mxu1 %vm1518_vm11, %v6748_v23  ;;  %v3863_v50 = vsel %vm8245_vm0, %v3858_v49, %v3862_v5  ;;  %v3867_v11 = vor.u32 %v3866_v62, %v3862_v5  ;;  %v4531_v17 = vshll.u32 %v4362_v1, 16  ;;  %v6788_v34 = vcombine.low %v4516_v10, %v4525_v39  ;;  %v4364_v1 = vld [vmem:[#allocation2 + $0x90] sm:$0x8]  ;;  %v8931_v39 = vpop.f32.mrf.mxu0 }
 0x2d2   : > { %v4530_v2 = vrot.slane %v4528_v36, 7  ;;  %v4537_v56 = vshrl.u32 %v4363_v63, 16  ;;  %v4540_v13 = vshll.u32 %v4363_v63, 16  ;;  %v3875_v51 = vshrl.u32 %v3678_v20, 16  ;;  %v4365_v36 = vld [vmem:[#allocation2 + $0x94] sm:$0xf] }
 0x2d3   : > { %v3868_v42 = vrot.slane %v3867_v11, 4  ;;  %v3878_v44 = vshll.u32 %v3678_v20, 16  ;;  %v3884_v28 = vshll.u32 %v3679_v24, 16  ;;  %7269 = vmatprep.mubr.msk.bf16.mxu0 %vm1518_vm11, %v6788_v34  ;;  %v3888_v5 = vshrl.u32 %v3679_v24, 16  ;;  %v8933_v11 = vpop.f32.mrf.mxu1 }
 0x2d4   : > { %v4533_v33 = vor.u32 %v4531_v17, %v4530_v2  ;;  %v4535_v23 = vrot.slane %v4530_v2, 4  ;;  %v4539_v29 = vrot.slane %v4537_v56, 7  ;;  %v3877_v62 = vrot.slane %v3875_v51, 4 }
 0x2d5   : > { %v3873_v49 = vsel %vm8245_vm0, %v3868_v42, %v3872_v31  ;;  %v3880_v10 = vrot.slane %v3878_v44, 5  ;;  %v3886_v63 = vrot.slane %v3884_v28, 5  ;;  %v3890_v2 = vrot.slane %v3888_v5, 4  ;;  %v8937_v31 = vpop.f32.mrf.mxu0  ;;  %v3681_v28 = vld [vmem:[#allocation2 + $0x88] sm:$0xf] }
 0x2d6   : > { %v6749_v20 = vcombine.low %v3863_v50, %v3873_v49  ;;  %v4534_v34 = vsel %vm8200_vm13, %v4526_v22, %v4533_v33  ;;  %v4542_v17 = vor.u32 %v4540_v13, %v4539_v29  ;;  %v3894_v24 = vshll.u32 %v3680_v45, 16 }
 0x2d7   : > { %v3881_v56 = vor.u32 %v3880_v10, %v3877_v62  ;;  %v3898_v48 = vshrl.u32 %v3680_v45, 16  ;;  %v4545_v9 = vshrl.u32 %v4364_v1, 16  ;;  %v3891_v51 = vor.u32 %v3890_v2, %v3886_v63  ;;  %v8942_v29 = vpop.f32.mrf.mxu0  ;;  %v8944_v45 = vpop.f32.mrf.mxu1 }
 0x2d8   : > { %7236 = vmatmul.mubr.msk.bf16.gmra.mxu1 %vm1518_vm11, %v6749_v20  ;;  %v4543_v42 = vsel %vm8200_vm13, %v4535_v23, %v4542_v17  ;;  %v4550_v44 = vshrl.u32 %v4365_v36, 16  ;;  %v4553_v50 = vshll.u32 %v4365_v36, 16  ;;  %v3896_v13 = vrot.slane %v3894_v24, 5  ;;  %v3682_v20 = vld [vmem:[#allocation2 + $0x8c] sm:$0x1] }
 0x2d9   : > { %v6789_v49 = vcombine.low %v4534_v34, %v4543_v42  ;;  %v3882_v22 = vrot.slane %v3881_v56, 4  ;;  %v6778_v33 = vrot.slane %v4545_v9, 11  ;;  %v3892_v5 = vrot.slane %v3891_v51, 4  ;;  %v8949_v2 = vpop.f32.mrf.mxu1  ;;  %v4367_v51 = vld [vmem:[#allocation2 + $0x9c] sm:$0xf] }
 0x2da   : > { %v4552_v1 = vrot.slane %v4550_v44, 7  ;;  %v4559_v62 = vshrl.u32 %v4366_v32, 16  ;;  %v4562_v10 = vshll.u32 %v4366_v32, 16  ;;  %v3900_v36 = vrot.slane %v3898_v48, 4  ;;  %v8953_v44 = vpop.f32.mrf.mxu0 }
 0x2db   : > { %7270 = vmatmul.mubr.msk.bf16.gmra.mxu0 %vm1518_vm11, %v6789_v49  ;;  %v3887_v23 = vsel %vm8245_vm0, %v3882_v22, %v3886_v63  ;;  %v3904_v17 = vshll.u32 %v3681_v28, 16  ;;  %v3908_v34 = vshrl.u32 %v3681_v28, 16  ;;  %v3897_v9 = vsel %vm8245_vm0, %v3892_v5, %v3896_v13  ;;  %v4368_v63 = vld [vmem:[#allocation2 + $0xa0] sm:$0xf]  ;;  %v8955_v22 = vpop.f32.mrf.mxu1  ;;  %v3683_v5 = vld [vmem:[#allocation2 + $0x94] sm:$0xf] }
 0x2dc   : > { %v4555_v56 = vor.u32 %v4553_v50, %v4552_v1  ;;  %v4557_v24 = vrot.slane %v4552_v1, 4  ;;  %v4561_v42 = vrot.slane %v4559_v62, 7  ;;  %v6750_v32 = vcombine.low %v3887_v23, %v3897_v9  ;;  %v3684_v23 = vld [vmem:[#allocation2 + $0x98] sm:$0xf]  ;;  %v8962_v9 = vpop.f32.mrf.mxu0 }
 0x2dd   : > { %v3901_v49 = vor.u32 %v3900_v36, %v3896_v13  ;;  %v3906_v18 = vrot.slane %v3904_v17, 5  ;;  %v3910_v47 = vrot.slane %v3908_v34, 4  ;;  %v3914_v55 = vshll.u32 %v3682_v20, 16 }
 0x2de   : > { %v4556_v48 = vsel %vm8200_vm13, %v6778_v33, %v4555_v56  ;;  %v4564_v28 = vor.u32 %v4562_v10, %v4561_v42  ;;  %v4566_v53 = vrot.slane %v4561_v42, 4  ;;  %7239 = vmatprep.mubr.msk.bf16.mxu1 %vm1518_vm11, %v6750_v32  ;;  %v4568_v62 = vshrl.u32 %v4367_v51, 16  ;;  %v8966_v42 = vpop.f32.mrf.mxu1  ;;  %v3685_v32 = vld [vmem:[#allocation2 + $0x9c] sm:$0xf]  ;;  %v8968_v25 = vpop.f32.mrf.mxu0 }
 0x2df   : > { %v3902_v50 = vrot.slane %v3901_v49, 4  ;;  %v3911_v1 = vor.u32 %v3910_v47, %v3906_v18  ;;  %v4571_v12 = vshll.u32 %v4367_v51, 16  ;;  %v3916_v36 = vrot.slane %v3914_v55, 5 }
 0x2e0   : > { %v4565_v13 = vsel %vm8200_vm13, %v4557_v24, %v4564_v28  ;;  %v4577_v17 = vshrl.u32 %v4368_v63, 16  ;;  %v4580_v34 = vshll.u32 %v4368_v63, 16  ;;  %v4570_v56 = vrot.slane %v4568_v62, 7 }
 0x2e1   : > { %v6790_v33 = vcombine.low %v4556_v48, %v4565_v13  ;;  %v3907_v10 = vsel %vm8245_vm0, %v3902_v50, %v3906_v18  ;;  %v3912_v20 = vrot.slane %v3911_v1, 4  ;;  %v3919_v51 = vshrl.u32 %v3683_v5, 16  ;;  %v4369_v18 = vld [vmem:[#allocation2 + $0xa8] sm:$0x8]  ;;  %v4370_v13 = vld [vmem:[#allocation2 + $0xac] sm:$0xf]  ;;  %v8977_v46 = vpop.f32.mrf.mxu1 }
 0x2e2   : > { %v4579_v47 = vrot.slane %v4577_v17, 7  ;;  %v3922_v49 = vshll.u32 %v3683_v5, 16  ;;  %v3928_v38 = vshll.u32 %v3684_v23, 16  ;;  %v4573_v24 = vor.u32 %v4571_v12, %v4570_v56  ;;  %v8973_v17 = vpop.f32.mrf.mxu0 }
 0x2e3   : > { %7273 = vmatprep.mubr.msk.bf16.mxu0 %vm1518_vm11, %v6790_v33  ;;  %v3917_v55 = vsel %vm8245_vm0, %v3912_v20, %v3916_v36  ;;  %v4575_v63 = vrot.slane %v4570_v56, 4  ;;  %v3932_v48 = vshrl.u32 %v3684_v23, 16  ;;  %v3921_v1 = vrot.slane %v3919_v51, 4  ;;  %v3686_v51 = vld [vmem:[#allocation2 + $0xa0] sm:$0xf] }
 0x2e4   : > { %v6751_v28 = vcombine.low %v3907_v10, %v3917_v55  ;;  %v4582_v50 = vor.u32 %v4580_v34, %v4579_v47  ;;  %v3924_v62 = vrot.slane %v3922_v49, 5  ;;  %v4574_v5 = vsel %vm8200_vm13, %v4566_v53, %v4573_v24  ;;  %v8982_v53 = vpop.f32.mrf.mxu1 }
 0x2e5   : > { %v3930_v61 = vrot.slane %v3928_v38, 5  ;;  %v3934_v59 = vrot.slane %v3932_v48, 4  ;;  %v3938_v33 = vshll.u32 %v3685_v32, 16  ;;  %v3942_v36 = vshrl.u32 %v3685_v32, 16  ;;  %v8984_v48 = vpop.f32.mrf.mxu0 }
 0x2e6   : > { %7240 = vmatmul.mubr.msk.bf16.gmra.mxu1 %vm1518_vm11, %v6751_v28  ;;  %v4583_v12 = vsel %vm8200_vm13, %v4575_v63, %v4582_v50  ;;  %v3925_v23 = vor.u32 %v3924_v62, %v3921_v1  ;;  %v4585_v34 = vshrl.u32 %v4369_v18, 16  ;;  %v4590_v47 = vshrl.u32 %v4370_v13, 16  ;;  %v8987_v18 = vpop.f32.mrf.mxu1  ;;  %v3687_v62 = vld [vmem:[#allocation2 + $0xa4] sm:$0x1] }
 0x2e7   : > { %v6791_v10 = vcombine.low %v4574_v5, %v4583_v12  ;;  %v3935_v20 = vor.u32 %v3934_v59, %v3930_v61  ;;  %v3940_v56 = vrot.slane %v3938_v33, 5  ;;  %v4593_v55 = vshll.u32 %v4370_v13, 16  ;;  %v8997_v16 = vpop.f32.mrf.mxu0 }
 0x2e8   : > { %v3926_v38 = vrot.slane %v3925_v23, 4  ;;  %v6779_v49 = vrot.slane %v4585_v34, 11  ;;  %v4599_v24 = vshrl.u32 %v4371_v30, 16  ;;  %v4592_v63 = vrot.slane %v4590_v47, 7 }
 0x2e9   : > { %7274 = vmatmul.mubr.msk.bf16.gmra.mxu0 %vm1518_vm11, %v6791_v10  ;;  %v3936_v28 = vrot.slane %v3935_v20, 4  ;;  %v4602_v50 = vshll.u32 %v4371_v30, 16  ;;  %v3944_v32 = vrot.slane %v3942_v36, 4  ;;  %v3948_v5 = vshll.u32 %v3686_v51, 16  ;;  %v8993_v10 = vld [vmem:[#allocation2 + $0xb4] sm:$0xf] }
 0x2ea   : > { %v3931_v59 = vsel %vm8245_vm0, %v3926_v38, %v3930_v61  ;;  %v4601_v1 = vrot.slane %v4599_v24, 7  ;;  %v3952_v33 = vshrl.u32 %v3686_v51, 16  ;;  %v4595_v12 = vor.u32 %v4593_v55, %v4592_v63  ;;  %10207 = vst [vmem:[#allocation28_spill] sm:$0xff] %v8993_v10  ;;  %v8999_v61 = vpop.f32.mrf.mxu1 }
 0x2eb   : > { %v3941_v13 = vsel %vm8245_vm0, %v3936_v28, %v3940_v56  ;;  %v4597_v23 = vrot.slane %v4592_v63, 4  ;;  %v3945_v34 = vor.u32 %v3944_v32, %v3940_v56  ;;  %v3950_v36 = vrot.slane %v3948_v5, 5  ;;  %10209 = vst [vmem:[#allocation30_spill] sm:$0xff] %v8999_v61  ;;  %v3688_v28 = vld [vmem:[#allocation2 + $0xac] sm:$0xf]  ;;  %v9008_v5 = vpop.f32.mrf.mxu0 }
 0x2ec   : > { %v6752_v20 = vcombine.low %v3931_v59, %v3941_v13  ;;  %v4604_v30 = vor.u32 %v4602_v50, %v4601_v1  ;;  %v3954_v47 = vrot.slane %v3952_v33, 4  ;;  %v4596_v51 = vsel %vm8200_vm13, %v6779_v49, %v4595_v12  ;;  %v3689_v59 = vld [vmem:[#allocation2 + $0xb0] sm:$0xf] }
 0x2ed   : > { %v3946_v38 = vrot.slane %v3945_v34, 4  ;;  %v3958_v24 = vshll.u32 %v3687_v62, 16  ;;  %v4606_v55 = vrot.slane %v4601_v1, 4  ;;  %v4608_v50 = vshrl.u32 %v8993_v10, 16 }
 0x2ee   : > { %7243 = vmatprep.mubr.msk.bf16.mxu1 %vm1518_vm11, %v6752_v20  ;;  %v4605_v56 = vsel %vm8200_vm13, %v4597_v23, %v4604_v30  ;;  %v3955_v63 = vor.u32 %v3954_v47, %v3950_v36  ;;  %v4611_v32 = vshll.u32 %v8993_v10, 16  ;;  %v4617_v1 = vshrl.u32 %v8995_v3, 16  ;;  %v9014_v20 = vpop.f32.mrf.mxu0  ;;  %v9016_v30 = vpop.f32.mrf.mxu1  ;;  %v3690_v10 = vld [vmem:[#allocation2 + $0xb4] sm:$0xf] }
 0x2ef   : > { %v6792_v33 = vcombine.low %v4596_v51, %v4605_v56  ;;  %v3951_v49 = vsel %vm8245_vm0, %v3946_v38, %v3950_v36  ;;  %v3960_v62 = vrot.slane %v3958_v24, 5  ;;  %v4610_v12 = vrot.slane %v4608_v50, 7  ;;  %10210 = vst [vmem:[#allocation31_spill] sm:$0xff] %v9014_v20  ;;  %10211 = vst [vmem:[#allocation32_spill] sm:$0xff] %v9016_v30  ;;  %v4374_v50 = vld [vmem:[#allocation2 + $0xc0] sm:$0x8] }
 0x2f0   : > { %v3956_v13 = vrot.slane %v3955_v63, 4  ;;  %v4620_v34 = vshll.u32 %v8995_v3, 16  ;;  %v3963_v23 = vshrl.u32 %v3688_v28, 16  ;;  %v4619_v47 = vrot.slane %v4617_v1, 7  ;;  %v4375_v3 = vld [vmem:[#allocation2 + $0xc4] sm:$0xf]  ;;  %v9021_v43 = vpop.f32.mrf.mxu1 }
 0x2f1   : > { %7277 = vmatprep.mubr.msk.bf16.mxu0 %vm1518_vm11, %v6792_v33  ;;  %v3966_v51 = vshll.u32 %v3688_v28, 16  ;;  %v3972_v56 = vshll.u32 %v3689_v59, 16  ;;  %v3976_v60 = vshrl.u32 %v3689_v59, 16  ;;  %v4613_v38 = vor.u32 %v4611_v32, %v4610_v12  ;;  %10212 = vst [vmem:[#allocation33_spill] sm:$0xff] %v9021_v43 }
 0x2f2   : > { %v3961_v36 = vsel %vm8245_vm0, %v3956_v13, %v3960_v62  ;;  %v4615_v24 = vrot.slane %v4610_v12, 4  ;;  %v3965_v63 = vrot.slane %v3963_v23, 4  ;;  %v4622_v40 = vor.u32 %v4620_v34, %v4619_v47  ;;  %v9027_v62 = vpop.f32.mrf.mxu0  ;;  %v9029_v32 = vpop.f32.mrf.mxu1  ;;  %v3691_v23 = vld [vmem:[#allocation2 + $0xb8] sm:$0xf] }
 0x2f3   : > { %v6753_v15 = vcombine.low %v3951_v49, %v3961_v36  ;;  %v3968_v30 = vrot.slane %v3966_v51, 5  ;;  %v3974_v61 = vrot.slane %v3972_v56, 5  ;;  %v4614_v33 = vsel %vm8200_vm13, %v4606_v55, %v4613_v38  ;;  %10214 = vst [vmem:[#allocation35_spill] sm:$0xff] %v9027_v62  ;;  %10215 = vst [vmem:[#allocation36_spill] sm:$0xff] %v9029_v32 }
 0x2f4   : > { %v3978_v28 = vrot.slane %v3976_v60, 4  ;;  %v3982_v1 = vshll.u32 %v3690_v10, 16  ;;  %v3986_v59 = vshrl.u32 %v3690_v10, 16  ;;  %v4623_v49 = vsel %vm8200_vm13, %v4615_v24, %v4622_v40  ;;  %v9035_v43 = vpop.f32.mrf.mxu1 }
 0x2f5   : > { %7244 = vmatmul.mubr.msk.bf16.gmra.mxu1 %vm1518_vm11, %v6753_v15  ;;  %v3969_v13 = vor.u32 %v3968_v30, %v3965_v63  ;;  %v4625_v12 = vshrl.u32 %v4374_v50, 16  ;;  %v4630_v34 = vshrl.u32 %v4375_v3, 16  ;;  %v6793_v47 = vcombine.low %v4614_v33, %v4623_v49  ;;  %10216 = vst [vmem:[#allocation37_spill] sm:$0xff] %v9035_v43  ;;  %v3692_v30 = vld [vmem:[#allocation2 + $0xbc] sm:$0x1]  ;;  %v9039_v50 = vpop.f32.mrf.mxu0 }
 0x2f6   : > { %v3979_v55 = vor.u32 %v3978_v28, %v3974_v61  ;;  %v3984_v60 = vrot.slane %v3982_v1, 5  ;;  %v4633_v51 = vshll.u32 %v4375_v3, 16  ;;  %v4639_v38 = vshrl.u32 %v9025_v52, 16  ;;  %10217 = vst [vmem:[#allocation38_spill] sm:$0xff] %v9039_v50  ;;  %v9043_v49 = vld [vmem:[#allocation2 + $0xcc] sm:$0xf] }
 0x2f7   : > { %v3970_v10 = vrot.slane %v3969_v13, 4  ;;  %v6780_v56 = vrot.slane %v4625_v12, 11  ;;  %v4632_v36 = vrot.slane %v4630_v34, 7  ;;  %7278 = vmatmul.mubr.msk.bf16.gmra.mxu0 %vm1518_vm11, %v6793_v47  ;;  %v4642_v40 = vshll.u32 %v9025_v52, 16  ;;  %10218 = vst [vmem:[#allocation39_spill] sm:$0xff] %v9043_v49 }
 0x2f8   : > { %v3980_v15 = vrot.slane %v3979_v55, 4  ;;  %v3988_v24 = vrot.slane %v3986_v59, 4  ;;  %v3992_v63 = vshll.u32 %v3691_v23, 16  ;;  %v4641_v1 = vrot.slane %v4639_v38, 7  ;;  %v9047_v55 = vld [vmem:[#allocation2 + $0xd0] sm:$0xf]  ;;  %v9049_v59 = vpop.f32.mrf.mxu0 }
 0x2f9   : > { %v3975_v3 = vsel %vm8245_vm0, %v3970_v10, %v3974_v61  ;;  %v4635_v33 = vor.u32 %v4633_v51, %v4632_v36  ;;  %v4637_v28 = vrot.slane %v4632_v36, 4  ;;  %v3996_v47 = vshrl.u32 %v3691_v23, 16  ;;  %10219 = vst [vmem:[#allocation40_spill] sm:$0xff] %v9047_v55  ;;  %10220 = vst [vmem:[#allocation41_spill] sm:$0xff] %v9049_v59  ;;  %v9053_v10 = vpop.f32.mrf.mxu1  ;;  %v9107_v50 = vld [vmem:[#allocation2 + $0xe8] sm:$0xf] }
 0x2fa   : > { %v3985_v13 = vsel %vm8245_vm0, %v3980_v15, %v3984_v60  ;;  %v3989_v12 = vor.u32 %v3988_v24, %v3984_v60  ;;  %v3994_v34 = vrot.slane %v3992_v63, 5  ;;  %v4644_v61 = vor.u32 %v4642_v40, %v4641_v1  ;;  %10221 = vst [vmem:[#allocation42_spill] sm:$0xff] %v9053_v10  ;;  %v3693_v60 = vld [vmem:[#allocation2 + $0xc4] sm:$0xf]  ;;  %v9056_v24 = vpop.f32.mrf.mxu0  ;;  %10235 = vst [vmem:[#allocation56_spill] sm:$0xff] %v9107_v50 }
 0x2fb   : > { %v6754_v52 = vcombine.low %v3975_v3, %v3985_v13  ;;  %v4636_v43 = vsel %vm8200_vm13, %v6780_v56, %v4635_v33  ;;  %v4002_v51 = vshll.u32 %v3692_v30, 16  ;;  %v3998_v38 = vrot.slane %v3996_v47, 4  ;;  %10222 = vst [vmem:[#allocation43_spill] sm:$0xff] %v9056_v24  ;;  %v3694_v30 = vld [vmem:[#allocation2 + $0xc8] sm:$0xf]  ;;  %v9063_v3 = vpop.f32.mrf.mxu1 }
 0x2fc   : > { %v3990_v36 = vrot.slane %v3989_v12, 4  ;;  %v4646_v32 = vrot.slane %v4641_v1, 4  ;;  %v4648_v15 = vshrl.u32 %v9043_v49, 16  ;;  %v4645_v23 = vsel %vm8200_vm13, %v4637_v28, %v4644_v61  ;;  %10223 = vst [vmem:[#allocation44_spill] sm:$0xff] %v9063_v3  ;;  %v9067_v47 = vpop.f32.mrf.mxu0  ;;  %v3695_v28 = vld [vmem:[#allocation2 + $0xcc] sm:$0xf] }
 0x2fd   : > { %7247 = vmatprep.mubr.msk.bf16.mxu1 %vm1518_vm11, %v6754_v52  ;;  %v4004_v63 = vrot.slane %v4002_v51, 5  ;;  %v4651_v56 = vshll.u32 %v9043_v49, 16  ;;  %v4657_v40 = vshrl.u32 %v9047_v55, 16  ;;  %v6794_v33 = vcombine.low %v4636_v43, %v4645_v23  ;;  %10224 = vst [vmem:[#allocation45_spill] sm:$0xff] %v9067_v47  ;;  %v9070_v49 = vpop.f32.mrf.mxu1 }
 0x2fe   : > { %v3995_v1 = vsel %vm8245_vm0, %v3990_v36, %v3994_v34  ;;  %v3999_v13 = vor.u32 %v3998_v38, %v3994_v34  ;;  %v4650_v12 = vrot.slane %v4648_v15, 7  ;;  %v4660_v10 = vshll.u32 %v9047_v55, 16  ;;  %10225 = vst [vmem:[#allocation46_spill] sm:$0xff] %v9070_v49  ;;  %v4379_v15 = vld [vmem:[#allocation2 + $0xd8] sm:$0x8] }
 0x2ff   : > { %v4659_v52 = vrot.slane %v4657_v40, 7  ;;  %v4007_v61 = vshrl.u32 %v3693_v60, 16  ;;  %v4010_v51 = vshll.u32 %v3693_v60, 16  ;;  %7281 = vmatprep.mubr.msk.bf16.mxu0 %vm1518_vm11, %v6794_v33  ;;  %v4016_v23 = vshll.u32 %v3694_v30, 16  ;;  %v9077_v49 = vld [vmem:[#allocation2 + $0xdc] sm:$0xf]  ;;  %v9079_v33 = vpop.f32.mrf.mxu0 }
 0x300   : > { %v4000_v24 = vrot.slane %v3999_v13, 4  ;;  %v4653_v3 = vor.u32 %v4651_v56, %v4650_v12  ;;  %v4655_v43 = vrot.slane %v4650_v12, 4  ;;  %v4020_v38 = vshrl.u32 %v3694_v30, 16  ;;  %10226 = vst [vmem:[#allocation47_spill] sm:$0xff] %v9077_v49  ;;  %10227 = vst [vmem:[#allocation48_spill] sm:$0xff] %v9079_v33 }
 0x301   : > { %v4662_v59 = vor.u32 %v4660_v10, %v4659_v52  ;;  %v4009_v36 = vrot.slane %v4007_v61, 4  ;;  %v4012_v34 = vrot.slane %v4010_v51, 5  ;;  %v4018_v60 = vrot.slane %v4016_v23, 5  ;;  %v9083_v30 = vld [vmem:[#allocation2 + $0xe0] sm:$0xf]  ;;  %v9085_v52 = vpop.f32.mrf.mxu1  ;;  %v9087_v51 = vpop.f32.mrf.mxu0 }
 0x302   : > { %v4005_v40 = vsel %vm8245_vm0, %v4000_v24, %v4004_v63  ;;  %v4654_v55 = vsel %vm8200_vm13, %v4646_v32, %v4653_v3  ;;  %v4026_v47 = vshll.u32 %v3695_v28, 16  ;;  %v4022_v12 = vrot.slane %v4020_v38, 4  ;;  %10228 = vst [vmem:[#allocation49_spill] sm:$0xff] %v9083_v30  ;;  %10229 = vst [vmem:[#allocation50_spill] sm:$0xff] %v9085_v52  ;;  %v3696_v3 = vld [vmem:[#allocation2 + $0xd0] sm:$0xf] }
 0x303   : > { %v6755_v56 = vcombine.low %v3995_v1, %v4005_v40  ;;  %v4663_v10 = vsel %vm8200_vm13, %v4655_v43, %v4662_v59  ;;  %v4013_v13 = vor.u32 %v4012_v34, %v4009_v36  ;;  %v4030_v61 = vshrl.u32 %v3695_v28, 16  ;;  %10230 = vst [vmem:[#allocation51_spill] sm:$0xff] %v9087_v51  ;;  %v3697_v43 = vld [vmem:[#allocation2 + $0xd4] sm:$0x1]  ;;  %v9095_v34 = vpop.f32.mrf.mxu0 }
 0x304   : > { %v6795_v24 = vcombine.low %v4654_v55, %v4663_v10  ;;  %v4028_v63 = vrot.slane %v4026_v47, 5  ;;  %v4665_v32 = vshrl.u32 %v4379_v15, 16  ;;  %v4023_v1 = vor.u32 %v4022_v12, %v4018_v60  ;;  %10231 = vst [vmem:[#allocation52_spill] sm:$0xff] %v9095_v34 }
 0x305   : > { %7248 = vmatmul.mubr.msk.bf16.gmra.mxu1 %vm1518_vm11, %v6755_v56  ;;  %v4014_v23 = vrot.slane %v4013_v13, 4  ;;  %v4670_v40 = vshrl.u32 %v9077_v49, 16  ;;  %v4673_v59 = vshll.u32 %v9077_v49, 16  ;;  %v4679_v55 = vshrl.u32 %v9083_v30, 16 }
 0x306   : > { %7282 = vmatmul.mubr.msk.bf16.gmra.mxu0 %vm1518_vm11, %v6795_v24  ;;  %v6781_v36 = vrot.slane %v4665_v32, 11  ;;  %v4682_v47 = vshll.u32 %v9083_v30, 16  ;;  %v4032_v28 = vrot.slane %v4030_v61, 4  ;;  %v4024_v15 = vrot.slane %v4023_v1, 4  ;;  %v9099_v13 = vpop.f32.mrf.mxu1  ;;  %v9101_v32 = vld [vmem:[#allocation2 + $0xe4] sm:$0xf] }
 0x307   : > { %v4019_v38 = vsel %vm8245_vm0, %v4014_v23, %v4018_v60  ;;  %v4672_v56 = vrot.slane %v4670_v40, 7  ;;  %v4036_v10 = vshll.u32 %v3696_v3, 16  ;;  %10232 = vst [vmem:[#allocation53_spill] sm:$0xff] %v9099_v13  ;;  %v4681_v12 = vrot.slane %v4679_v55, 7  ;;  %10233 = vst [vmem:[#allocation54_spill] sm:$0xff] %v9101_v32  ;;  %v9109_v55 = vpop.f32.mrf.mxu0 }
 0x308   : > { %v4033_v49 = vor.u32 %v4032_v28, %v4028_v63  ;;  %v4040_v52 = vshrl.u32 %v3696_v3, 16  ;;  %v4046_v24 = vshll.u32 %v3697_v43, 16  ;;  %v4029_v30 = vsel %vm8245_vm0, %v4024_v15, %v4028_v63  ;;  %v9105_v33 = vpop.f32.mrf.mxu1  ;;  %10236 = vst [vmem:[#allocation57_spill] sm:$0xff] %v9109_v55 }
 0x309   : > { %v4675_v61 = vor.u32 %v4673_v59, %v4672_v56  ;;  %v4677_v51 = vrot.slane %v4672_v56, 4  ;;  %v4038_v34 = vrot.slane %v4036_v10, 5  ;;  %10234 = vst [vmem:[#allocation55_spill] sm:$0xff] %v9105_v33  ;;  %v6756_v60 = vcombine.low %v4019_v38, %v4029_v30  ;;  %v5322_v59 = vld [vmem:[#allocation2 + $0x34] sm:$0xf] }
 0x30a   : > { %v4684_v23 = vor.u32 %v4682_v47, %v4681_v12  ;;  %v4034_v1 = vrot.slane %v4033_v49, 4  ;;  %v4042_v40 = vrot.slane %v4040_v52, 4  ;;  %v4048_v43 = vrot.slane %v4046_v24, 5  ;;  %v9114_v15 = vpop.f32.mrf.mxu1  ;;  %v5323_v38 = vld [vmem:[#allocation2 + $0x38] sm:$0xf] }
 0x30b   : > { %v4676_v3 = vsel %vm8200_vm13, %v6781_v36, %v4675_v61  ;;  %v4686_v28 = vrot.slane %v4681_v12, 4  ;;  %v4688_v63 = vshrl.u32 %v9101_v32, 16  ;;  %10237 = vst [vmem:[#allocation58_spill] sm:$0xff] %v9114_v15  ;;  %7251 = vmatprep.mubr.msk.bf16.mxu1 %vm1518_vm11, %v6756_v60  ;;  %v4691_v47 = vshll.u32 %v9101_v32, 16  ;;  %v7499_v61 = vld [vmem:[#allocation2 + $0x34] sm:$0xf] }
 0x30c   : > { %v4685_v49 = vsel %vm8200_vm13, %v4677_v51, %v4684_v23  ;;  %v4039_v30 = vsel %vm8245_vm0, %v4034_v1, %v4038_v34  ;;  %v4043_v52 = vor.u32 %v4042_v40, %v4038_v34  ;;  %v4697_v10 = vshrl.u32 %v9107_v50, 16  ;;  %v7500_v15 = vld [vmem:[#allocation2 + $0x38] sm:$0xf]  ;;  %v5324_v33 = vld [vmem:[#allocation2 + $0x3c] sm:$0xf]  ;;  %v9124_v23 = vpop.f32.mrf.mxu0 }
 0x30d   : > { %v6796_v36 = vcombine.low %v4676_v3, %v4685_v49  ;;  %v4690_v56 = vrot.slane %v4688_v63, 7  ;;  %v4700_v12 = vshll.u32 %v9107_v50, 16  ;;  %v6814_v60 = vcombine.low %v7499_v61, %v7500_v15  ;;  %10238 = vst [vmem:[#allocation59_spill] sm:$0xff] %v9124_v23  ;;  %v5325_v3 = vld [vmem:[#allocation2 + $0x40] sm:$0xf]  ;;  %v9127_v49 = vpop.f32.mrf.mxu1 }
 0x30e   : > { %v4044_v24 = vrot.slane %v4043_v52, 4  ;;  %v5363_v13 = vshrl.u32 %v5322_v59, 16  ;;  %v5366_v51 = vshll.u32 %v5322_v59, 16  ;;  %v4699_v40 = vrot.slane %v4697_v10, 7  ;;  %10239 = vst [vmem:[#allocation60_spill] sm:$0xff] %v9127_v49  ;;  %v9131_v55 = vpop.f32.mrf.mxu0 }
 0x30f   : > { %7285 = vmatprep.mubr.msk.bf16.mxu0 %vm1518_vm11, %v6796_v36  ;;  %v4693_v34 = vor.u32 %v4691_v47, %v4690_v56  ;;  %v4695_v1 = vrot.slane %v4690_v56, 4  ;;  %v5372_v63 = vshll.u32 %v5323_v38, 16  ;;  %v5326_v32 = vld [vmem:[#allocation2 + $0x44] sm:$0x1]  ;;  %v5376_v61 = vshrl.u32 %v5323_v38, 16 }
 0x310   : > { %v4049_v52 = vsel %vm8245_vm0, %v4044_v24, %v4048_v43  ;;  %v5365_v50 = vrot.slane %v5363_v13, 4  ;;  %v5368_v15 = vrot.slane %v5366_v51, 5  ;;  %v4702_v47 = vor.u32 %v4700_v12, %v4699_v40  ;;  %v9135_v49 = vpop.f32.mrf.mxu0 }
 0x311   : > { %v6757_v59 = vcombine.low %v4039_v30, %v4049_v52  ;;  %v4694_v36 = vsel %vm8200_vm13, %v4686_v28, %v4693_v34  ;;  %v5374_v56 = vrot.slane %v5372_v63, 5  ;;  %v5378_v23 = vrot.slane %v5376_v61, 4 }
 0x312   : > { %v5369_v10 = vor.u32 %v5368_v15, %v5365_v50  ;;  %v5382_v62 = vshll.u32 %v5324_v33, 16  ;;  %v5386_v20 = vshrl.u32 %v5324_v33, 16  ;;  %v4703_v13 = vsel %vm8200_vm13, %v4695_v1, %v4702_v47 }
 0x313   : > { %7252 = vmatmul.mubr.msk.bf16.gmra.mxu1 %vm1518_vm11, %v6757_v59  ;;  %v5392_v43 = vshll.u32 %v5325_v3, 16  ;;  %v5396_v38 = vshrl.u32 %v5325_v3, 16  ;;  %v5402_v24 = vshll.u32 %v5326_v32, 16  ;;  %v9140_v30 = vpop.f32.mrf.mxu1  ;;  %v6797_v51 = vcombine.low %v4694_v36, %v4703_v13  ;;  %v7501_v3 = vld [vmem:[#allocation2 + $0x3c] sm:$0xf] }
 0x314   : > { %7291 = vmatprep.mubr.msk.bf16.mxu1 %vm1518_vm11, %v6814_v60  ;;  %v5370_v28 = vrot.slane %v5369_v10, 4  ;;  %v5379_v50 = vor.u32 %v5378_v23, %v5374_v56  ;;  %v5384_v12 = vrot.slane %v5382_v62, 5  ;;  %v5388_v34 = vrot.slane %v5386_v20, 4  ;;  %v7502_v60 = vld [vmem:[#allocation2 + $0x40] sm:$0xf]  ;;  %v9150_v23 = vpop.f32.mrf.mxu0 }
 0x315   : > { %v5394_v33 = vrot.slane %v5392_v43, 5  ;;  %v5398_v40 = vrot.slane %v5396_v38, 4  ;;  %v5404_v63 = vrot.slane %v5402_v24, 5  ;;  %v9143_v52 = vpop.f32.mrf.mxu1  ;;  %7286 = vmatmul.mubr.msk.bf16.gmra.mxu0 %vm1518_vm11, %v6797_v51  ;;  %v1874_v1 = vadd.f32 %v8913_v19, %v8806_v6  ;;  %v5327_v36 = vld [vmem:[#allocation2 + $0x4c] sm:$0xf] }
 0x316   : > { %v5375_v58 = vsel %vm8245_vm0, %v5370_v28, %v5374_v56  ;;  %v5380_v32 = vrot.slane %v5379_v50, 4  ;;  %v6815_v15 = vcombine.low %v7501_v3, %v7502_v60  ;;  %v5389_v20 = vor.u32 %v5388_v34, %v5384_v12  ;;  %v7503_v10 = vld [vmem:[#allocation2 + $0x4c] sm:$0xf]  ;;  %v7504_v13 = vld [vmem:[#allocation2 + $0x50] sm:$0xf] }
 0x317   : > { %v5399_v62 = vor.u32 %v5398_v40, %v5394_v33  ;;  %v1866_v61 = vadd.f32 %v8917_v35, %v8811_v7  ;;  %v1877_v59 = vadd.f32 %v8926_v4, %v8819_v37  ;;  %v9156_v47 = vpop.f32.mrf.mxu1  ;;  %v9161_v6 = vadd.f32 %v8931_v39, %v1874_v1  ;;  %v5328_v38 = vld [vmem:[#allocation2 + $0x50] sm:$0xf]  ;;  %v5329_v4 = vld [vmem:[#allocation2 + $0x54] sm:$0xf] }
 0x318   : > { %v5385_v56 = vsel %vm8245_vm0, %v5380_v32, %v5384_v12  ;;  %v1869_v19 = vadd.f32 %v8933_v11, %v8829_v27  ;;  %v6816_v43 = vcombine.low %v7503_v10, %v7504_v13  ;;  %v5390_v7 = vrot.slane %v5389_v20, 4 }
 0x319   : > { %v5400_v35 = vrot.slane %v5399_v62, 4  ;;  %v6846_v24 = vcombine.low %v5375_v58, %v5385_v56  ;;  %v9166_v37 = vadd.f32 %v8937_v31, %v1866_v61  ;;  %v9169_v51 = vadd.f32 %v8942_v29, %v1877_v59  ;;  %v9174_v27 = vpop.f32.mrf.mxu0  ;;  %v9176_v11 = vpop.f32.mrf.mxu1  ;;  %v5331_v62 = vld [vmem:[#allocation2 + $0x5c] sm:$0x1]  ;;  %v7505_v59 = vld [vmem:[#allocation2 + $0x54] sm:$0xf] }
 0x31a   : > { %v9172_v39 = vadd.f32 %v8953_v44, %v1869_v19  ;;  %v5407_v28 = vshrl.u32 %v5327_v36, 16  ;;  %v5410_v50 = vshll.u32 %v5327_v36, 16  ;;  %v5395_v12 = vsel %vm8245_vm0, %v5390_v7, %v5394_v33  ;;  %v5330_v44 = vld [vmem:[#allocation2 + $0x58] sm:$0xf] }
 0x31b   : > { %v5405_v31 = vsel %vm8245_vm0, %v5400_v35, %v5404_v63  ;;  %7325 = vmatprep.mubr.msk.bf16.mxu0 %vm1518_vm11, %v6846_v24  ;;  %7292 = vmatmul.mubr.msk.bf16.vlgmr.msra.gmra.mxu1 %vm1518_vm11, %v6815_v15  ;;  %v5416_v29 = vshll.u32 %v5328_v38, 16  ;;  %v5420_v34 = vshrl.u32 %v5328_v38, 16  ;;  %v5426_v1 = vshll.u32 %v5329_v4, 16  ;;  %v9185_v3 = vpop.f32.mrf.mxu0  ;;  %v7506_v36 = vld [vmem:[#allocation2 + $0x58] sm:$0xf] }
 0x31c   : > { %v6847_v40 = vcombine.low %v5395_v12, %v5405_v31  ;;  %7295 = vmatprep.mubr.msk.bf16.mxu1 %vm1518_vm11, %v6816_v43  ;;  %v5409_v58 = vrot.slane %v5407_v28, 4  ;;  %v5412_v32 = vrot.slane %v5410_v50, 5  ;;  %v5430_v20 = vshrl.u32 %v5329_v4, 16 }
 0x31d   : > { %v5418_v60 = vrot.slane %v5416_v29, 5  ;;  %v5422_v33 = vrot.slane %v5420_v34, 4  ;;  %v1890_v63 = vadd.f32 %v8944_v45, %v8834_v41  ;;  %v5428_v61 = vrot.slane %v5426_v1, 5  ;;  %v9190_v10 = vpop.f32.mrf.mxu0  ;;  %v5332_v34 = vld [vmem:[#allocation2 + $0x64] sm:$0xf] }
 0x31e   : > { %7326 = vmatmul.mubr.msk.bf16.vlgmr.msra.gmra.mxu0 %vm1518_vm11, %v6847_v40  ;;  %v5413_v15 = vor.u32 %v5412_v32, %v5409_v58  ;;  %v6817_v56 = vcombine.low %v7505_v59, %v7506_v36  ;;  %v5436_v19 = vshll.u32 %v5330_v44, 16  ;;  %v5432_v38 = vrot.slane %v5430_v20, 4 }
 0x31f   : > { %v5423_v43 = vor.u32 %v5422_v33, %v5418_v60  ;;  %v9195_v7 = vadd.f32 %v8962_v9, %v1890_v63  ;;  %v5440_v35 = vshrl.u32 %v5330_v44, 16  ;;  %v5446_v24 = vshll.u32 %v5331_v62, 16 }
 0x320   : > { %v9192_v13 = vpop.f32.mrf.mxu1  ;;  %v5414_v41 = vrot.slane %v5413_v15, 4  ;;  %v5438_v45 = vrot.slane %v5436_v19, 5  ;;  %v1882_v4 = vadd.f32 %v8949_v2, %v8841_v57  ;;  %v5433_v12 = vor.u32 %v5432_v38, %v5428_v61  ;;  %v5333_v57 = vld [vmem:[#allocation2 + $0x68] sm:$0xf]  ;;  %v9210_v2 = vpop.f32.mrf.mxu0 }
 0x321   : > { %v5424_v50 = vrot.slane %v5423_v43, 4  ;;  %v5442_v31 = vrot.slane %v5440_v35, 4  ;;  %v1893_v29 = vadd.f32 %v8955_v22, %v8847_v26  ;;  %v5448_v40 = vrot.slane %v5446_v24, 5 }
 0x322   : > { %v9199_v28 = vpop.f32.mrf.mxu1  ;;  %v5419_v9 = vsel %vm8245_vm0, %v5414_v41, %v5418_v60  ;;  %v9206_v44 = vadd.f32 %v8968_v25, %v1882_v4  ;;  %v1885_v58 = vadd.f32 %v8966_v42, %v8854_v21  ;;  %v5434_v26 = vrot.slane %v5433_v12, 4  ;;  %v5334_v25 = vld [vmem:[#allocation2 + $0x6c] sm:$0xf]  ;;  %v7507_v21 = vld [vmem:[#allocation2 + $0x64] sm:$0xf] }
 0x323   : > { %v5429_v1 = vsel %vm8245_vm0, %v5424_v50, %v5428_v61  ;;  %7296 = vmatmul.mubr.msk.bf16.gmra.mxu1 %vm1518_vm11, %v6817_v56  ;;  %v5443_v22 = vor.u32 %v5442_v31, %v5438_v45  ;;  %v9218_v60 = vadd.f32 %v8973_v17, %v1893_v29  ;;  %v7508_v42 = vld [vmem:[#allocation2 + $0x68] sm:$0xf]  ;;  %v5451_v62 = vshrl.u32 %v5332_v34, 16  ;;  %v5336_v50 = vld [vmem:[#allocation2 + $0x74] sm:$0x1] }
 0x324   : > { %v9212_v32 = vpop.f32.mrf.mxu1  ;;  %v6848_v33 = vcombine.low %v5419_v9, %v5429_v1  ;;  %v9221_v20 = vadd.f32 %v8984_v48, %v1885_v58  ;;  %v6818_v63 = vcombine.low %v7507_v21, %v7508_v42  ;;  %v5439_v15 = vsel %vm8245_vm0, %v5434_v26, %v5438_v45  ;;  %v5335_v48 = vld [vmem:[#allocation2 + $0x70] sm:$0xf]  ;;  %v7509_v1 = vld [vmem:[#allocation2 + $0x6c] sm:$0xf] }
 0x325   : > { %v5444_v61 = vrot.slane %v5443_v22, 4  ;;  %v5454_v59 = vshll.u32 %v5332_v34, 16  ;;  %v5460_v36 = vshll.u32 %v5333_v57, 16  ;;  %v5453_v17 = vrot.slane %v5451_v62, 4  ;;  %v9227_v38 = vpop.f32.mrf.mxu0  ;;  %v7510_v26 = vld [vmem:[#allocation2 + $0x70] sm:$0xf] }
 0x326   : > { %10240 = vst [vmem:[#allocation61_spill] sm:$0xff] %v9221_v20  ;;  %7329 = vmatprep.mubr.msk.bf16.mxu0 %vm1518_vm11, %v6848_v33  ;;  %7299 = vmatprep.mubr.msk.bf16.mxu1 %vm1518_vm11, %v6818_v63  ;;  %v5464_v56 = vshrl.u32 %v5333_v57, 16  ;;  %v5470_v19 = vshll.u32 %v5334_v25, 16  ;;  %v5474_v43 = vshrl.u32 %v5334_v25, 16  ;;  %v9229_v35 = vpop.f32.mrf.mxu1  ;;  %v1906_v4 = vadd.f32 %v8977_v46, %v8859_v0 }
 0x327   : > { %v5449_v41 = vsel %vm8245_vm0, %v5444_v61, %v5448_v40  ;;  %v5456_v45 = vrot.slane %v5454_v59, 5  ;;  %v5462_v24 = vrot.slane %v5460_v36, 5  ;;  %v9235_v9 = vpop.f32.mrf.mxu0  ;;  %v6819_v22 = vcombine.low %v7509_v1, %v7510_v26 }
 0x328   : > { %v6849_v12 = vcombine.low %v5439_v15, %v5449_v41  ;;  %v5466_v31 = vrot.slane %v5464_v56, 4  ;;  %v5472_v29 = vrot.slane %v5470_v19, 5  ;;  %v5476_v34 = vrot.slane %v5474_v43, 4  ;;  %v5337_v56 = vld [vmem:[#allocation2 + $0x7c] sm:$0xf] }
 0x329   : > { %v5457_v58 = vor.u32 %v5456_v45, %v5453_v17  ;;  %v9238_v57 = vadd.f32 %v8997_v16, %v1906_v4  ;;  %v5480_v40 = vshll.u32 %v5335_v48, 16  ;;  %v5484_v46 = vshrl.u32 %v5335_v48, 16  ;;  %v9241_v21 = vpop.f32.mrf.mxu0  ;;  %v10243_v45 = vld [vmem:[#allocation31_spill] sm:$0xff]  ;;  %v5338_v4 = vld [vmem:[#allocation2 + $0x80] sm:$0xf] }
 0x32a   : > { %7330 = vmatmul.mubr.msk.bf16.gmra.mxu0 %vm1518_vm11, %v6849_v12  ;;  %v5467_v25 = vor.u32 %v5466_v31, %v5462_v24  ;;  %v5477_v33 = vor.u32 %v5476_v34, %v5472_v29  ;;  %v5490_v0 = vshll.u32 %v5336_v50, 16  ;;  %v9243_v42 = vpop.f32.mrf.mxu1  ;;  %v1898_v16 = vadd.f32 %v8982_v53, %v8867_v54  ;;  %v10245_v53 = vld [vmem:[#allocation16_spill] sm:$0xff]  ;;  %v5339_v50 = vld [vmem:[#allocation2 + $0x84] sm:$0xf] }
 0x32b   : > { %10241 = vst [vmem:[#allocation62_spill] sm:$0xff] %v9238_v57  ;;  %v5458_v63 = vrot.slane %v5457_v58, 4  ;;  %7300 = vmatmul.mubr.msk.bf16.gmra.mxu1 %vm1518_vm11, %v6819_v22  ;;  %v5482_v62 = vrot.slane %v5480_v40, 5  ;;  %v1909_v15 = vadd.f32 %v8987_v18, %v8873_v14  ;;  %v5486_v36 = vrot.slane %v5484_v46, 4  ;;  %v9250_v19 = vpop.f32.mrf.mxu0  ;;  %v10246_v14 = vld [vmem:[#allocation30_spill] sm:$0xff]  ;;  %v10247_v40 = vld [vmem:[#allocation35_spill] sm:$0xff] }
 0x32c   : > { %v5468_v61 = vrot.slane %v5467_v25, 4  ;;  %v5478_v59 = vrot.slane %v5477_v33, 4  ;;  %v5492_v17 = vrot.slane %v5490_v0, 5  ;;  %v9252_v43 = vpop.f32.mrf.mxu1  ;;  %v9257_v41 = vadd.f32 %v9008_v5, %v1898_v16  ;;  %v7511_v58 = vld [vmem:[#allocation2 + $0x7c] sm:$0xf] }
 0x32d   : > { %v5463_v48 = vsel %vm8245_vm0, %v5458_v63, %v5462_v24  ;;  %v9260_v54 = vadd.f32 %v10243_v45, %v1909_v15  ;;  %v1901_v18 = vadd.f32 %v10246_v14, %v10245_v53  ;;  %v5487_v34 = vor.u32 %v5486_v36, %v5482_v62  ;;  %v7512_v24 = vld [vmem:[#allocation2 + $0x80] sm:$0xf]  ;;  %v9268_v5 = vpop.f32.mrf.mxu0  ;;  %v10250_v45 = vld [vmem:[#allocation32_spill] sm:$0xff]  ;;  %v5340_v14 = vld [vmem:[#allocation2 + $0x88] sm:$0xf] }
 0x32e   : > { %10242 = vst [vmem:[#allocation63_spill] sm:$0xff] %v9257_v41  ;;  %v5473_v12 = vsel %vm8245_vm0, %v5468_v61, %v5472_v29  ;;  %v5483_v31 = vsel %vm8245_vm0, %v5478_v59, %v5482_v62  ;;  %v6820_v1 = vcombine.low %v7511_v58, %v7512_v24  ;;  %v9270_v26 = vpop.f32.mrf.mxu1  ;;  %v5495_v33 = vshrl.u32 %v5337_v56, 16  ;;  %v10264_v41 = vld [vmem:[#allocation37_spill] sm:$0xff] }
 0x32f   : > { %10244 = vst [vmem:[#allocation31_spill] sm:$0xff] %v9260_v54  ;;  %v6850_v22 = vcombine.low %v5463_v48, %v5473_v12  ;;  %v9273_v25 = vadd.f32 %v10247_v40, %v1901_v18  ;;  %v5498_v46 = vshll.u32 %v5337_v56, 16  ;;  %v5488_v0 = vrot.slane %v5487_v34, 4  ;;  %v9276_v62 = vpop.f32.mrf.mxu0  ;;  %v10249_v48 = vld [vmem:[#allocation19_spill] sm:$0xff]  ;;  %v5341_v34 = vld [vmem:[#allocation2 + $0x8c] sm:$0x1] }
 0x330   : > { %7303 = vmatprep.mubr.msk.bf16.mxu1 %vm1518_vm11, %v6820_v1  ;;  %v5504_v29 = vshll.u32 %v5338_v4, 16  ;;  %v5508_v63 = vshrl.u32 %v5338_v4, 16  ;;  %v5514_v16 = vshll.u32 %v5339_v50, 16  ;;  %v9278_v15 = vpop.f32.mrf.mxu1  ;;  %v5497_v61 = vrot.slane %v5495_v33, 4 }
 0x331   : > { %10248 = vst [vmem:[#allocation16_spill] sm:$0xff] %v9273_v25  ;;  %7333 = vmatprep.mubr.msk.bf16.mxu0 %vm1518_vm11, %v6850_v22  ;;  %v5500_v59 = vrot.slane %v5498_v46, 5  ;;  %v5518_v36 = vshrl.u32 %v5339_v50, 16  ;;  %v1922_v53 = vadd.f32 %v10250_v45, %v10249_v48  ;;  %v5493_v56 = vsel %vm8245_vm0, %v5488_v0, %v5492_v17  ;;  %v9285_v58 = vpop.f32.mrf.mxu0  ;;  %v10251_v22 = vld [vmem:[#allocation38_spill] sm:$0xff]  ;;  %v7513_v48 = vld [vmem:[#allocation2 + $0x84] sm:$0xf] }
 0x332   : > { %v5506_v18 = vrot.slane %v5504_v29, 5  ;;  %v5510_v12 = vrot.slane %v5508_v63, 4  ;;  %v5516_v4 = vrot.slane %v5514_v16, 5  ;;  %v6851_v24 = vcombine.low %v5483_v31, %v5493_v56  ;;  %v7514_v45 = vld [vmem:[#allocation2 + $0x88] sm:$0xf]  ;;  %v10253_v16 = vld [vmem:[#allocation25_spill] sm:$0xff] }
 0x333   : > { %v5501_v1 = vor.u32 %v5500_v59, %v5497_v61  ;;  %v5520_v40 = vrot.slane %v5518_v36, 4  ;;  %v9288_v33 = vadd.f32 %v10251_v22, %v1922_v53  ;;  %v9290_v50 = vpop.f32.mrf.mxu1  ;;  %v6821_v25 = vcombine.low %v7513_v48, %v7514_v45  ;;  %v9292_v0 = vpop.f32.mrf.mxu0  ;;  %v10254_v61 = vld [vmem:[#allocation33_spill] sm:$0xff]  ;;  %v10255_v22 = vld [vmem:[#allocation24_spill] sm:$0xff]  ;;  %v5342_v45 = vld [vmem:[#allocation2 + $0x94] sm:$0xf] }
 0x334   : > { %v5511_v46 = vor.u32 %v5510_v12, %v5506_v18  ;;  %v5524_v54 = vshll.u32 %v5340_v14, 16  ;;  %v5528_v17 = vshrl.u32 %v5340_v14, 16  ;;  %7334 = vmatmul.mubr.msk.bf16.gmra.mxu0 %vm1518_vm11, %v6851_v24  ;;  %v5534_v31 = vshll.u32 %v5341_v34, 16  ;;  %v10256_v48 = vld [vmem:[#allocation36_spill] sm:$0xff] }
 0x335   : > { %10252 = vst [vmem:[#allocation30_spill] sm:$0xff] %v9288_v33  ;;  %v5502_v29 = vrot.slane %v5501_v1, 4  ;;  %v5521_v63 = vor.u32 %v5520_v40, %v5516_v4  ;;  %v1914_v59 = vadd.f32 %v10254_v61, %v10253_v16  ;;  %v9297_v36 = vpop.f32.mrf.mxu1  ;;  %7304 = vmatmul.mubr.msk.bf16.gmra.mxu1 %vm1518_vm11, %v6821_v25  ;;  %v1925_v14 = vadd.f32 %v10256_v48, %v10255_v22  ;;  %v9302_v33 = vpop.f32.mrf.mxu0  ;;  %v10258_v40 = vld [vmem:[#allocation41_spill] sm:$0xff]  ;;  %v5343_v61 = vld [vmem:[#allocation2 + $0x98] sm:$0xf]  ;;  %v10263_v48 = vld [vmem:[#allocation27_spill] sm:$0xff] }
 0x336   : > { %v5512_v53 = vrot.slane %v5511_v46, 4  ;;  %v5526_v56 = vrot.slane %v5524_v54, 5  ;;  %v5530_v12 = vrot.slane %v5528_v17, 4  ;;  %10257 = vst [vmem:[#allocation35_spill] sm:$0xff] %v9302_v33  ;;  %v5536_v1 = vrot.slane %v5534_v31, 5  ;;  %v10261_v17 = vld [vmem:[#allocation43_spill] sm:$0xff] }
 0x337   : > { %v5507_v24 = vsel %vm8245_vm0, %v5502_v29, %v5506_v18  ;;  %v5522_v34 = vrot.slane %v5521_v63, 4  ;;  %v9307_v16 = vadd.f32 %v10258_v40, %v1914_v59  ;;  %v9309_v46 = vpop.f32.mrf.mxu1  ;;  %v9314_v22 = vadd.f32 %v10261_v17, %v1925_v14  ;;  %v5344_v33 = vld [vmem:[#allocation2 + $0x9c] sm:$0xf]  ;;  %v9318_v18 = vpop.f32.mrf.mxu0  ;;  %v7515_v31 = vld [vmem:[#allocation2 + $0x94] sm:$0xf] }
 0x338   : > { %10260 = vst [vmem:[#allocation32_spill] sm:$0xff] %v9309_v46  ;;  %v5517_v54 = vsel %vm8245_vm0, %v5512_v53, %v5516_v4  ;;  %v5531_v25 = vor.u32 %v5530_v12, %v5526_v56  ;;  %v1917_v57 = vadd.f32 %v10264_v41, %v10263_v48  ;;  %10265 = vst [vmem:[#allocation25_spill] sm:$0xff] %v9318_v18  ;;  %v7516_v59 = vld [vmem:[#allocation2 + $0x98] sm:$0xf]  ;;  %v10267_v53 = vld [vmem:[#allocation45_spill] sm:$0xff]  ;;  %v5542_v14 = vshll.u32 %v5342_v45, 16 }
 0x339   : > { %10259 = vst [vmem:[#allocation19_spill] sm:$0xff] %v9307_v16  ;;  %10262 = vst [vmem:[#allocation38_spill] sm:$0xff] %v9314_v22  ;;  %v6852_v29 = vcombine.low %v5507_v24, %v5517_v54  ;;  %v5527_v63 = vsel %vm8245_vm0, %v5522_v34, %v5526_v56  ;;  %v6822_v40 = vcombine.low %v7515_v31, %v7516_v59  ;;  %v5539_v16 = vshrl.u32 %v5342_v45, 16  ;;  %v9322_v20 = vpop.f32.mrf.mxu1  ;;  %v9327_v41 = vpop.f32.mrf.mxu0  ;;  %v5345_v48 = vld [vmem:[#allocation2 + $0xa0] sm:$0xf] }
 0x33a   : > { %10266 = vst [vmem:[#allocation33_spill] sm:$0xff] %v9322_v20  ;;  %v5532_v4 = vrot.slane %v5531_v25, 4  ;;  %v9325_v12 = vadd.f32 %v10267_v53, %v1917_v57  ;;  %v5548_v17 = vshll.u32 %v5343_v61, 16  ;;  %10269 = vst [vmem:[#allocation36_spill] sm:$0xff] %v9327_v41  ;;  %v5552_v56 = vshrl.u32 %v5343_v61, 16  ;;  %v10271_v45 = vld [vmem:[#allocation9_spill] sm:$0xff] }
 0x33b   : > { %7337 = vmatprep.mubr.msk.bf16.mxu0 %vm1518_vm11, %v6852_v29  ;;  %7307 = vmatprep.mubr.msk.bf16.mxu1 %vm1518_vm11, %v6822_v40  ;;  %v5541_v24 = vrot.slane %v5539_v16, 4  ;;  %v5558_v34 = vshll.u32 %v5344_v33, 16  ;;  %v5562_v54 = vshrl.u32 %v5344_v33, 16  ;;  %v9331_v31 = vpop.f32.mrf.mxu1  ;;  %v5544_v57 = vrot.slane %v5542_v14, 5  ;;  %v10272_v53 = vld [vmem:[#allocation42_spill] sm:$0xff]  ;;  %v9337_v41 = vpop.f32.mrf.mxu0  ;;  %v10275_v20 = vld [vmem:[#allocation48_spill] sm:$0xff] }
 0x33c   : > { %10268 = vst [vmem:[#allocation24_spill] sm:$0xff] %v9325_v12  ;;  %10270 = vst [vmem:[#allocation41_spill] sm:$0xff] %v9331_v31  ;;  %v5537_v25 = vsel %vm8245_vm0, %v5532_v4, %v5536_v1  ;;  %v5550_v59 = vrot.slane %v5548_v17, 5  ;;  %v1938_v12 = vadd.f32 %v10272_v53, %v10271_v45  ;;  %v5346_v22 = vld [vmem:[#allocation2 + $0xa4] sm:$0x1]  ;;  %v5554_v40 = vrot.slane %v5552_v56, 4 }
 0x33d   : > { %10273 = vst [vmem:[#allocation43_spill] sm:$0xff] %v9337_v41  ;;  %v6853_v29 = vcombine.low %v5527_v63, %v5537_v25  ;;  %v5560_v16 = vrot.slane %v5558_v34, 5  ;;  %v5564_v61 = vrot.slane %v5562_v54, 4  ;;  %v9339_v18 = vpop.f32.mrf.mxu1  ;;  %v5545_v33 = vor.u32 %v5544_v57, %v5541_v24  ;;  %v7517_v46 = vld [vmem:[#allocation2 + $0x9c] sm:$0xf]  ;;  %v9344_v17 = vpop.f32.mrf.mxu0  ;;  %v10281_v57 = vld [vmem:[#allocation11_spill] sm:$0xff] }
 0x33e   : > { %10274 = vst [vmem:[#allocation27_spill] sm:$0xff] %v9339_v18  ;;  %v9342_v31 = vadd.f32 %v10275_v20, %v1938_v12  ;;  %v7518_v1 = vld [vmem:[#allocation2 + $0xa0] sm:$0xf]  ;;  %v5568_v14 = vshll.u32 %v5345_v48, 16  ;;  %10277 = vst [vmem:[#allocation45_spill] sm:$0xff] %v9344_v17  ;;  %v5555_v45 = vor.u32 %v5554_v40, %v5550_v59  ;;  %v5572_v63 = vshrl.u32 %v5345_v48, 16 }
 0x33f   : > { %v6823_v4 = vcombine.low %v7517_v46, %v7518_v1  ;;  %7338 = vmatmul.mubr.msk.bf16.gmra.mxu0 %vm1518_vm11, %v6853_v29  ;;  %v5565_v53 = vor.u32 %v5564_v61, %v5560_v16  ;;  %v5578_v56 = vshll.u32 %v5346_v22, 16  ;;  %v9347_v34 = vpop.f32.mrf.mxu1  ;;  %v5546_v54 = vrot.slane %v5545_v33, 4  ;;  %v10279_v20 = vld [vmem:[#allocation7_spill] sm:$0xff]  ;;  %v10280_v12 = vld [vmem:[#allocation44_spill] sm:$0xff]  ;;  %v10282_v46 = vld [vmem:[#allocation46_spill] sm:$0xff] }
 0x340   : > { %10276 = vst [vmem:[#allocation37_spill] sm:$0xff] %v9342_v31  ;;  %10278 = vst [vmem:[#allocation9_spill] sm:$0xff] %v9347_v34  ;;  %v5570_v24 = vrot.slane %v5568_v14, 5  ;;  %v1930_v25 = vadd.f32 %v10280_v12, %v10279_v20  ;;  %v1941_v1 = vadd.f32 %v10282_v46, %v10281_v57  ;;  %v9354_v31 = vpop.f32.mrf.mxu0  ;;  %v5556_v17 = vrot.slane %v5555_v45, 4  ;;  %v10285_v33 = vld [vmem:[#allocation51_spill] sm:$0xff]  ;;  %v10287_v14 = vld [vmem:[#allocation52_spill] sm:$0xff] }
 0x341   : > { %7308 = vmatmul.mubr.msk.bf16.gmra.mxu1 %vm1518_vm11, %v6823_v4  ;;  %10283 = vst [vmem:[#allocation42_spill] sm:$0xff] %v9354_v31  ;;  %v5566_v29 = vrot.slane %v5565_v53, 4  ;;  %v5574_v40 = vrot.slane %v5572_v63, 4  ;;  %v5580_v61 = vrot.slane %v5578_v56, 5  ;;  %v9356_v48 = vpop.f32.mrf.mxu1  ;;  %v5551_v22 = vsel %vm8245_vm0, %v5546_v54, %v5550_v59  ;;  %v10289_v20 = vld [vmem:[#allocation8_spill] sm:$0xff]  ;;  %v10290_v12 = vld [vmem:[#allocation50_spill] sm:$0xff] }
 0x342   : > { %10284 = vst [vmem:[#allocation48_spill] sm:$0xff] %v9356_v48  ;;  %v9361_v4 = vadd.f32 %v10285_v33, %v1930_v25  ;;  %v9364_v34 = vadd.f32 %v10287_v14, %v1941_v1  ;;  %v1933_v57 = vadd.f32 %v10290_v12, %v10289_v20  ;;  %v5347_v46 = vld [vmem:[#allocation2 + $0xac] sm:$0xf]  ;;  %v5348_v31 = vld [vmem:[#allocation2 + $0xb0] sm:$0xf]  ;;  %v9368_v45 = vpop.f32.mrf.mxu0  ;;  %v5561_v53 = vsel %vm8245_vm0, %v5556_v17, %v5560_v16  ;;  %v10295_v12 = vld [vmem:[#allocation13_spill] sm:$0xff] }
 0x343   : > { %10291 = vst [vmem:[#allocation11_spill] sm:$0xff] %v9368_v45  ;;  %v5571_v63 = vsel %vm8245_vm0, %v5566_v29, %v5570_v24  ;;  %v5575_v59 = vor.u32 %v5574_v40, %v5570_v24  ;;  %v7519_v56 = vld [vmem:[#allocation2 + $0xac] sm:$0xf]  ;;  %v7520_v54 = vld [vmem:[#allocation2 + $0xb0] sm:$0xf]  ;;  %v9374_v1 = vpop.f32.mrf.mxu1  ;;  %v6854_v14 = vcombine.low %v5551_v22, %v5561_v53  ;;  %v10297_v48 = vld [vmem:[#allocation29_spill] sm:$0xff] }
 0x344   : > { %10286 = vst [vmem:[#allocation7_spill] sm:$0xff] %v9361_v4  ;;  %10288 = vst [vmem:[#allocation44_spill] sm:$0xff] %v9364_v34  ;;  %v6824_v25 = vcombine.low %v7519_v56, %v7520_v54  ;;  %v5349_v33 = vld [vmem:[#allocation2 + $0xb4] sm:$0xf]  ;;  %v10293_v34 = vld [vmem:[#allocation57_spill] sm:$0xff]  ;;  %v9383_v17 = vpop.f32.mrf.mxu0  ;;  %v5583_v24 = vshrl.u32 %v5347_v46, 16 }
 0x345   : > { %10292 = vst [vmem:[#allocation46_spill] sm:$0xff] %v9374_v1  ;;  %v9377_v20 = vadd.f32 %v10293_v34, %v1933_v57  ;;  %v10296_v4 = vld [vmem:[#allocation53_spill] sm:$0xff]  ;;  %v10298_v41 = vld [vmem:[#allocation28_spill] sm:$0xff]  ;;  %10299 = vst [vmem:[#allocation52_spill] sm:$0xff] %v9383_v17  ;;  %v5576_v29 = vrot.slane %v5575_v59, 4  ;;  %v5586_v40 = vshll.u32 %v5347_v46, 16  ;;  %v9386_v54 = vpop.f32.mrf.mxu1  ;;  %7341 = vmatprep.mubr.msk.bf16.mxu0 %vm1518_vm11, %v6854_v14 }
 0x346   : > { %v1954_v45 = vadd.f32 %v10296_v4, %v10295_v12  ;;  %v6825_v16 = vcombine.low %v10298_v41, %v10297_v48  ;;  %7311 = vmatprep.mubr.msk.bf16.mxu1 %vm1518_vm11, %v6824_v25  ;;  %v5592_v56 = vshll.u32 %v5348_v31, 16  ;;  %10300 = vst [vmem:[#allocation8_spill] sm:$0xff] %v9386_v54  ;;  %v10301_v34 = vld [vmem:[#allocation59_spill] sm:$0xff]  ;;  %v5596_v57 = vshrl.u32 %v5348_v31, 16  ;;  %v5350_v12 = vld [vmem:[#allocation2 + $0xb8] sm:$0xf]  ;;  %v9392_v41 = vpop.f32.mrf.mxu0 }
 0x347   : > { %10294 = vst [vmem:[#allocation51_spill] sm:$0xff] %v9377_v20  ;;  %v5602_v4 = vshll.u32 %v5349_v33, 16  ;;  %v5606_v53 = vshrl.u32 %v5349_v33, 16  ;;  %10303 = vst [vmem:[#allocation57_spill] sm:$0xff] %v9392_v41  ;;  %v5581_v48 = vsel %vm8245_vm0, %v5576_v29, %v5580_v61  ;;  %v5585_v59 = vrot.slane %v5583_v24, 4  ;;  %v9396_v17 = vpop.f32.mrf.mxu1  ;;  %v10306_v41 = vld [vmem:[#allocation55_spill] sm:$0xff] }
 0x348   : > { %v9390_v22 = vadd.f32 %v10301_v34, %v1954_v45  ;;  %v5588_v25 = vrot.slane %v5586_v40, 5  ;;  %v5594_v46 = vrot.slane %v5592_v56, 5  ;;  %v5351_v20 = vld [vmem:[#allocation2 + $0xbc] sm:$0x1]  ;;  %v6855_v54 = vcombine.low %v5571_v63, %v5581_v48  ;;  %v9399_v34 = vpop.f32.mrf.mxu0  ;;  %v10307_v56 = vld [vmem:[#allocation15_spill] sm:$0xff] }
 0x349   : > { %7312 = vmatmul.mubr.msk.bf16.gmra.mxu1 %vm1518_vm11, %v6825_v16  ;;  %v5598_v45 = vrot.slane %v5596_v57, 4  ;;  %v5604_v14 = vrot.slane %v5602_v4, 5  ;;  %v5608_v31 = vrot.slane %v5606_v53, 4  ;;  %10304 = vst [vmem:[#allocation13_spill] sm:$0xff] %v9399_v34  ;;  %v5612_v18 = vshll.u32 %v5350_v12, 16  ;;  %v9403_v29 = vpop.f32.mrf.mxu1  ;;  %v10308_v16 = vld [vmem:[#allocation58_spill] sm:$0xff] }
 0x34a   : > { %10302 = vst [vmem:[#allocation50_spill] sm:$0xff] %v9390_v22  ;;  %v5589_v33 = vor.u32 %v5588_v25, %v5585_v59  ;;  %v10305_v22 = vld [vmem:[#allocation10_spill] sm:$0xff]  ;;  %v5616_v61 = vshrl.u32 %v5350_v12, 16  ;;  %7342 = vmatmul.mubr.msk.bf16.gmra.mxu0 %vm1518_vm11, %v6855_v54  ;;  %v5622_v63 = vshll.u32 %v5351_v20, 16  ;;  %v1957_v57 = vadd.f32 %v10308_v16, %v10307_v56  ;;  %v9408_v4 = vpop.f32.mrf.mxu0  ;;  %v5352_v20 = vld [vmem:[#allocation2 + $0xc4] sm:$0xf] }
 0x34b   : > { %v1946_v1 = vadd.f32 %v10306_v41, %v10305_v22  ;;  %v5599_v24 = vor.u32 %v5598_v45, %v5594_v46  ;;  %v5609_v40 = vor.u32 %v5608_v31, %v5604_v14  ;;  %v5614_v59 = vrot.slane %v5612_v18, 5  ;;  %v9413_v41 = vpop.f32.mrf.mxu1  ;;  %v10311_v56 = vld [vmem:[#allocation12_spill] sm:$0xff]  ;;  %v7521_v18 = vld [vmem:[#allocation2 + $0xc4] sm:$0xf] }
 0x34c   : > { %v5590_v53 = vrot.slane %v5589_v33, 4  ;;  %v5618_v22 = vrot.slane %v5616_v61, 4  ;;  %v5624_v34 = vrot.slane %v5622_v63, 5  ;;  %v9416_v54 = vadd.f32 %v9135_v49, %v1957_v57  ;;  %v9418_v45 = vpop.f32.mrf.mxu0  ;;  %v10313_v61 = vld [vmem:[#allocation34_spill] sm:$0xff]  ;;  %v10314_v63 = vld [vmem:[#allocation17_spill] sm:$0xff] }
 0x34d   : > { %v9411_v48 = vadd.f32 %v9131_v55, %v1946_v1  ;;  %v5600_v12 = vrot.slane %v5599_v24, 4  ;;  %v5610_v25 = vrot.slane %v5609_v40, 4  ;;  %v10312_v55 = vld [vmem:[#allocation60_spill] sm:$0xff]  ;;  %v6826_v16 = vcombine.low %v7521_v18, %v10313_v61  ;;  %v9425_v24 = vpop.f32.mrf.mxu1 }
 0x34e   : > { %10310 = vst [vmem:[#allocation29_spill] sm:$0xff] %v9416_v54  ;;  %v5595_v31 = vsel %vm8245_vm0, %v5590_v53, %v5594_v46  ;;  %v5619_v33 = vor.u32 %v5618_v22, %v5614_v59  ;;  %v1949_v1 = vadd.f32 %v10312_v55, %v10311_v56  ;;  %v1970_v57 = vadd.f32 %v9140_v30, %v10314_v63  ;;  %v10315_v46 = vld [vmem:[#allocation40_spill] sm:$0xff]  ;;  %v10316_v53 = vld [vmem:[#allocation39_spill] sm:$0xff]  ;;  %v5354_v54 = vld [vmem:[#allocation2 + $0xcc] sm:$0xf]  ;;  %v9435_v56 = vpop.f32.mrf.mxu0 }
 0x34f   : > { %10309 = vst [vmem:[#allocation53_spill] sm:$0xff] %v9411_v48  ;;  %v5353_v48 = vld [vmem:[#allocation2 + $0xc8] sm:$0xf]  ;;  %v5605_v49 = vsel %vm8245_vm0, %v5600_v12, %v5604_v14  ;;  %v5615_v40 = vsel %vm8245_vm0, %v5610_v25, %v5614_v59  ;;  %v6827_v22 = vcombine.low %v10316_v53, %v10315_v46  ;;  %10317 = vst [vmem:[#allocation28_spill] sm:$0xff] %v9435_v56  ;;  %7315 = vmatprep.mubr.msk.bf16.mxu1 %vm1518_vm11, %v6826_v16  ;;  %v9441_v12 = vpop.f32.mrf.mxu1  ;;  %v5355_v46 = vld [vmem:[#allocation2 + $0xd0] sm:$0xf] }
 0x350   : > { %v6856_v55 = vcombine.low %v5595_v31, %v5605_v49  ;;  %v5620_v18 = vrot.slane %v5619_v33, 4  ;;  %v9438_v61 = vadd.f32 %v9150_v23, %v1949_v1  ;;  %v5627_v14 = vshrl.u32 %v5352_v20, 16  ;;  %10319 = vst [vmem:[#allocation10_spill] sm:$0xff] %v9441_v12  ;;  %v9447_v53 = vpop.f32.mrf.mxu0  ;;  %v5356_v16 = vld [vmem:[#allocation2 + $0xd4] sm:$0x1]  ;;  %v10323_v12 = vld [vmem:[#allocation14_spill] sm:$0xff] }
 0x351   : > { %v9444_v59 = vadd.f32 %v9174_v27, %v1970_v57  ;;  %7316 = vmatmul.mubr.msk.bf16.gmra.mxu1 %vm1518_vm11, %v6827_v22  ;;  %v5630_v30 = vshll.u32 %v5352_v20, 16  ;;  %v5636_v25 = vshll.u32 %v5353_v48, 16  ;;  %v5640_v63 = vshrl.u32 %v5353_v48, 16  ;;  %10321 = vst [vmem:[#allocation15_spill] sm:$0xff] %v9447_v53  ;;  %v9452_v49 = vpop.f32.mrf.mxu1 }
 0x352   : > { %10318 = vst [vmem:[#allocation59_spill] sm:$0xff] %v9438_v61  ;;  %7345 = vmatprep.mubr.msk.bf16.mxu0 %vm1518_vm11, %v6856_v55  ;;  %v5625_v23 = vsel %vm8245_vm0, %v5620_v18, %v5624_v34  ;;  %v5629_v31 = vrot.slane %v5627_v14, 4  ;;  %v5646_v33 = vshll.u32 %v5354_v54, 16  ;;  %v5650_v1 = vshrl.u32 %v5354_v54, 16 }
 0x353   : > { %10320 = vst [vmem:[#allocation55_spill] sm:$0xff] %v9444_v59  ;;  %v6857_v27 = vcombine.low %v5615_v40, %v5625_v23  ;;  %v5632_v57 = vrot.slane %v5630_v30, 5  ;;  %v5638_v22 = vrot.slane %v5636_v25, 5  ;;  %v5642_v20 = vrot.slane %v5640_v63, 4  ;;  %v9454_v59 = vpop.f32.mrf.mxu0  ;;  %v9458_v56 = vpop.f32.mrf.mxu1  ;;  %v10324_v23 = vld [vmem:[#allocation18_spill] sm:$0xff] }
 0x354   : > { %10322 = vst [vmem:[#allocation58_spill] sm:$0xff] %v9454_v59  ;;  %v5648_v48 = vrot.slane %v5646_v33, 5  ;;  %v5652_v61 = vrot.slane %v5650_v1, 4  ;;  %v1962_v55 = vadd.f32 %v9143_v52, %v10323_v12  ;;  %v5656_v53 = vshll.u32 %v5355_v46, 16 }
 0x355   : > { %7346 = vmatmul.mubr.msk.bf16.gmra.mxu0 %vm1518_vm11, %v6857_v27  ;;  %v5633_v34 = vor.u32 %v5632_v57, %v5629_v31  ;;  %v5643_v54 = vor.u32 %v5642_v20, %v5638_v22  ;;  %v5660_v18 = vshrl.u32 %v5355_v46, 16  ;;  %v5666_v14 = vshll.u32 %v5356_v16, 16  ;;  %v9461_v40 = vpop.f32.mrf.mxu0  ;;  %v9468_v52 = vpop.f32.mrf.mxu1  ;;  %v10327_v57 = vld [vmem:[#allocation49_spill] sm:$0xff] }
 0x356   : > { %v5653_v30 = vor.u32 %v5652_v61, %v5648_v48  ;;  %v9464_v25 = vadd.f32 %v9185_v3, %v1962_v55  ;;  %v5658_v63 = vrot.slane %v5656_v53, 5  ;;  %v1973_v33 = vadd.f32 %v9156_v47, %v10324_v23  ;;  %v10326_v61 = vld [vmem:[#allocation21_spill] sm:$0xff]  ;;  %v10328_v53 = vld [vmem:[#allocation47_spill] sm:$0xff]  ;;  %v5357_v55 = vld [vmem:[#allocation2 + $0xdc] sm:$0xf] }
 0x357   : > { %v5634_v12 = vrot.slane %v5633_v34, 4  ;;  %v5644_v1 = vrot.slane %v5643_v54, 4  ;;  %v5662_v59 = vrot.slane %v5660_v18, 4  ;;  %v5668_v27 = vrot.slane %v5666_v14, 5  ;;  %v9470_v31 = vpop.f32.mrf.mxu0  ;;  %v9479_v47 = vpop.f32.mrf.mxu1  ;;  %v10329_v14 = vld [vmem:[#allocation22_spill] sm:$0xff] }
 0x358   : > { %v5654_v46 = vrot.slane %v5653_v30, 4  ;;  %v9473_v16 = vadd.f32 %v9190_v10, %v1973_v33  ;;  %v1965_v3 = vadd.f32 %v9176_v11, %v10326_v61  ;;  %v6828_v20 = vcombine.low %v10328_v53, %v10327_v57  ;;  %v5358_v30 = vld [vmem:[#allocation2 + $0xe0] sm:$0xf]  ;;  %v5359_v23 = vld [vmem:[#allocation2 + $0xe4] sm:$0xf] }
 0x359   : > { %v5639_v34 = vsel %vm8245_vm0, %v5634_v12, %v5638_v22  ;;  %v5649_v54 = vsel %vm8245_vm0, %v5644_v1, %v5648_v48  ;;  %v5663_v18 = vor.u32 %v5662_v59, %v5658_v63  ;;  %v1986_v10 = vadd.f32 %v9192_v13, %v10329_v14  ;;  %v9487_v33 = vpop.f32.mrf.mxu0  ;;  %v10332_v22 = vld [vmem:[#allocation56_spill] sm:$0xff]  ;;  %v10333_v12 = vld [vmem:[#allocation54_spill] sm:$0xff]  ;;  %v9497_v59 = vpop.f32.mrf.mxu1 }
 0x35a   : > { %10325 = vst [vmem:[#allocation12_spill] sm:$0xff] %v9473_v16  ;;  %10330 = vst [vmem:[#allocation60_spill] sm:$0xff] %v9487_v33  ;;  %v6858_v11 = vcombine.low %v5639_v34, %v5649_v54  ;;  %v5659_v61 = vsel %vm8245_vm0, %v5654_v46, %v5658_v63  ;;  %v9492_v57 = vadd.f32 %v9210_v2, %v1965_v3  ;;  %7319 = vmatprep.mubr.msk.bf16.mxu1 %vm1518_vm11, %v6828_v20  ;;  %v5360_v20 = vld [vmem:[#allocation2 + $0xe8] sm:$0xf] }
 0x35b   : > { %v6829_v48 = vcombine.low %v10333_v12, %v10332_v22  ;;  %v5664_v1 = vrot.slane %v5663_v18, 4  ;;  %v9500_v13 = vadd.f32 %v9227_v38, %v1986_v10  ;;  %v5671_v53 = vshrl.u32 %v5357_v55, 16  ;;  %v9502_v34 = vpop.f32.mrf.mxu0  ;;  %v9506_v54 = vpop.f32.mrf.mxu1  ;;  %v10336_v22 = vld [vmem:[#allocation20_spill] sm:$0xff]  ;;  %v5361_v12 = vld [vmem:[#allocation2 + $0xec] sm:$0x1] }
 0x35c   : > { %10331 = vst [vmem:[#allocation34_spill] sm:$0xff] %v9492_v57  ;;  %v5674_v14 = vshll.u32 %v5357_v55, 16  ;;  %10335 = vst [vmem:[#allocation40_spill] sm:$0xff] %v9502_v34  ;;  %7349 = vmatprep.mubr.msk.bf16.mxu0 %vm1518_vm11, %v6858_v11  ;;  %v5680_v2 = vshll.u32 %v5358_v30, 16  ;;  %v5684_v63 = vshrl.u32 %v5358_v30, 16  ;;  %v5690_v46 = vshll.u32 %v5359_v23, 16 }
 0x35d   : > { %10334 = vst [vmem:[#allocation17_spill] sm:$0xff] %v9500_v13  ;;  %7320 = vmatmul.mubr.msk.bf16.gmra.mxu1 %vm1518_vm11, %v6829_v48  ;;  %v5694_v3 = vshrl.u32 %v5359_v23, 16  ;;  %v5669_v18 = vsel %vm8245_vm0, %v5664_v1, %v5668_v27  ;;  %v5673_v38 = vrot.slane %v5671_v53, 4  ;;  %v1978_v55 = vadd.f32 %v9199_v28, %v10336_v22  ;;  %v9512_v13 = vpop.f32.mrf.mxu0  ;;  %v9514_v16 = vpop.f32.mrf.mxu1  ;;  %v10338_v22 = vld [vmem:[#allocation23_spill] sm:$0xff] }
 0x35e   : > { %v5676_v10 = vrot.slane %v5674_v14, 5  ;;  %v6859_v11 = vcombine.low %v5659_v61, %v5669_v18  ;;  %v5682_v48 = vrot.slane %v5680_v2, 5  ;;  %v5686_v57 = vrot.slane %v5684_v63, 4 }
 0x35f   : > { %v5692_v30 = vrot.slane %v5690_v46, 5  ;;  %v5696_v34 = vrot.slane %v5694_v3, 4  ;;  %v9517_v33 = vadd.f32 %v9235_v9, %v1978_v55  ;;  %v5700_v27 = vshll.u32 %v5360_v20, 16  ;;  %v9519_v1 = vpop.f32.mrf.mxu0  ;;  %v9524_v2 = vpop.f32.mrf.mxu1  ;;  %v10339_v3 = vld [vmem:[#allocation26_spill] sm:$0xff] }
 0x360   : > { %v5677_v23 = vor.u32 %v5676_v10, %v5673_v38  ;;  %7350 = vmatmul.mubr.msk.bf16.gmra.mxu0 %vm1518_vm11, %v6859_v11  ;;  %v5687_v28 = vor.u32 %v5686_v57, %v5682_v48  ;;  %v5704_v53 = vshrl.u32 %v5360_v20, 16  ;;  %v5710_v14 = vshll.u32 %v5361_v12, 16 }
 0x361   : > { %10337 = vst [vmem:[#allocation39_spill] sm:$0xff] %v9517_v33  ;;  %v1989_v61 = vadd.f32 %v9212_v32, %v10338_v22  ;;  %v5697_v46 = vor.u32 %v5696_v34, %v5692_v30  ;;  %v5702_v18 = vrot.slane %v5700_v27, 5  ;;  %v1981_v9 = vadd.f32 %v9229_v35, %v10339_v3  ;;  %v9528_v38 = vpop.f32.mrf.mxu0  ;;  %v9533_v20 = vpop.f32.mrf.mxu1  ;;  %v10341_v22 = vld [vmem:[#allocation61_spill] sm:$0xff] }
 0x362   : > { %v5678_v63 = vrot.slane %v5677_v23, 4  ;;  %v5688_v10 = vrot.slane %v5687_v28, 4  ;;  %v5706_v55 = vrot.slane %v5704_v53, 4  ;;  %v5712_v33 = vrot.slane %v5710_v14, 5 }
 0x363   : > { %v9531_v57 = vadd.f32 %v9241_v21, %v1989_v61  ;;  %v5698_v12 = vrot.slane %v5697_v46, 4  ;;  %v9538_v34 = vadd.f32 %v9250_v19, %v1981_v9  ;;  %v3303_v35 = vadd.f32 %v9243_v42, %v9161_v6  ;;  %v9542_v11 = vpop.f32.mrf.mxu0  ;;  %v10342_v61 = vld [vmem:[#allocation33_spill] sm:$0xff]  ;;  %v10346_v9 = vld [vmem:[#allocation63_spill] sm:$0xff] }
 0x364   : > { %v5683_v32 = vsel %vm8245_vm0, %v5678_v63, %v5682_v48  ;;  %v5693_v23 = vsel %vm8245_vm0, %v5688_v10, %v5692_v30  ;;  %v5707_v27 = vor.u32 %v5706_v55, %v5702_v18  ;;  %v3301_v21 = vadd.f32 %v9252_v43, %v9166_v37  ;;  %v9550_v48 = vpop.f32.mrf.mxu1  ;;  %v10347_v10 = vld [vmem:[#allocation27_spill] sm:$0xff] }
 0x365   : > { %v3304_v28 = vadd.f32 %v9270_v26, %v9169_v51  ;;  %v6860_v53 = vcombine.low %v5683_v32, %v5693_v23  ;;  %v5703_v19 = vsel %vm8245_vm0, %v5698_v12, %v5702_v18  ;;  %v9555_v6 = vadd.f32 %v9268_v5, %v3303_v35  ;;  %v9559_v30 = vpop.f32.mrf.mxu0  ;;  %v10344_v18 = vld [vmem:[#allocation62_spill] sm:$0xff]  ;;  %v10349_v12 = vld [vmem:[#allocation36_spill] sm:$0xff]  ;;  %v10350_v23 = vld [vmem:[#allocation43_spill] sm:$0xff] }
 0x366   : > { %v3302_v42 = vadd.f32 %v9278_v15, %v9172_v39  ;;  %v5708_v14 = vrot.slane %v5707_v27, 4  ;;  %v9562_v37 = vadd.f32 %v9276_v62, %v3301_v21  ;;  %v3307_v43 = vadd.f32 %v9290_v50, %v9195_v7  ;;  %v9569_v26 = vpop.f32.mrf.mxu1  ;;  %v10340_v15 = vld [vmem:[#allocation32_spill] sm:$0xff]  ;;  %v10343_v50 = vld [vmem:[#allocation35_spill] sm:$0xff]  ;;  %v10351_v27 = vld [vmem:[#allocation45_spill] sm:$0xff] }
 0x367   : > { %v9565_v51 = vadd.f32 %v9285_v58, %v3304_v28  ;;  %7353 = vmatprep.mubr.msk.bf16.mxu0 %vm1518_vm11, %v6860_v53  ;;  %v3305_v39 = vadd.f32 %v9297_v36, %v9206_v44  ;;  %v3308_v62 = vadd.f32 %v10340_v15, %v9218_v60  ;;  %v3306_v58 = vadd.f32 %v10342_v61, %v10341_v22  ;;  %v9581_v63 = vpop.f32.mrf.mxu0  ;;  %v10348_v60 = vld [vmem:[#allocation25_spill] sm:$0xff]  ;;  %v10352_v28 = vld [vmem:[#allocation42_spill] sm:$0xff]  ;;  %v10356_v15 = vld [vmem:[#allocation48_spill] sm:$0xff] }
 0x368   : > { %v9573_v5 = vadd.f32 %v9292_v0, %v3302_v42  ;;  %v5713_v7 = vsel %vm8245_vm0, %v5708_v14, %v5712_v33  ;;  %v9586_v46 = vadd.f32 %v10343_v50, %v3307_v43  ;;  %v10345_v0 = vld [vmem:[#allocation41_spill] sm:$0xff]  ;;  %v3309_v44 = vadd.f32 %v10347_v10, %v10346_v9  ;;  %v7186_v36 = vpop.f32.mrf.mxu1  ;;  %v10353_v42 = vld [vmem:[#allocation31_spill] sm:$0xff]  ;;  %v10358_v61 = vld [vmem:[#allocation46_spill] sm:$0xff] }
 0x369   : > { %v3311_v3 = vadd.f32 %v10345_v0, %v10344_v18  ;;  %v6861_v55 = vcombine.low %v5703_v19, %v5713_v7  ;;  %v9593_v32 = vadd.f32 %v10348_v60, %v3305_v39  ;;  %v9596_v35 = vadd.f32 %v10349_v12, %v3308_v62  ;;  %v3611_v33 = vpop.f32.mrf.mxu0  ;;  %v10354_v14 = vld [vmem:[#allocation9_spill] sm:$0xff]  ;;  %v10355_v19 = vld [vmem:[#allocation16_spill] sm:$0xff]  ;;  %v10357_v62 = vld [vmem:[#allocation30_spill] sm:$0xff] }
 0x36a   : > { %v9599_v8 = vadd.f32 %v10350_v23, %v3306_v58  ;;  %v9605_v53 = vadd.f32 %v10352_v28, %v3309_v44  ;;  %v3312_v43 = vadd.f32 %v10354_v14, %v10353_v42  ;;  %v3310_v39 = vadd.f32 %v10356_v15, %v10355_v19  ;;  %v3289_v22 = vpop.f32.mrf.mxu1  ;;  %v10359_v7 = vld [vmem:[#allocation19_spill] sm:$0xff]  ;;  %v10360_v50 = vld [vmem:[#allocation8_spill] sm:$0xff]  ;;  %v10361_v0 = vld [vmem:[#allocation38_spill] sm:$0xff] }
 0x36b   : > { %v9602_v21 = vadd.f32 %v10351_v27, %v3311_v3  ;;  %7354 = vmatmul.mubr.msk.bf16.gmra.mxu0 %vm1518_vm11, %v6861_v55  ;;  %v3315_v58 = vadd.f32 %v10358_v61, %v10357_v62  ;;  %v3313_v18 = vadd.f32 %v10360_v50, %v10359_v7  ;;  %v3316_v3 = vadd.f32 %v9396_v17, %v10361_v0  ;;  %v10362_v9 = vld [vmem:[#allocation24_spill] sm:$0xff]  ;;  %v7220_v44 = vpop.f32.mrf.mxu0  ;;  %v10363_v60 = vld [vmem:[#allocation11_spill] sm:$0xff]  ;;  %v10365_v55 = vld [vmem:[#allocation37_spill] sm:$0xff] }
 0x36c   : > { %v3314_v10 = vadd.f32 %v9403_v29, %v10362_v9  ;;  %v9621_v12 = vadd.f32 %v10363_v60, %v3312_v43  ;;  %v10364_v23 = vld [vmem:[#allocation52_spill] sm:$0xff]  ;;  %v3319_v28 = vadd.f32 %v9413_v41, %v10365_v55  ;;  %v10366_v42 = vld [vmem:[#allocation7_spill] sm:$0xff]  ;;  %v10367_v19 = vld [vmem:[#allocation57_spill] sm:$0xff]  ;;  %v7225_v61 = vpop.f32.mrf.mxu1 }
 0x36d   : > { %v9624_v27 = vadd.f32 %v10364_v23, %v3310_v39  ;;  %v3317_v14 = vadd.f32 %v9425_v24, %v10366_v42  ;;  %v9631_v15 = vadd.f32 %v10367_v19, %v3315_v58  ;;  %v10368_v17 = vld [vmem:[#allocation13_spill] sm:$0xff]  ;;  %v9637_v29 = vadd.f32 %v9408_v4, %v3316_v3  ;;  %v3614_v39 = vpop.f32.mrf.mxu0  ;;  %v10369_v7 = vld [vmem:[#allocation28_spill] sm:$0xff]  ;;  %v10370_v41 = vld [vmem:[#allocation15_spill] sm:$0xff] }
 0x36e   : > { %v9634_v62 = vadd.f32 %v10368_v17, %v3313_v18  ;;  %v9640_v43 = vadd.f32 %v9418_v45, %v3314_v10  ;;  %v9643_v50 = vadd.f32 %v10369_v7, %v3319_v28  ;;  %v10371_v24 = vld [vmem:[#allocation44_spill] sm:$0xff]  ;;  %v10372_v58 = vld [vmem:[#allocation10_spill] sm:$0xff]  ;;  %v10373_v60 = vld [vmem:[#allocation51_spill] sm:$0xff]  ;;  %v4184_v19 = vpop.f32.mrf.mxu1 }
 0x36f   : > { %v9646_v0 = vadd.f32 %v10370_v41, %v3317_v14  ;;  %v3320_v9 = vadd.f32 %v10372_v58, %v10371_v24  ;;  %v3318_v18 = vadd.f32 %v9452_v49, %v10373_v60  ;;  %v10374_v23 = vld [vmem:[#allocation50_spill] sm:$0xff]  ;;  %v10375_v3 = vld [vmem:[#allocation53_spill] sm:$0xff]  ;;  %v10377_v28 = vld [vmem:[#allocation59_spill] sm:$0xff]  ;;  %v7259_v14 = vpop.f32.mrf.mxu0 }
 0x370   : > { %v3323_v4 = vadd.f32 %v9458_v56, %v10374_v23  ;;  %v3321_v45 = vadd.f32 %v9468_v52, %v10375_v3  ;;  %v10376_v10 = vld [vmem:[#allocation29_spill] sm:$0xff]  ;;  %v3322_v42 = vadd.f32 %v9497_v59, %v10377_v28  ;;  %v10378_v17 = vld [vmem:[#allocation58_spill] sm:$0xff]  ;;  %v10379_v49 = vld [vmem:[#allocation55_spill] sm:$0xff]  ;;  %v3325_v52 = vadd.f32 %v9514_v16, %v9464_v25 }
 0x371   : > { %v3324_v55 = vadd.f32 %v9479_v47, %v10376_v10  ;;  %v9661_v7 = vadd.f32 %v10378_v17, %v3320_v9  ;;  %v9664_v41 = vadd.f32 %v9461_v40, %v3318_v18  ;;  %v3327_v56 = vadd.f32 %v9506_v54, %v10379_v49  ;;  %v10380_v47 = vld [vmem:[#allocation60_spill] sm:$0xff]  ;;  %v4838_v40 = vpop.f32.mrf.mxu0  ;;  %v7226_v18 = vpop.f32.mrf.mxu1  ;;  %v10383_v16 = vld [vmem:[#allocation34_spill] sm:$0xff]  ;;  %v10384_v3 = vld [vmem:[#allocation17_spill] sm:$0xff] }
 0x372   : > { %v9671_v24 = vadd.f32 %v9470_v31, %v3323_v4  ;;  %v9674_v58 = vadd.f32 %v10380_v47, %v3321_v45  ;;  %v10381_v59 = vld [vmem:[#allocation40_spill] sm:$0xff]  ;;  %v9680_v9 = vadd.f32 %v9512_v13, %v3322_v42  ;;  %v9686_v54 = vadd.f32 %v9528_v38, %v3325_v52  ;;  %v10385_v10 = vld [vmem:[#allocation39_spill] sm:$0xff] }
 0x373   : > { %v9677_v60 = vadd.f32 %v10381_v59, %v3324_v55  ;;  %v9683_v23 = vadd.f32 %v9519_v1, %v3327_v56  ;;  %v10382_v25 = vld [vmem:[#allocation12_spill] sm:$0xff]  ;;  %v3326_v4 = vadd.f32 %v9533_v20, %v10383_v16  ;;  %v3331_v45 = vadd.f32 %v9550_v48, %v10384_v3  ;;  %v7260_v28 = vpop.f32.mrf.mxu0  ;;  %v4187_v42 = vpop.f32.mrf.mxu1 }
 0x374   : > { %v3328_v31 = vadd.f32 %v9524_v2, %v10382_v25  ;;  %v3329_v13 = vadd.f32 %v9569_v26, %v10385_v10  ;;  %v3332_v55 = vadd.f32 %v7186_v36, %v9531_v57  ;;  %v3330_v1 = vadd.f32 %v3289_v22, %v9538_v34 }
 0x375   : > { %v9702_v2 = vadd.f32 %v9559_v30, %v3326_v4  ;;  %v4313_v20 = vadd.f32 %v7225_v61, %v9555_v6  ;;  %v4311_v17 = vadd.f32 %v4184_v19, %v9562_v37  ;;  %v9707_v48 = vadd.f32 %v9581_v63, %v3331_v45  ;;  %v4841_v6 = vpop.f32.mrf.mxu0 }
 0x376   : > { %v9699_v38 = vadd.f32 %v9542_v11, %v3328_v31  ;;  %v9709_v26 = vadd.f32 %v3611_v33, %v3329_v13  ;;  %v9711_v57 = vadd.f32 %v7220_v44, %v3332_v55  ;;  %v9713_v34 = vadd.f32 %v3614_v39, %v3330_v1 }
 0x377   : > { %v9715_v36 = vadd.f32 %v7259_v14, %v4313_v20  ;;  %v9717_v11 = vadd.f32 %v4838_v40, %v4311_v17  ;;  %v4314_v30 = vadd.f32 %v7226_v18, %v9565_v51  ;;  %v4312_v22 = vadd.f32 %v4187_v42, %v9573_v5 }
 0x379   : > { %v9721_v61 = vadd.f32 %v7260_v28, %v4314_v30  ;;  %v9723_v37 = vadd.f32 %v4841_v6, %v4312_v22 }
 0x37a   : > { %v7229_v63 = vpop.f32.mrf.mxu1 }
 0x37b   : > { %v4317_v33 = vadd.f32 %v7229_v63, %v9586_v46 }
 0x37c   : > { %v4200_v44 = vpop.f32.mrf.mxu1 }
 0x37d   : > { %v7263_v19 = vpop.f32.mrf.mxu0  ;;  %v4315_v39 = vadd.f32 %v4200_v44, %v9593_v32 }
 0x37e   : > { %v9727_v14 = vadd.f32 %v7263_v19, %v4317_v33  ;;  %v7230_v49 = vpop.f32.mrf.mxu1 }
 0x37f   : > { %v4854_v56 = vpop.f32.mrf.mxu0  ;;  %v4318_v51 = vadd.f32 %v7230_v49, %v9596_v35 }
 0x380   : > { %v9730_v52 = vadd.f32 %v4854_v56, %v4315_v39  ;;  %v4203_v5 = vpop.f32.mrf.mxu1 }
 0x381   : > { %v7264_v47 = vpop.f32.mrf.mxu0  ;;  %v4316_v59 = vadd.f32 %v4203_v5, %v9599_v8 }
 0x382   : > { %v9733_v40 = vadd.f32 %v7264_v47, %v4318_v51 }
 0x383   : > { %v4857_v18 = vpop.f32.mrf.mxu0 }
 0x384   : > { %v9735_v46 = vadd.f32 %v4857_v18, %v4316_v59 }
 0x389   : > { %v7233_v25 = vpop.f32.mrf.mxu1 }
 0x38a   : > { %v4321_v32 = vadd.f32 %v7233_v25, %v9602_v21 }
 0x38b   : > { %v7267_v31 = vpop.f32.mrf.mxu0  ;;  %v4216_v16 = vpop.f32.mrf.mxu1 }
 0x38c   : > { %v9738_v4 = vadd.f32 %v7267_v31, %v4321_v32  ;;  %v4319_v35 = vadd.f32 %v4216_v16, %v9605_v53 }
 0x38d   : > { %v4870_v3 = vpop.f32.mrf.mxu0  ;;  %v7234_v45 = vpop.f32.mrf.mxu1 }
 0x38e   : > { %v9741_v10 = vadd.f32 %v4870_v3, %v4319_v35  ;;  %v4322_v8 = vadd.f32 %v7234_v45, %v9621_v12 }
 0x38f   : > { %v7268_v13 = vpop.f32.mrf.mxu0  ;;  %v4219_v55 = vpop.f32.mrf.mxu1 }
 0x390   : > { %v9744_v1 = vadd.f32 %v7268_v13, %v4322_v8  ;;  %v4320_v28 = vadd.f32 %v4219_v55, %v9624_v27 }
 0x391   : > { %v4873_v42 = vpop.f32.mrf.mxu0 }
 0x392   : > { %v9747_v21 = vadd.f32 %v4873_v42, %v4320_v28 }
 0x398   : > { %v7237_v20 = vpop.f32.mrf.mxu1 }
 0x399   : > { %v4325_v17 = vadd.f32 %v7237_v20, %v9631_v15 }
 0x39a   : > { %v4232_v30 = vpop.f32.mrf.mxu1 }
 0x39b   : > { %v7271_v53 = vpop.f32.mrf.mxu0  ;;  %v4323_v22 = vadd.f32 %v4232_v30, %v9634_v62 }
 0x39c   : > { %v9751_v6 = vadd.f32 %v7271_v53, %v4325_v17  ;;  %v7238_v63 = vpop.f32.mrf.mxu1 }
 0x39d   : > { %v4886_v12 = vpop.f32.mrf.mxu0  ;;  %v4326_v33 = vadd.f32 %v7238_v63, %v9637_v29 }
 0x39e   : > { %v9754_v44 = vadd.f32 %v4886_v12, %v4323_v22  ;;  %v4235_v19 = vpop.f32.mrf.mxu1 }
 0x39f   : > { %v7272_v27 = vpop.f32.mrf.mxu0  ;;  %v4324_v39 = vadd.f32 %v4235_v19, %v9640_v43 }
 0x3a0   : > { %v9757_v49 = vadd.f32 %v7272_v27, %v4326_v33 }
 0x3a1   : > { %v4889_v56 = vpop.f32.mrf.mxu0 }
 0x3a2   : > { %v9759_v15 = vadd.f32 %v4889_v56, %v4324_v39 }
 0x3a6   : > { %v7241_v51 = vpop.f32.mrf.mxu1 }
 0x3a7   : > { %v4329_v62 = vadd.f32 %v7241_v51, %v9643_v50 }
 0x3a8   : > { %v9762_v5 = vpop.f32.mrf.mxu1 }
 0x3a9   : > { %v7275_v47 = vpop.f32.mrf.mxu0 }
 0x3aa   : > { %v9764_v59 = vadd.f32 %v7275_v47, %v4329_v62  ;;  %v7242_v29 = vpop.f32.mrf.mxu1 }
 0x3ab   : > { %v9766_v18 = vpop.f32.mrf.mxu0  ;;  %v4330_v25 = vadd.f32 %v7242_v29, %v9661_v7 }
 0x3ac   : > { %v9771_v31 = vpop.f32.mrf.mxu1 }
 0x3ad   : > { %v7276_v32 = vpop.f32.mrf.mxu0 }
 0x3ae   : > { %v9769_v43 = vadd.f32 %v7276_v32, %v4330_v25 }
 0x3af   : > { %v9773_v16 = vpop.f32.mrf.mxu0 }
 0x3b5   : > { %v7245_v35 = vpop.f32.mrf.mxu1 }
 0x3b6   : > { %v4333_v50 = vadd.f32 %v7245_v35, %v9671_v24 }
 0x3b7   : > { %v4264_v3 = vpop.f32.mrf.mxu1  ;;  %v7279_v45 = vpop.f32.mrf.mxu0 }
 0x3b8   : > { %v4331_v8 = vadd.f32 %v4264_v3, %v9674_v58  ;;  %v9777_v13 = vadd.f32 %v7279_v45, %v4333_v50 }
 0x3b9   : > { %v7246_v55 = vpop.f32.mrf.mxu1  ;;  %v4918_v28 = vpop.f32.mrf.mxu0 }
 0x3ba   : > { %v4334_v7 = vadd.f32 %v7246_v55, %v9677_v60  ;;  %v9780_v42 = vadd.f32 %v4918_v28, %v4331_v8 }
 0x3bb   : > { %v4267_v20 = vpop.f32.mrf.mxu1  ;;  %v7280_v17 = vpop.f32.mrf.mxu0 }
 0x3bc   : > { %v4332_v30 = vadd.f32 %v4267_v20, %v9680_v9  ;;  %v9783_v53 = vadd.f32 %v7280_v17, %v4334_v7 }
 0x3bd   : > { %v4921_v22 = vpop.f32.mrf.mxu0 }
 0x3be   : > { %v9785_v24 = vadd.f32 %v4921_v22, %v4332_v30 }
 0x3c5   : > { %v7249_v63 = vpop.f32.mrf.mxu1 }
 0x3c6   : > { %v4337_v58 = vadd.f32 %v7249_v63, %v9683_v23  ;;  %v7283_v12 = vpop.f32.mrf.mxu0 }
 0x3c7   : > { %v4280_v33 = vpop.f32.mrf.mxu1 }
 0x3c8   : > { %v9788_v19 = vadd.f32 %v7283_v12, %v4337_v58  ;;  %v4335_v60 = vadd.f32 %v4280_v33, %v9686_v54  ;;  %v4934_v27 = vpop.f32.mrf.mxu0 }
 0x3c9   : > { %v7250_v39 = vpop.f32.mrf.mxu1 }
 0x3ca   : > { %v9791_v56 = vadd.f32 %v4934_v27, %v4335_v60  ;;  %v4338_v9 = vadd.f32 %v7250_v39, %v9699_v38  ;;  %v7284_v51 = vpop.f32.mrf.mxu0 }
 0x3cb   : > { %v4283_v62 = vpop.f32.mrf.mxu1 }
 0x3cc   : > { %v9794_v47 = vadd.f32 %v7284_v51, %v4338_v9  ;;  %v4336_v29 = vadd.f32 %v4283_v62, %v9702_v2  ;;  %v4937_v25 = vpop.f32.mrf.mxu0 }
 0x3ce   : > { %v9797_v23 = vadd.f32 %v4937_v25, %v4336_v29 }
 0x3d3   : > { %v7253_v32 = vpop.f32.mrf.mxu1 }
 0x3d4   : > { %v4341_v35 = vadd.f32 %v7253_v32, %v9707_v48 }
 0x3d5   : > { %v4296_v50 = vpop.f32.mrf.mxu1  ;;  %v7287_v54 = vpop.f32.mrf.mxu0 }
 0x3d6   : > { %v4339_v3 = vadd.f32 %v4296_v50, %v9709_v26  ;;  %v9801_v45 = vadd.f32 %v7287_v54, %v4341_v35 }
 0x3d7   : > { %v7254_v8 = vpop.f32.mrf.mxu1  ;;  %v4950_v38 = vpop.f32.mrf.mxu0 }
 0x3d8   : > { %v4342_v55 = vadd.f32 %v7254_v8, %v9711_v57  ;;  %v9804_v28 = vadd.f32 %v4950_v38, %v4339_v3 }
 0x3d9   : > { %v4299_v7 = vpop.f32.mrf.mxu1  ;;  %v7288_v2 = vpop.f32.mrf.mxu0 }
 0x3da   : > { %v4340_v20 = vadd.f32 %v4299_v7, %v9713_v34  ;;  %v9807_v17 = vadd.f32 %v7288_v2, %v4342_v55 }
 0x3db   : > { %v7293_v30 = vpop.f32.mrf.mxu1  ;;  %v4953_v48 = vpop.f32.mrf.mxu0 }
 0x3dc   : > { %v9809_v22 = vadd.f32 %v4953_v48, %v4340_v20  ;;  %v5292_v12 = vadd.f32 %v7293_v30, %v9715_v36 }
 0x3dd   : > { %v5163_v63 = vpop.f32.mrf.mxu1 }
 0x3de   : > { %v7327_v26 = vpop.f32.mrf.mxu0  ;;  %v5290_v58 = vadd.f32 %v5163_v63, %v9717_v11 }
 0x3df   : > { %v7294_v33 = vpop.f32.mrf.mxu1  ;;  %v9817_v51 = vadd.f32 %v7327_v26, %v5292_v12 }
 0x3e0   : > { %v5848_v57 = vpop.f32.mrf.mxu0  ;;  %v5293_v27 = vadd.f32 %v7294_v33, %v9721_v61 }
 0x3e1   : > { %v9813_v60 = vadd.f32 %v5848_v57, %v5290_v58  ;;  %v5166_v39 = vpop.f32.mrf.mxu1  ;;  %v6080_v35 = vmul.f32 %v9817_v51, %v9817_v51  ;;  %v6010_v3 = vsel %vm1518_vm11, %v9817_v51, 0.0 }
 0x3e2   : > { %v7328_v34 = vpop.f32.mrf.mxu0  ;;  %v5291_v9 = vadd.f32 %v5166_v39, %v9723_v37 }
 0x3e3   : > { %v7297_v62 = vpop.f32.mrf.mxu1  ;;  %v6078_v25 = vmul.f32 %v9813_v60, %v9813_v60  ;;  %v9821_v11 = vadd.f32 %v7328_v34, %v5293_v27  ;;  %v6007_v61 = vsel %vm1518_vm11, %v9813_v60, 0.0  ;;  %v6113_v26 = vsel %vm1518_vm11, %v6080_v35, 0.0 }
 0x3e4   : > { %v5851_v29 = vpop.f32.mrf.mxu0  ;;  %v5296_v12 = vadd.f32 %v7297_v62, %v9727_v14 }
 0x3e5   : > { %v9823_v36 = vadd.f32 %v5851_v29, %v5291_v9  ;;  %v5179_v32 = vpop.f32.mrf.mxu1  ;;  %v6110_v38 = vsel %vm1518_vm11, %v6078_v25, 0.0  ;;  %v6081_v55 = vmul.f32 %v9821_v11, %v9821_v11  ;;  %v6012_v58 = vsel %vm1518_vm11, %v9821_v11, 0.0 }
 0x3e6   : > { %v5294_v2 = vadd.f32 %v5179_v32, %v9730_v52 }
 0x3e7   : > { %v6008_v37 = vsel %vm1518_vm11, %v9823_v36, 0.0  ;;  %v6079_v50 = vmul.f32 %v9823_v36, %v9823_v36  ;;  %v7298_v54 = vpop.f32.mrf.mxu1  ;;  %v6115_v34 = vsel %vm1518_vm11, %v6081_v55, 0.0 }
 0x3e8   : > { %v6009_v8 = vadd.f32 %v6008_v37, %v6007_v61  ;;  %v5297_v52 = vadd.f32 %v7298_v54, %v9733_v40 }
 0x3e9   : > { %v6111_v7 = vsel %vm1518_vm11, %v6079_v50, 0.0  ;;  %v5182_v20 = vpop.f32.mrf.mxu1 }
 0x3ea   : > { %v6011_v30 = vadd.f32 %v6010_v3, %v6009_v8  ;;  %v6112_v48 = vadd.f32 %v6111_v7, %v6110_v38  ;;  %v7331_v63 = vpop.f32.mrf.mxu0  ;;  %v5295_v29 = vadd.f32 %v5182_v20, %v9735_v46 }
 0x3eb   : > { %v7301_v33 = vpop.f32.mrf.mxu1  ;;  %v9849_v61 = vadd.f32 %v7331_v63, %v5296_v12 }
 0x3ec   : > { %v6114_v57 = vadd.f32 %v6113_v26, %v6112_v48  ;;  %v5864_v27 = vpop.f32.mrf.mxu0  ;;  %v6013_v39 = vadd.f32 %v6012_v58, %v6011_v30  ;;  %v5300_v58 = vadd.f32 %v7301_v33, %v9738_v4 }
 0x3ed   : > { %v9845_v9 = vadd.f32 %v5864_v27, %v5294_v2  ;;  %v5195_v25 = vpop.f32.mrf.mxu1  ;;  %v6084_v55 = vmul.f32 %v9849_v61, %v9849_v61  ;;  %v6018_v48 = vsel %vm1518_vm11, %v9849_v61, 0.0 }
 0x3ee   : > { %v6116_v32 = vadd.f32 %v6115_v34, %v6114_v57  ;;  %v7332_v35 = vpop.f32.mrf.mxu0  ;;  %v5298_v30 = vadd.f32 %v5195_v25, %v9741_v10 }
 0x3ef   : > { %v6014_v14 = vsel %vm1518_vm11, %v9845_v9, 0.0  ;;  %v6082_v62 = vmul.f32 %v9845_v9, %v9845_v9  ;;  %v7302_v37 = vpop.f32.mrf.mxu1  ;;  %v9856_v38 = vadd.f32 %v7332_v35, %v5297_v52  ;;  %v6121_v34 = vsel %vm1518_vm11, %v6084_v55, 0.0 }
 0x3f0   : > { %v6015_v50 = vadd.f32 %v6014_v14, %v6013_v39  ;;  %v5867_v3 = vpop.f32.mrf.mxu0 }
 0x3f1   : > { %v6117_v8 = vsel %vm1518_vm11, %v6082_v62, 0.0  ;;  %v9858_v40 = vadd.f32 %v5867_v3, %v5295_v29  ;;  %v5198_v54 = vpop.f32.mrf.mxu1  ;;  %v6085_v63 = vmul.f32 %v9856_v38, %v9856_v38  ;;  %v5301_v29 = vadd.f32 %v7302_v37, %v9744_v1 }
 0x3f2   : > { %v6118_v46 = vadd.f32 %v6117_v8, %v6116_v32  ;;  %v6020_v10 = vsel %vm1518_vm11, %v9856_v38, 0.0  ;;  %v5299_v35 = vadd.f32 %v5198_v54, %v9747_v21 }
 0x3f3   : > { %v6016_v7 = vsel %vm1518_vm11, %v9858_v40, 0.0  ;;  %v6083_v2 = vmul.f32 %v9858_v40, %v9858_v40  ;;  %v6123_v4 = vsel %vm1518_vm11, %v6085_v63, 0.0 }
 0x3f4   : > { %v6017_v20 = vadd.f32 %v6016_v7, %v6015_v50  ;;  %v7335_v12 = vpop.f32.mrf.mxu0 }
 0x3f5   : > { %v6119_v26 = vsel %vm1518_vm11, %v6083_v2, 0.0  ;;  %v7305_v39 = vpop.f32.mrf.mxu1  ;;  %v9881_v33 = vadd.f32 %v7335_v12, %v5300_v58 }
 0x3f6   : > { %v6019_v57 = vadd.f32 %v6018_v48, %v6017_v20  ;;  %v6120_v27 = vadd.f32 %v6119_v26, %v6118_v46  ;;  %v5880_v52 = vpop.f32.mrf.mxu0 }
 0x3f7   : > { %v9877_v32 = vadd.f32 %v5880_v52, %v5298_v30  ;;  %v5211_v14 = vpop.f32.mrf.mxu1  ;;  %v6088_v20 = vmul.f32 %v9881_v33, %v9881_v33  ;;  %v5304_v52 = vadd.f32 %v7305_v39, %v9751_v6 }
 0x3f8   : > { %v6122_v25 = vadd.f32 %v6121_v34, %v6120_v27  ;;  %v6021_v62 = vadd.f32 %v6020_v10, %v6019_v57  ;;  %v7336_v50 = vpop.f32.mrf.mxu0  ;;  %v5302_v26 = vadd.f32 %v5211_v14, %v9754_v44  ;;  %v6026_v57 = vsel %vm1518_vm11, %v9881_v33, 0.0 }
 0x3f9   : > { %v6022_v3 = vsel %vm1518_vm11, %v9877_v32, 0.0  ;;  %v6086_v1 = vmul.f32 %v9877_v32, %v9877_v32  ;;  %v7306_v8 = vpop.f32.mrf.mxu1  ;;  %v9888_v21 = vadd.f32 %v7336_v50, %v5301_v29  ;;  %v6129_v10 = vsel %vm1518_vm11, %v6088_v20, 0.0 }
 0x3fa   : > { %v6124_v37 = vadd.f32 %v6123_v4, %v6122_v25  ;;  %v6023_v46 = vadd.f32 %v6022_v3, %v6021_v62  ;;  %v5883_v55 = vpop.f32.mrf.mxu0  ;;  %v5305_v62 = vadd.f32 %v7306_v8, %v9757_v49 }
 0x3fb   : > { %v6125_v7 = vsel %vm1518_vm11, %v6086_v1, 0.0  ;;  %v9890_v54 = vadd.f32 %v5883_v55, %v5299_v35  ;;  %v5214_v2 = vpop.f32.mrf.mxu1  ;;  %v6089_v27 = vmul.f32 %v9888_v21, %v9888_v21  ;;  %v6028_v44 = vsel %vm1518_vm11, %v9888_v21, 0.0 }
 0x3fc   : > { %v6126_v30 = vadd.f32 %v6125_v7, %v6124_v37  ;;  %v5303_v50 = vadd.f32 %v5214_v2, %v9759_v15  ;;  %v4327_v1 = vadd.f32 %v9762_v5, %v9646_v0 }
 0x3fd   : > { %v6024_v48 = vsel %vm1518_vm11, %v9890_v54, 0.0  ;;  %v6087_v63 = vmul.f32 %v9890_v54, %v9890_v54 }
 0x3fe   : > { %v6025_v58 = vadd.f32 %v6024_v48, %v6023_v46  ;;  %v6131_v46 = vsel %vm1518_vm11, %v6089_v27, 0.0 }
 0x3ff   : > { %v7339_v12 = vpop.f32.mrf.mxu0  ;;  %v6127_v34 = vsel %vm1518_vm11, %v6087_v63, 0.0  ;;  %v4981_v63 = vadd.f32 %v9766_v18, %v4327_v1 }
 0x400   : > { %v6027_v25 = vadd.f32 %v6026_v57, %v6025_v58  ;;  %v6128_v35 = vadd.f32 %v6127_v34, %v6126_v30  ;;  %v9915_v55 = vadd.f32 %v7339_v12, %v5304_v52 }
 0x401   : > { %v7309_v29 = vpop.f32.mrf.mxu1  ;;  %v5896_v4 = vpop.f32.mrf.mxu0 }
 0x402   : > { %v9908_v14 = vadd.f32 %v5896_v4, %v5302_v26  ;;  %v6130_v6 = vadd.f32 %v6129_v10, %v6128_v35  ;;  %v6029_v39 = vadd.f32 %v6028_v44, %v6027_v25  ;;  %v4328_v26 = vadd.f32 %v9771_v31, %v9664_v41 }
 0x403   : > { %v5227_v3 = vpop.f32.mrf.mxu1  ;;  %v7340_v37 = vpop.f32.mrf.mxu0  ;;  %v5308_v12 = vadd.f32 %v7309_v29, %v9764_v59  ;;  %v6092_v57 = vmul.f32 %v9915_v55, %v9915_v55  ;;  %v6034_v18 = vsel %vm1518_vm11, %v9915_v55, 0.0 }
 0x404   : > { %v6030_v7 = vsel %vm1518_vm11, %v9908_v14, 0.0  ;;  %v6090_v20 = vmul.f32 %v9908_v14, %v9908_v14  ;;  %v6132_v15 = vadd.f32 %v6131_v46, %v6130_v6  ;;  %v9922_v0 = vadd.f32 %v7340_v37, %v5305_v62 }
 0x405   : > { %v7310_v49 = vpop.f32.mrf.mxu1  ;;  %v6031_v8 = vadd.f32 %v6030_v7, %v6029_v39  ;;  %v5899_v2 = vpop.f32.mrf.mxu0  ;;  %v5306_v25 = vadd.f32 %v5227_v3, %v4981_v63  ;;  %v4982_v35 = vadd.f32 %v9773_v16, %v4328_v26 }
 0x406   : > { %v6133_v30 = vsel %vm1518_vm11, %v6090_v20, 0.0  ;;  %v9924_v5 = vadd.f32 %v5899_v2, %v5303_v50  ;;  %v6093_v41 = vmul.f32 %v9922_v0, %v9922_v0  ;;  %v6137_v50 = vsel %vm1518_vm11, %v6092_v57, 0.0 }
 0x407   : > { %v5230_v48 = vpop.f32.mrf.mxu1  ;;  %v6134_v58 = vadd.f32 %v6133_v30, %v6132_v15  ;;  %v5309_v3 = vadd.f32 %v7310_v49, %v9769_v43  ;;  %v6036_v39 = vsel %vm1518_vm11, %v9922_v0, 0.0 }
 0x408   : > { %v6032_v27 = vsel %vm1518_vm11, %v9924_v5, 0.0  ;;  %v6091_v34 = vmul.f32 %v9924_v5, %v9924_v5  ;;  %v5307_v7 = vadd.f32 %v5230_v48, %v4982_v35  ;;  %v6139_v20 = vsel %vm1518_vm11, %v6093_v41, 0.0 }
 0x409   : > { %v7313_v52 = vpop.f32.mrf.mxu1  ;;  %v6033_v10 = vadd.f32 %v6032_v27, %v6031_v8 }
 0x40a   : > { %v6135_v59 = vsel %vm1518_vm11, %v6091_v34, 0.0  ;;  %v7343_v31 = vpop.f32.mrf.mxu0  ;;  %v5312_v34 = vadd.f32 %v7313_v52, %v9777_v13 }
 0x40b   : > { %v5243_v29 = vpop.f32.mrf.mxu1  ;;  %v6035_v4 = vadd.f32 %v6034_v18, %v6033_v10  ;;  %v6136_v44 = vadd.f32 %v6135_v59, %v6134_v58  ;;  %v5993_v62 = vadd.f32 %v7343_v31, %v5308_v12 }
 0x40c   : > { %v5912_v1 = vpop.f32.mrf.mxu0 }
 0x40d   : > { %v7314_v6 = vpop.f32.mrf.mxu1  ;;  %v6138_v37 = vadd.f32 %v6137_v50, %v6136_v44  ;;  %v5991_v46 = vadd.f32 %v5912_v1, %v5306_v25  ;;  %v6037_v8 = vadd.f32 %v6036_v39, %v6035_v4  ;;  %v7418_v2 = vpack.i.bf16 %v5993_v62, %v9817_v51 }
 0x40e   : > { %v7344_v15 = vpop.f32.mrf.mxu0  ;;  %v5310_v25 = vadd.f32 %v5243_v29, %v9780_v42  ;;  %v6096_v41 = vmul.f32 %v5993_v62, %v5993_v62  ;;  %v5313_v42 = vadd.f32 %v7314_v6, %v9783_v53 }
 0x40f   : > { %v5246_v16 = vpop.f32.mrf.mxu1  ;;  %v6038_v30 = vsel %vm1518_vm11, %v5991_v46, 0.0  ;;  %v6094_v63 = vmul.f32 %v5991_v46, %v5991_v46  ;;  %v6140_v26 = vadd.f32 %v6139_v20, %v6138_v37  ;;  %v5994_v43 = vadd.f32 %v7344_v15, %v5309_v3 }
 0x410   : > { %v6039_v58 = vadd.f32 %v6038_v30, %v6037_v8  ;;  %v5915_v49 = vpop.f32.mrf.mxu0  ;;  %v7414_v12 = vpack.i.bf16 %v5991_v46, %v9813_v60  ;;  %v6042_v60 = vsel %vm1518_vm11, %v5993_v62, 0.0  ;;  %v6145_v39 = vsel %vm1518_vm11, %v6096_v41, 0.0 }
 0x411   : > { %v7317_v57 = vpop.f32.mrf.mxu1  ;;  %v6141_v27 = vsel %vm1518_vm11, %v6094_v63, 0.0  ;;  %v5992_v48 = vadd.f32 %v5915_v49, %v5307_v7  ;;  %v7420_v18 = vpack.i.bf16 %v5994_v43, %v9821_v11  ;;  %v6097_v50 = vmul.f32 %v5994_v43, %v5994_v43 }
 0x412   : > { %v6142_v10 = vadd.f32 %v6141_v27, %v6140_v26  ;;  %7415 = vxpose.xlu0.b32.start [1/16] (narrow) %v7414_v12, 8  ;;  %v5311_v62 = vadd.f32 %v5246_v16, %v9785_v24  ;;  %v5316_v27 = vadd.f32 %v7317_v57, %v9788_v19 }
 0x413   : > { %v5259_v51 = vpop.f32.mrf.mxu1  ;;  %v6040_v59 = vsel %vm1518_vm11, %v5992_v48, 0.0  ;;  %v6095_v31 = vmul.f32 %v5992_v48, %v5992_v48  ;;  %v7416_v35 = vpack.i.bf16 %v5992_v48, %v9823_v36  ;;  %v6044_v36 = vsel %vm1518_vm11, %v5994_v43, 0.0 }
 0x414   : > { %v6041_v4 = vadd.f32 %v6040_v59, %v6039_v58  ;;  %v6147_v53 = vsel %vm1518_vm11, %v6097_v50, 0.0 }
 0x415   : > { %v7347_v44 = vpop.f32.mrf.mxu0  ;;  %v6143_v13 = vsel %vm1518_vm11, %v6095_v31, 0.0  ;;  %v7318_v3 = vpop.f32.mrf.mxu1 }
 0x416   : > { %v9958_v52 = vadd.f32 %v7347_v44, %v5312_v34  ;;  %v6043_v29 = vadd.f32 %v6042_v60, %v6041_v4  ;;  %v6144_v1 = vadd.f32 %v6143_v13, %v6142_v10  ;;  %7417 = vxpose.xlu0.b32.cont [2/16] (narrow) %v7416_v35, 8  ;;  %v5317_v50 = vadd.f32 %v7318_v3, %v9794_v47 }
 0x417   : > { %v5928_v11 = vpop.f32.mrf.mxu0  ;;  %v5262_v43 = vpop.f32.mrf.mxu1 }
 0x418   : > { %v5995_v37 = vadd.f32 %v5928_v11, %v5310_v25  ;;  %v6146_v46 = vadd.f32 %v6145_v39, %v6144_v1  ;;  %v6045_v7 = vadd.f32 %v6044_v36, %v6043_v29  ;;  %v7426_v8 = vpack.i.bf16 %v9958_v52, %v9849_v61 }
 0x419   : > { %v7348_v20 = vpop.f32.mrf.mxu0  ;;  %v6100_v34 = vmul.f32 %v9958_v52, %v9958_v52  ;;  %v6050_v31 = vsel %vm1518_vm11, %v9958_v52, 0.0 }
 0x41a   : > { %v6046_v6 = vsel %vm1518_vm11, %v5995_v37, 0.0  ;;  %v6098_v15 = vmul.f32 %v5995_v37, %v5995_v37  ;;  %v9968_v30 = vadd.f32 %v7348_v20, %v5313_v42  ;;  %v6148_v26 = vadd.f32 %v6147_v53, %v6146_v46  ;;  %7419 = vxpose.xlu0.b32.cont [3/16] (narrow) %v7418_v2, 8 }
 0x41b   : > { %v6047_v63 = vadd.f32 %v6046_v6, %v6045_v7  ;;  %v5931_v58 = vpop.f32.mrf.mxu0  ;;  %v7422_v24 = vpack.i.bf16 %v5995_v37, %v9845_v9  ;;  %v5314_v9 = vadd.f32 %v5259_v51, %v9791_v56  ;;  %v5315_v42 = vadd.f32 %v5262_v43, %v9797_v23 }
 0x41c   : > { %v6149_v16 = vsel %vm1518_vm11, %v6098_v15, 0.0  ;;  %v5996_v49 = vadd.f32 %v5931_v58, %v5311_v62  ;;  %v7428_v48 = vpack.i.bf16 %v9968_v30, %v9856_v38  ;;  %v6101_v19 = vmul.f32 %v9968_v30, %v9968_v30 }
 0x41d   : > { %v6150_v12 = vadd.f32 %v6149_v16, %v6148_v26  ;;  %v7321_v59 = vpop.f32.mrf.mxu1  ;;  %v6052_v51 = vsel %vm1518_vm11, %v9968_v30, 0.0 }
 0x41e   : > { %v6048_v10 = vsel %vm1518_vm11, %v5996_v49, 0.0  ;;  %v6099_v25 = vmul.f32 %v5996_v49, %v5996_v49  ;;  %v7424_v2 = vpack.i.bf16 %v5996_v49, %v9858_v40  ;;  %7421 = vxpose.xlu0.b32.cont [4/16] (narrow) %v7420_v18, 8  ;;  %v6153_v40 = vsel %vm1518_vm11, %v6100_v34, 0.0 }
 0x41f   : > { %v6049_v41 = vadd.f32 %v6048_v10, %v6047_v63  ;;  %v5275_v29 = vpop.f32.mrf.mxu1  ;;  %v6155_v1 = vsel %vm1518_vm11, %v6101_v19, 0.0  ;;  %v5320_v63 = vadd.f32 %v7321_v59, %v9801_v45 }
 0x420   : > { %v6151_v57 = vsel %vm1518_vm11, %v6099_v25, 0.0  ;;  %v7351_v35 = vpop.f32.mrf.mxu0  ;;  %v5318_v49 = vadd.f32 %v5275_v29, %v9804_v28 }
 0x421   : > { %v6051_v60 = vadd.f32 %v6050_v31, %v6049_v41  ;;  %v6152_v4 = vadd.f32 %v6151_v57, %v6150_v12  ;;  %v9985_v44 = vadd.f32 %v7351_v35, %v5316_v27  ;;  %v7322_v6 = vpop.f32.mrf.mxu1 }
 0x422   : > { %v5944_v56 = vpop.f32.mrf.mxu0  ;;  %7423 = vxpose.xlu0.b32.cont [5/16] (narrow) %v7422_v24, 8  ;;  %v5321_v28 = vadd.f32 %v7322_v6, %v9807_v17 }
 0x423   : > { %v6154_v18 = vadd.f32 %v6153_v40, %v6152_v4  ;;  %v5999_v13 = vadd.f32 %v5944_v56, %v5314_v9  ;;  %v6053_v11 = vadd.f32 %v6052_v51, %v6051_v60  ;;  %v7434_v36 = vpack.i.bf16 %v9985_v44, %v9881_v33  ;;  %v5278_v10 = vpop.f32.mrf.mxu1 }
 0x424   : > { %v7352_v39 = vpop.f32.mrf.mxu0  ;;  %v6104_v58 = vmul.f32 %v9985_v44, %v9985_v44  ;;  %v6058_v12 = vsel %vm1518_vm11, %v9985_v44, 0.0  ;;  %v5319_v57 = vadd.f32 %v5278_v10, %v9809_v22 }
 0x425   : > { %v6054_v37 = vsel %vm1518_vm11, %v5999_v13, 0.0  ;;  %v6102_v47 = vmul.f32 %v5999_v13, %v5999_v13  ;;  %v6156_v3 = vadd.f32 %v6155_v1, %v6154_v18  ;;  %v9996_v46 = vadd.f32 %v7352_v39, %v5317_v50 }
 0x426   : > { %v6055_v62 = vadd.f32 %v6054_v37, %v6053_v11  ;;  %v5947_v7 = vpop.f32.mrf.mxu0  ;;  %v7430_v20 = vpack.i.bf16 %v5999_v13, %v9877_v32  ;;  %7425 = vxpose.xlu0.b32.cont [6/16] (narrow) %v7424_v2, 8  ;;  %v6161_v41 = vsel %vm1518_vm11, %v6104_v58, 0.0 }
 0x427   : > { %v6157_v23 = vsel %vm1518_vm11, %v6102_v47, 0.0  ;;  %v6000_v53 = vadd.f32 %v5947_v7, %v5315_v42  ;;  %v7436_v26 = vpack.i.bf16 %v9996_v46, %v9888_v21  ;;  %v6105_v45 = vmul.f32 %v9996_v46, %v9996_v46 }
 0x428   : > { %v6158_v15 = vadd.f32 %v6157_v23, %v6156_v3  ;;  %v6060_v59 = vsel %vm1518_vm11, %v9996_v46, 0.0 }
 0x429   : > { %v6056_v43 = vsel %vm1518_vm11, %v6000_v53, 0.0  ;;  %v6103_v24 = vmul.f32 %v6000_v53, %v6000_v53  ;;  %v7432_v16 = vpack.i.bf16 %v6000_v53, %v9890_v54  ;;  %v6163_v35 = vsel %vm1518_vm11, %v6105_v45, 0.0 }
 0x42a   : > { %v6057_v32 = vadd.f32 %v6056_v43, %v6055_v62  ;;  %7427 = vxpose.xlu0.b32.cont [7/16] (narrow) %v7426_v8, 8 }
 0x42b   : > { %v6159_v27 = vsel %vm1518_vm11, %v6103_v24, 0.0  ;;  %v7355_v34 = vpop.f32.mrf.mxu0 }
 0x42c   : > { %v6059_v25 = vadd.f32 %v6058_v12, %v6057_v32  ;;  %v6160_v2 = vadd.f32 %v6159_v27, %v6158_v15  ;;  %v6005_v54 = vadd.f32 %v7355_v34, %v5320_v63 }
 0x42d   : > { %v5960_v9 = vpop.f32.mrf.mxu0 }
 0x42e   : > { %v6162_v31 = vadd.f32 %v6161_v41, %v6160_v2  ;;  %v6003_v19 = vadd.f32 %v5960_v9, %v5318_v49  ;;  %v6061_v60 = vadd.f32 %v6060_v59, %v6059_v25  ;;  %7429 = vxpose.xlu0.b32.cont [8/16] (narrow) %v7428_v48, 8  ;;  %v7442_v52 = vpack.i.bf16 %v6005_v54, %v9915_v55 }
 0x42f   : > { %v7356_v61 = vpop.f32.mrf.mxu0  ;;  %v6108_v38 = vmul.f32 %v6005_v54, %v6005_v54  ;;  %v6066_v1 = vsel %vm1518_vm11, %v6005_v54, 0.0 }
 0x430   : > { %v6062_v17 = vsel %vm1518_vm11, %v6003_v19, 0.0  ;;  %v6106_v8 = vmul.f32 %v6003_v19, %v6003_v19  ;;  %v6164_v4 = vadd.f32 %v6163_v35, %v6162_v31  ;;  %v6006_v50 = vadd.f32 %v7356_v61, %v5321_v28 }
 0x431   : > { %v6063_v40 = vadd.f32 %v6062_v17, %v6061_v60  ;;  %v5963_v56 = vpop.f32.mrf.mxu0  ;;  %v7438_v51 = vpack.i.bf16 %v6003_v19, %v9908_v14  ;;  %v6169_v47 = vsel %vm1518_vm11, %v6108_v38, 0.0 }
 0x432   : > { %v6165_v22 = vsel %vm1518_vm11, %v6106_v8, 0.0  ;;  %v6004_v18 = vadd.f32 %v5963_v56, %v5319_v57  ;;  %7431 = vxpose.xlu0.b32.cont [9/16] (narrow) %v7430_v20, 8  ;;  %v7444_v42 = vpack.i.bf16 %v6006_v50, %v9922_v0  ;;  %v6109_v11 = vmul.f32 %v6006_v50, %v6006_v50 }
 0x433   : > { %v6166_v13 = vadd.f32 %v6165_v22, %v6164_v4  ;;  %v6068_v3 = vsel %vm1518_vm11, %v6006_v50, 0.0 }
 0x434   : > { %v6064_v30 = vsel %vm1518_vm11, %v6004_v18, 0.0  ;;  %v6107_v55 = vmul.f32 %v6004_v18, %v6004_v18  ;;  %v7440_v48 = vpack.i.bf16 %v6004_v18, %v9924_v5  ;;  %v6171_v7 = vsel %vm1518_vm11, %v6109_v11, 0.0 }
 0x435   : > { %v6065_v29 = vadd.f32 %v6064_v30, %v6063_v40 }
 0x436   : > { %v6167_v39 = vsel %vm1518_vm11, %v6107_v55, 0.0  ;;  %7433 = vxpose.xlu0.b32.cont [10/16] (narrow) %v7432_v16, 8 }
 0x437   : > { %v6067_v14 = vadd.f32 %v6066_v1, %v6065_v29  ;;  %v6168_v37 = vadd.f32 %v6167_v39, %v6166_v13 }
 0x439   : > { %v6069_v0 = vadd.f32 %v6068_v3, %v6067_v14  ;;  %v6170_v62 = vadd.f32 %v6169_v47, %v6168_v37 }
 0x43a   : > { %7435 = vxpose.xlu0.b32.cont [11/16] (narrow) %v7434_v36, 8 }
 0x43b   : > { %v6070_v20 = vrot.slane %v6069_v0, 4  ;;  %v6172_v5 = vadd.f32 %v6171_v7, %v6170_v62 }
 0x43d   : > { %v6071_v23 = vadd.f32 %v6070_v20, %v6069_v0  ;;  %v6173_v53 = vrot.slane %v6172_v5, 4 }
 0x43e   : > { %7437 = vxpose.xlu0.b32.cont [12/16] (narrow) %v7436_v26, 8 }
 0x43f   : > { %v6072_v6 = vrot.slane %v6071_v23, 2  ;;  %v6174_v15 = vadd.f32 %v6173_v53, %v6172_v5 }
 0x441   : > { %v6073_v63 = vadd.f32 %v6072_v6, %v6071_v23  ;;  %v6175_v58 = vrot.slane %v6174_v15, 2 }
 0x442   : > { %7439 = vxpose.xlu0.b32.cont [13/16] (narrow) %v7438_v51, 8 }
 0x443   : > { %v6074_v43 = vrot.slane %v6073_v63, 1  ;;  %v6176_v24 = vadd.f32 %v6175_v58, %v6174_v15 }
 0x445   : > { %v6075_v16 = vadd.f32 %v6074_v43, %v6073_v63  ;;  %v6177_v32 = vrot.slane %v6176_v24, 1 }
 0x446   : > { %7441 = vxpose.xlu0.b32.cont [14/16] (narrow) %v7440_v48, 8 }
 0x447   : > { %6077 = vst.msk [vmem:[%s7697_s24] sm:$0x1] %vm690_vm3, %v6075_v16  ;;  %v6178_v33 = vadd.f32 %v6177_v32, %v6176_v24 }
 0x449   : > { %6179 = vst.msk [vmem:[%s7697_s24 + $0x1] sm:$0x1] %vm690_vm3, %v6178_v33 }
 0x44a   : > { %7443 = vxpose.xlu0.b32.cont [15/16] (narrow) %v7442_v52, 8 }
 0x44e   : > { %7445 = vxpose.xlu0.b32.end [16/16] (narrow) %v7444_v42, 8 }
 0x48e   : > { %v7446_v44 = vpop.trf.xlu0 }
 0x48f   : > { %v7450_v36 = vunpack.i.h.bf16 %v7446_v44  ;;  %v7447_v21 = vunpack.i.l.bf16 %v7446_v44 }
 0x491   : > { %v6897_v46 = vpack.c.bf16 %v7450_v36, %v7447_v21 }
 0x493   : > { %6252 = vst [vmem:[%s7690_s21] sm:$0xff] %v6897_v46 }
 0x494 PF: > { %s19_s9 = sadd.s32 1, %s7560_s9   ;;  %s10386_s27 = sld [smem:[#allocation3_spill]] }
 0x495   : > { %p16_p2 = scmp.ge.s32.totalorder %s19_s9, 10   ;;  %s10387_s28 = sld [smem:[#allocation4_spill]] }
 0x496   : > { %s10388_s29 = sld [smem:[#allocation5_spill]] }
 0x497   : > { %s10389_s30 = sld [smem:[#allocation6_spill]]  ;;  %18 = sbr.rel (!%p16_p2) target bundleno = 3 (0x3), region = 125 }

</bundles_post_ra>
